<compile_context>
chip_gen: v5e
topology: v5e:2x2
jax: 0.10.0
libtpu: 0.0.40
codegen_flags: <defaults>
</compile_context>

<pallas_src>
import jax
import jax.numpy as jnp
from jax.experimental import pallas as pl
from jax.experimental.pallas import tpu as pltpu

N = 8        # batch (small test batch; must stay a multiple of the f32 sublane tile 8)
D = 1024     # features: BatchNorm1d(1024) -> Linear(1024, 1024)
EPS = 1e-5


def bn_linear_relu_kernel(x_ref, gamma_ref, beta_ref, w_ref, b_ref, o_ref):
    # x_ref:     (N, D)   f32 input batch (full, constant index_map -> DMA'd once)
    # gamma_ref: (1, D)   f32 BN weight
    # beta_ref:  (1, D)   f32 BN bias
    # w_ref:     (D, TN)  bf16 Linear weight column block, pre-transposed to (in, out)
    # b_ref:     (1, TN)  f32 Linear bias column block
    # o_ref:     (N, TN)  f32 output column block
    x = x_ref[...]

    # --- BatchNorm1d (training-mode batch stats, biased variance), affine folded.
    # Recomputed per column block: trivial (8, 1024) VPU/XLU work, and avoiding
    # cross-step scratch keeps the grid axis safe for (core-)parallel sharding.
    mean = jnp.mean(x, axis=0, keepdims=True)                       # (1, D)
    centered = x - mean                                             # (N, D)
    var = jnp.mean(centered * centered, axis=0, keepdims=True)      # (1, D)
    scale = jax.lax.rsqrt(var + EPS) * gamma_ref[...]               # (1, D) folded affine
    y = (centered * scale + beta_ref[...]).astype(jnp.bfloat16)     # (N, D) bf16 for MXU

    # --- Linear column block: y @ W[:, block] + b[block]  (bf16 MXU, f32 accumulate)
    z = jnp.dot(y, w_ref[...], preferred_element_type=jnp.float32) + b_ref[...]

    # --- ReLU ---
    o_ref[...] = jnp.maximum(z, 0.0).astype(o_ref.dtype)


def _tiling_for_device(d):
    """Pick (TN, dimension_semantics) per TPU generation.

    v7x has 2 TensorCores per chip -> 2 weight column blocks + CORE_PARALLEL so the
    dominant weight stream is split across both cores. v5e/v6e have a single TC, so
    one full-width block avoids a useless extra grid step.
    """
    try:
        kind = jax.devices()[0].device_kind.lower()
    except Exception:
        kind = ""
    is_v7x = ("7" in kind)  # e.g. "tpu7x"
    if is_v7x:
        core_parallel = getattr(pltpu, "CORE_PARALLEL", None)
        sem = (core_parallel,) if core_parallel is not None else ("parallel",)
        return d // 2, sem
    return d, ("parallel",)


def foo_forward(x, gamma, beta, w_t_bf16, b):
    n, d = x.shape
    tn, semantics = _tiling_for_device(d)
    grid = (d // tn,)

    # Actual traffic: bf16 weight once, f32 x once (constant index_map -> single DMA),
    # f32 output once, small f32 params once.
    bytes_accessed = int(
        w_t_bf16.size * 2          # weight (bf16) - dominant
        + x.size * 4               # input
        + n * d * 4                # output
        + (gamma.size + beta.size + b.size) * 4
    )
    cost = pl.CostEstimate(
        flops=2 * n * d * d,
        transcendentals=d,          # rsqrt per feature
        bytes_accessed=bytes_accessed,
    )

    return pl.pallas_call(
        bn_linear_relu_kernel,
        out_shape=jax.ShapeDtypeStruct((n, d), jnp.float32),
        grid=grid,
        in_specs=[
            pl.BlockSpec((n, d), lambda j: (0, 0)),    # x: full batch, fetched once
            pl.BlockSpec((1, d), lambda j: (0, 0)),    # gamma
            pl.BlockSpec((1, d), lambda j: (0, 0)),    # beta
            pl.BlockSpec((d, tn), lambda j: (0, j)),   # weight column block (bf16)
            pl.BlockSpec((1, tn), lambda j: (0, j)),   # bias column block
        ],
        out_specs=pl.BlockSpec((n, tn), lambda j: (0, j)),
        compiler_params=pltpu.CompilerParams(
            dimension_semantics=semantics,
            vmem_limit_bytes=16 << 20,   # generous vs ~2-5 MiB peak; fits v7x scoped VMEM
        ),
        cost_estimate=cost,
    )(x, gamma, beta, w_t_bf16, b)


if __name__ == "__main__":
    key = jax.random.PRNGKey(0)
    kx, kw, kb = jax.random.split(key, 3)

    # Input
    x = jax.random.normal(kx, (N, D), dtype=jnp.float32)

    # BatchNorm1d parameters (PyTorch default init: weight=1, bias=0)
    gamma = jnp.ones((1, D), dtype=jnp.float32)
    beta = jnp.zeros((1, D), dtype=jnp.float32)

    # Linear parameters (PyTorch default init: U(-1/sqrt(in), 1/sqrt(in)))
    bound = 1.0 / jnp.sqrt(jnp.float32(D))
    w = jax.random.uniform(kw, (D, D), jnp.float32, -bound, bound)   # (out, in)
    b = jax.random.uniform(kb, (1, D), jnp.float32, -bound, bound)
    w_t = w.T                               # (in, out) for y @ W
    w_t_bf16 = w_t.astype(jnp.bfloat16)     # halve the dominant HBM weight traffic

    out = jax.block_until_ready(foo_forward(x, gamma, beta, w_t_bf16, b))

    # --- References ---
    mean = jnp.mean(x, axis=0, keepdims=True)
    var = jnp.mean((x - mean) ** 2, axis=0, keepdims=True)
    y_f32 = (x - mean) / jnp.sqrt(var + EPS) * gamma + beta

    # (a) Tight check against a reference using the same bf16 operands (validates the
    #     kernel's math / tiling exactly).
    ref_bf16 = jnp.maximum(
        jnp.dot(y_f32.astype(jnp.bfloat16), w_t_bf16,
                preferred_element_type=jnp.float32) + b, 0.0)
    assert jnp.allclose(out, ref_bf16, atol=1e-4, rtol=1e-4), "mismatch vs bf16-matched reference"

    # (b) Full-f32 PyTorch-equivalent reference; tolerance consciously relaxed because
    #     the weight / BN activation feed the MXU in bf16.
    ref_f32 = jnp.maximum(y_f32 @ w_t + b, 0.0)
    assert jnp.allclose(out, ref_f32, atol=3e-2, rtol=3e-2), "mismatch vs f32 reference"

    print("KERNEL_OK")
</pallas_src>

<mosaic_0001>
module attributes {stable_mosaic.version = 11 : i64} {
  func.func @bn_linear_relu_kernel(%arg0: i32, %arg1: memref<8x1024xf32, #tpu.memory_space<vmem>>, %arg2: memref<1x1024xf32, #tpu.memory_space<vmem>>, %arg3: memref<1x1024xf32, #tpu.memory_space<vmem>>, %arg4: memref<1024x1024xbf16, #tpu.memory_space<vmem>>, %arg5: memref<1x1024xf32, #tpu.memory_space<vmem>>, %arg6: memref<8x1024xf32, #tpu.memory_space<vmem>>) attributes {dimension_semantics = [#tpu.dimension_semantics<parallel>], iteration_bounds = array<i64: 1>, scalar_prefetch = 0 : i64, scratch_operands = 0 : i64, tpu.core_type = #tpu.core_type<tc>, window_params = [{pipeline_mode = #tpu.pipeline_mode<synchronous>, transform_indices = @transform_0, window_bounds = array<i64: 8, 1024>}, {pipeline_mode = #tpu.pipeline_mode<synchronous>, transform_indices = @transform_1, window_bounds = array<i64: 1, 1024>}, {pipeline_mode = #tpu.pipeline_mode<synchronous>, transform_indices = @transform_2, window_bounds = array<i64: 1, 1024>}, {transform_indices = @transform_3, window_bounds = array<i64: 1024, 1024>}, {transform_indices = @transform_4, window_bounds = array<i64: 1, 1024>}, {transform_indices = @transform_5, window_bounds = array<i64: 8, 1024>}]} {
    %c0 = arith.constant 0 : index
    %c0_0 = arith.constant 0 : index
    %0 = vector.load %arg1[%c0, %c0_0] : memref<8x1024xf32, #tpu.memory_space<vmem>>, vector<8x1024xf32>
    %cst = arith.constant dense<0.000000e+00> : vector<1024xf32>
    %1 = vector.multi_reduction <add>, %0, %cst [0] : vector<8x1024xf32> to vector<1024xf32>
    %2 = vector.shape_cast %1 : vector<1024xf32> to vector<1x1024xf32>
    %cst_1 = arith.constant 8.000000e+00 : f32
    %3 = vector.broadcast %cst_1 : f32 to vector<1x1024xf32>
    %4 = arith.divf %2, %3 : vector<1x1024xf32>
    %5 = vector.broadcast %4 : vector<1x1024xf32> to vector<8x1024xf32>
    %6 = arith.subf %0, %5 : vector<8x1024xf32>
    %7 = arith.mulf %6, %6 : vector<8x1024xf32>
    %cst_2 = arith.constant dense<0.000000e+00> : vector<1024xf32>
    %8 = vector.multi_reduction <add>, %7, %cst_2 [0] : vector<8x1024xf32> to vector<1024xf32>
    %9 = vector.shape_cast %8 : vector<1024xf32> to vector<1x1024xf32>
    %cst_3 = arith.constant 8.000000e+00 : f32
    %10 = vector.broadcast %cst_3 : f32 to vector<1x1024xf32>
    %11 = arith.divf %9, %10 : vector<1x1024xf32>
    %cst_4 = arith.constant 9.99999974E-6 : f32
    %12 = vector.broadcast %cst_4 : f32 to vector<1x1024xf32>
    %13 = arith.addf %11, %12 : vector<1x1024xf32>
    %14 = math.rsqrt %13 : vector<1x1024xf32>
    %c0_5 = arith.constant 0 : index
    %c0_6 = arith.constant 0 : index
    %15 = vector.load %arg2[%c0_5, %c0_6] : memref<1x1024xf32, #tpu.memory_space<vmem>>, vector<1x1024xf32>
    %16 = arith.mulf %14, %15 : vector<1x1024xf32>
    %17 = vector.broadcast %16 : vector<1x1024xf32> to vector<8x1024xf32>
    %18 = arith.mulf %6, %17 : vector<8x1024xf32>
    %c0_7 = arith.constant 0 : index
    %c0_8 = arith.constant 0 : index
    %19 = vector.load %arg3[%c0_7, %c0_8] : memref<1x1024xf32, #tpu.memory_space<vmem>>, vector<1x1024xf32>
    %20 = vector.broadcast %19 : vector<1x1024xf32> to vector<8x1024xf32>
    %21 = arith.addf %18, %20 : vector<8x1024xf32>
    %22 = arith.truncf %21 : vector<8x1024xf32> to vector<8x1024xbf16>
    %c0_9 = arith.constant 0 : index
    %c0_10 = arith.constant 0 : index
    %23 = vector.load %arg4[%c0_9, %c0_10] : memref<1024x1024xbf16, #tpu.memory_space<vmem>>, vector<1024x1024xbf16>
    %cst_11 = arith.constant dense<0.000000e+00> : vector<8x1024xf32>
    %24 = tpu.matmul %22, %23, %cst_11 {dimension_numbers = #tpu.dot_dimension_numbers<[1], [0], [0], [1], [0, 0, 1, 1], [], []>} : vector<8x1024xbf16>, vector<1024x1024xbf16>, vector<8x1024xf32> -> vector<8x1024xf32>
    %c0_12 = arith.constant 0 : index
    %c0_13 = arith.constant 0 : index
    %25 = vector.load %arg5[%c0_12, %c0_13] : memref<1x1024xf32, #tpu.memory_space<vmem>>, vector<1x1024xf32>
    %26 = vector.broadcast %25 : vector<1x1024xf32> to vector<8x1024xf32>
    %27 = arith.addf %24, %26 : vector<8x1024xf32>
    %cst_14 = arith.constant 0.000000e+00 : f32
    %28 = vector.broadcast %cst_14 : f32 to vector<8x1024xf32>
    %29 = arith.maximumf %27, %28 : vector<8x1024xf32>
    %c0_15 = arith.constant 0 : index
    %c0_16 = arith.constant 0 : index
    %30 = vector.load %arg6[%c0_15, %c0_16] : memref<8x1024xf32, #tpu.memory_space<vmem>>, vector<8x1024xf32>
    tpu.vector_store %arg6[%c0_15, %c0_16], %29 {strides = array<i32>} : memref<8x1024xf32, #tpu.memory_space<vmem>>, vector<8x1024xf32>,
    return
  }
  func.func @transform_0(%arg0: i32) -> (i32, i32) {
    %c0_i32 = arith.constant 0 : i32
    %c0_i32_0 = arith.constant 0 : i32
    %c0_i32_1 = arith.constant 0 : i32
    return %c0_i32, %c0_i32_0 : i32, i32
  }
  func.func @transform_1(%arg0: i32) -> (i32, i32) {
    %c0_i32 = arith.constant 0 : i32
    %c0_i32_0 = arith.constant 0 : i32
    %c0_i32_1 = arith.constant 0 : i32
    return %c0_i32, %c0_i32_0 : i32, i32
  }
  func.func @transform_2(%arg0: i32) -> (i32, i32) {
    %c0_i32 = arith.constant 0 : i32
    %c0_i32_0 = arith.constant 0 : i32
    %c0_i32_1 = arith.constant 0 : i32
    return %c0_i32, %c0_i32_0 : i32, i32
  }
  func.func @transform_3(%arg0: i32) -> (i32, i32) {
    %c0_i32 = arith.constant 0 : i32
    %c0_i32_0 = arith.constant 0 : i32
    return %c0_i32, %arg0 : i32, i32
  }
  func.func @transform_4(%arg0: i32) -> (i32, i32) {
    %c0_i32 = arith.constant 0 : i32
    %c0_i32_0 = arith.constant 0 : i32
    return %c0_i32, %arg0 : i32, i32
  }
  func.func @transform_5(%arg0: i32) -> (i32, i32) {
    %c0_i32 = arith.constant 0 : i32
    %c0_i32_0 = arith.constant 0 : i32
    return %c0_i32, %arg0 : i32, i32
  }
}

</mosaic_0001>

<bundles_post_ra>
// kernel: tpu_custom_call.1
= control target key start
LH: loop header
LB: loop body
LE: loop exit
PB: predicated region body
PF: predicated region fallthrough
CT: control target
= control target key end

     0   :  { %10 = vsyncpa [#allocation3], 0  ;;  %s7702_s0 = inlined_call_operand.hbm [shape: f32[8,1024], index: 0, kind: input, shape index: {}]   ;;  %s7703_s1 = inlined_call_operand.hbm [shape: f32[1,1024], index: 1, kind: input, shape index: {}]   ;;  %s7704_s2 = inlined_call_operand.hbm [shape: f32[1,1024], index: 2, kind: input, shape index: {}]   ;;  %s7705_s3 = inlined_call_operand.hbm [shape: bf16[1024,1024], index: 3, kind: input, shape index: {}]   ;;  %s7706_s4 = inlined_call_operand.hbm [shape: f32[1,1024], index: 4, kind: input, shape index: {}]   ;;  %s7707_s5 = inlined_call_operand.hbm [shape: f32[8,1024], index: 5, kind: output, shape index: {}]  }
   0x1   :  { %11 = vsyncpa [#allocation6], 0 }
   0x2   :  { %12 = vsyncpa [#allocation9], 0  ;;  %s30_s20 = sshll.u32 %s7703_s1, 4  ;;  %s31_s20 = int_to_ptr.hbm [resolvable:$true] %s30_s20 }
   0x3   :  { %13 = vsyncpa [#allocation4], 0  ;;  %s7096_s21 = smov [#allocation5]   ;;  %s51_s25 = sshll.u32 %s7705_s3, 4  ;;  %s52_s25 = int_to_ptr.hbm [resolvable:$true] %s51_s25 }
   0x4   :  { %s32_s22 = sshll.u32 %s7096_s21, 4  ;;  %s7097_s26 = smov [#allocation8]   ;;  %s33_s22 = int_to_ptr.vmem [resolvable:$true] %s32_s22 }
   0x5   :  { %35 = dma.hbm_to_vmem [thread:$0]  %s31_s20, 128, %s33_s22, [#allocation6]  }
   0x6   :  { %s53_s27 = sshll.u32 %s7097_s26, 4  ;;  %s7098_s28 = smov 512   ;;  %s54_s27 = int_to_ptr.vmem [resolvable:$true] %s53_s27 }
   0x7   :  { %s7099_s29 = smov 32   ;;  %s19_s1 = sshll.u32 %s7702_s0, 4  ;;  %s20_s1 = int_to_ptr.hbm [resolvable:$true] %s19_s1 }
   0x8   :  { %59 = dma.hbm_to_vmem [thread:$0]  %s52_s25, 65536, %s54_s27, [#allocation9], %s7098_s28, %s7098_s28, %s7099_s29  }
   0x9   :  { %s7100_s7 = smov [#allocation2]   ;;  %s41_s3 = sshll.u32 %s7704_s2, 4  ;;  %s42_s3 = int_to_ptr.hbm [resolvable:$true] %s41_s3 }
   0xa   :  { %s21_s8 = sshll.u32 %s7100_s7, 4  ;;  %s7101_s11 = smov [#allocation7]   ;;  %s22_s8 = int_to_ptr.vmem [resolvable:$true] %s21_s8 }
   0xb   :  { %24 = dma.hbm_to_vmem [thread:$0]  %s20_s1, 1024, %s22_s8, [#allocation3]  }
   0xc   :  { %s43_s12 = sshll.u32 %s7101_s11, 4  ;;  %s65_s15 = sshll.u32 %s7706_s4, 4  ;;  %s44_s12 = int_to_ptr.vmem [resolvable:$true] %s43_s12  ;;  %s66_s15 = int_to_ptr.hbm [resolvable:$true] %s65_s15 }
   0xd   :  { %46 = dma.hbm_to_vmem [thread:$0]  %s42_s3, 128, %s44_s12, [#allocation6]  }
   0xe   :  { %s7102_s0 = smov [#allocation10]  }
   0xf   :  { %s67_s16 = sshll.u32 %s7102_s0, 4  ;;  %s68_s16 = int_to_ptr.vmem [resolvable:$true] %s67_s16 }
  0x10   :  { %70 = dma.hbm_to_vmem [thread:$0]  %s66_s15, 128, %s68_s16, [#allocation9]  }
  0x11   :  { %7088 = dma.done.wait [#allocation3], 1024  }
  0x12   :  { %7089 = vsyncadd [#allocation3], 4294966272 }
  0x13   :  { %7090 = dma.done.wait [#allocation6], 256  }
  0x14   :  { %7091 = vsyncadd [#allocation6], 4294967040 }
  0x15   :  { %7092 = dma.done.wait [#allocation9], 65664  }
  0x16   :  { %7093 = vsyncadd [#allocation9], 4294901632  ;;  %v4581_v0 = vld [vmem:[#allocation8 + $0x1c0] sm:$0xf]  ;;  %s7104_s2 = smov [#allocation11]   ;;  %s4343_s19 = sshll.u32 %s7707_s5, 4  ;;  %s4344_s19 = int_to_ptr.hbm [resolvable:$true] %s4343_s19 }
  0x17   :  { %v6463_v1 = vld [vmem:[#allocation8 + $0x1dc] sm:$0xf0]  ;;  %s4341_s4 = sshll.u32 %s7104_s2, 4  ;;  %s4342_s4 = int_to_ptr.vmem [resolvable:$true] %s4341_s4 }
  0x18   :  { %v4837_v2 = vld [vmem:[#allocation8 + $0x3c0] sm:$0xf]  ;;  %v4582_v3 = vor.u32 %v6463_v1, %v4581_v0 }
  0x19   :  { %v6527_v4 = vld [vmem:[#allocation8 + $0x3dc] sm:$0xf0] }
  0x1a   :  { %v5093_v5 = vld [vmem:[#allocation8 + $0x5c0] sm:$0xf]  ;;  %v4838_v7 = vor.u32 %v6527_v4, %v4837_v2  ;;  %3488 = vmatpush.bf16.msra.mxu0 %v4582_v3 }
  0x1b   :  { %v6591_v6 = vld [vmem:[#allocation8 + $0x5dc] sm:$0xf0] }
  0x1c   :  { %v5094_v8 = vor.u32 %v6591_v6, %v5093_v5  ;;  %v5349_v9 = vld [vmem:[#allocation8 + $0x7c0] sm:$0xf]  ;;  %3501 = vmatpush.bf16.msra.mxu1 %v4838_v7 }
  0x1d   :  { %v6655_v10 = vld [vmem:[#allocation8 + $0x7dc] sm:$0xf0] }
  0x1e   :  { %v4549_v11 = vld [vmem:[#allocation8 + $0x180] sm:$0xf]  ;;  %v5350_v12 = vor.u32 %v6655_v10, %v5349_v9  ;;  %3514 = vmatpush.bf16.msra.mxu2 %v5094_v8 }
  0x1f   :  { %v6455_v13 = vld [vmem:[#allocation8 + $0x19c] sm:$0xf0] }
  0x20   :  { %v4805_v14 = vld [vmem:[#allocation8 + $0x380] sm:$0xf]  ;;  %v4550_v16 = vor.u32 %v6455_v13, %v4549_v11  ;;  %3527 = vmatpush.bf16.msra.mxu3 %v5350_v12 }
  0x21   :  { %v6519_v15 = vld [vmem:[#allocation8 + $0x39c] sm:$0xf0] }
  0x22   :  { %v4806_v17 = vor.u32 %v6519_v15, %v4805_v14  ;;  %v5061_v18 = vld [vmem:[#allocation8 + $0x580] sm:$0xf]  ;;  %3489 = vmatpush.bf16.msra.mxu0 %v4550_v16 }
  0x23   :  { %v6583_v19 = vld [vmem:[#allocation8 + $0x59c] sm:$0xf0] }
  0x24   :  { %v5317_v20 = vld [vmem:[#allocation8 + $0x780] sm:$0xf]  ;;  %v5062_v21 = vor.u32 %v6583_v19, %v5061_v18  ;;  %3502 = vmatpush.bf16.msra.mxu1 %v4806_v17 }
  0x25   :  { %v6647_v22 = vld [vmem:[#allocation8 + $0x79c] sm:$0xf0] }
  0x26   :  { %v4517_v23 = vld [vmem:[#allocation8 + $0x140] sm:$0xf]  ;;  %v5318_v25 = vor.u32 %v6647_v22, %v5317_v20  ;;  %3515 = vmatpush.bf16.msra.mxu2 %v5062_v21 }
  0x27   :  { %v6447_v24 = vld [vmem:[#allocation8 + $0x15c] sm:$0xf0] }
  0x28   :  { %v4773_v26 = vld [vmem:[#allocation8 + $0x340] sm:$0xf]  ;;  %v4518_v29 = vor.u32 %v6447_v24, %v4517_v23  ;;  %3528 = vmatpush.bf16.msra.mxu3 %v5318_v25 }
  0x29   :  { %v6511_v27 = vld [vmem:[#allocation8 + $0x35c] sm:$0xf0] }
  0x2a   :  { %v5029_v28 = vld [vmem:[#allocation8 + $0x540] sm:$0xf]  ;;  %v4774_v33 = vor.u32 %v6511_v27, %v4773_v26  ;;  %3490 = vmatpush.bf16.msra.mxu0 %v4518_v29 }
  0x2b   :  { %v6575_v30 = vld [vmem:[#allocation8 + $0x55c] sm:$0xf0] }
  0x2c   :  { %v5285_v31 = vld [vmem:[#allocation8 + $0x740] sm:$0xf]  ;;  %v5030_v34 = vor.u32 %v6575_v30, %v5029_v28  ;;  %3503 = vmatpush.bf16.msra.mxu1 %v4774_v33 }
  0x2d   :  { %v6639_v32 = vld [vmem:[#allocation8 + $0x75c] sm:$0xf0] }
  0x2e   :  { %v4485_v35 = vld [vmem:[#allocation8 + $0x100] sm:$0xf]  ;;  %v5286_v38 = vor.u32 %v6639_v32, %v5285_v31  ;;  %3516 = vmatpush.bf16.msra.mxu2 %v5030_v34 }
  0x2f   :  { %v6439_v36 = vld [vmem:[#allocation8 + $0x11c] sm:$0xf0] }
  0x30   :  { %v4741_v37 = vld [vmem:[#allocation8 + $0x300] sm:$0xf]  ;;  %v4486_v44 = vor.u32 %v6439_v36, %v4485_v35  ;;  %3529 = vmatpush.bf16.msra.mxu3 %v5286_v38 }
  0x31   :  { %v6503_v39 = vld [vmem:[#allocation8 + $0x31c] sm:$0xf0] }
  0x32   :  { %v4997_v40 = vld [vmem:[#allocation8 + $0x500] sm:$0xf]  ;;  %v4742_v45 = vor.u32 %v6503_v39, %v4741_v37  ;;  %3491 = vmatpush.bf16.msra.mxu0 %v4486_v44 }
  0x33   :  { %v6567_v41 = vld [vmem:[#allocation8 + $0x51c] sm:$0xf0] }
  0x34   :  { %v5253_v42 = vld [vmem:[#allocation8 + $0x700] sm:$0xf]  ;;  %v4998_v46 = vor.u32 %v6567_v41, %v4997_v40  ;;  %3504 = vmatpush.bf16.msra.mxu1 %v4742_v45 }
  0x35   :  { %v6631_v43 = vld [vmem:[#allocation8 + $0x71c] sm:$0xf0] }
  0x36   :  { %v4453_v47 = vld [vmem:[#allocation8 + $0xc0] sm:$0xf]  ;;  %v5254_v50 = vor.u32 %v6631_v43, %v5253_v42  ;;  %3517 = vmatpush.bf16.msra.mxu2 %v4998_v46 }
  0x37   :  { %v6431_v48 = vld [vmem:[#allocation8 + $0xdc] sm:$0xf0] }
  0x38   :  { %v4709_v49 = vld [vmem:[#allocation8 + $0x2c0] sm:$0xf]  ;;  %v4454_v56 = vor.u32 %v6431_v48, %v4453_v47  ;;  %3530 = vmatpush.bf16.msra.mxu3 %v5254_v50 }
  0x39   :  { %v6495_v51 = vld [vmem:[#allocation8 + $0x2dc] sm:$0xf0] }
  0x3a   :  { %v4965_v52 = vld [vmem:[#allocation8 + $0x4c0] sm:$0xf]  ;;  %v4710_v57 = vor.u32 %v6495_v51, %v4709_v49  ;;  %3492 = vmatpush.bf16.msra.mxu0 %v4454_v56 }
  0x3b   :  { %v6559_v53 = vld [vmem:[#allocation8 + $0x4dc] sm:$0xf0] }
  0x3c   :  { %v5221_v54 = vld [vmem:[#allocation8 + $0x6c0] sm:$0xf]  ;;  %v4966_v58 = vor.u32 %v6559_v53, %v4965_v52  ;;  %3505 = vmatpush.bf16.msra.mxu1 %v4710_v57 }
  0x3d   :  { %v6623_v55 = vld [vmem:[#allocation8 + $0x6dc] sm:$0xf0] }
  0x3e   :  { %v4421_v59 = vld [vmem:[#allocation8 + $0x80] sm:$0xf]  ;;  %v5222_v62 = vor.u32 %v6623_v55, %v5221_v54  ;;  %3518 = vmatpush.bf16.msra.mxu2 %v4966_v58 }
  0x3f   :  { %v6423_v60 = vld [vmem:[#allocation8 + $0x9c] sm:$0xf0] }
  0x40   :  { %v4677_v61 = vld [vmem:[#allocation8 + $0x280] sm:$0xf]  ;;  %v4422_v4 = vor.u32 %v6423_v60, %v4421_v59  ;;  %3531 = vmatpush.bf16.msra.mxu3 %v5222_v62 }
  0x41   :  { %v6487_v63 = vld [vmem:[#allocation8 + $0x29c] sm:$0xf0] }
  0x42   :  { %v4933_v0 = vld [vmem:[#allocation8 + $0x480] sm:$0xf]  ;;  %v4678_v5 = vor.u32 %v6487_v63, %v4677_v61  ;;  %3493 = vmatpush.bf16.msra.mxu0 %v4422_v4 }
  0x43   :  { %v6551_v1 = vld [vmem:[#allocation8 + $0x49c] sm:$0xf0] }
  0x44   :  { %v5189_v2 = vld [vmem:[#allocation8 + $0x680] sm:$0xf]  ;;  %v4934_v6 = vor.u32 %v6551_v1, %v4933_v0  ;;  %3506 = vmatpush.bf16.msra.mxu1 %v4678_v5 }
  0x45   :  { %v6615_v3 = vld [vmem:[#allocation8 + $0x69c] sm:$0xf0] }
  0x46   :  { %v4389_v7 = vld [vmem:[#allocation8 + $0x40] sm:$0xf]  ;;  %v5190_v10 = vor.u32 %v6615_v3, %v5189_v2  ;;  %3519 = vmatpush.bf16.msra.mxu2 %v4934_v6 }
  0x47   :  { %v6415_v8 = vld [vmem:[#allocation8 + $0x5c] sm:$0xf0] }
  0x48   :  { %v4645_v9 = vld [vmem:[#allocation8 + $0x240] sm:$0xf]  ;;  %v4390_v16 = vor.u32 %v6415_v8, %v4389_v7  ;;  %3532 = vmatpush.bf16.msra.mxu3 %v5190_v10 }
  0x49   :  { %v6479_v11 = vld [vmem:[#allocation8 + $0x25c] sm:$0xf0] }
  0x4a   :  { %v4901_v12 = vld [vmem:[#allocation8 + $0x440] sm:$0xf]  ;;  %v4646_v19 = vor.u32 %v6479_v11, %v4645_v9  ;;  %3494 = vmatpush.bf16.msra.mxu0 %v4390_v16 }
  0x4b   :  { %v6543_v13 = vld [vmem:[#allocation8 + $0x45c] sm:$0xf0] }
  0x4c   :  { %v5157_v14 = vld [vmem:[#allocation8 + $0x640] sm:$0xf]  ;;  %v4902_v20 = vor.u32 %v6543_v13, %v4901_v12  ;;  %3507 = vmatpush.bf16.msra.mxu1 %v4646_v19 }
  0x4d   :  { %v6607_v15 = vld [vmem:[#allocation8 + $0x65c] sm:$0xf0] }
  0x4e   :  { %v4357_v17 = vld [vmem:[#allocation8] sm:$0xf]  ;;  %v5158_v24 = vor.u32 %v6607_v15, %v5157_v14  ;;  %3520 = vmatpush.bf16.msra.mxu2 %v4902_v20 }
  0x4f   :  { %v6407_v18 = vld [vmem:[#allocation8 + $0x1c] sm:$0xf0] }
  0x50   :  { %v4613_v21 = vld [vmem:[#allocation8 + $0x200] sm:$0xf]  ;;  %v4358_v31 = vor.u32 %v6407_v18, %v4357_v17  ;;  %3533 = vmatpush.bf16.msra.mxu3 %v5158_v24 }
  0x51   :  { %v6471_v22 = vld [vmem:[#allocation8 + $0x21c] sm:$0xf0] }
  0x52   :  { %v4869_v23 = vld [vmem:[#allocation8 + $0x400] sm:$0xf]  ;;  %v4614_v35 = vor.u32 %v6471_v22, %v4613_v21  ;;  %3495 = vmatpush.bf16.msra.mxu0 %v4358_v31 }
  0x53   :  { %v6535_v25 = vld [vmem:[#allocation8 + $0x41c] sm:$0xf0] }
  0x54   :  { %v5125_v26 = vld [vmem:[#allocation8 + $0x600] sm:$0xf]  ;;  %v4870_v36 = vor.u32 %v6535_v25, %v4869_v23  ;;  %3508 = vmatpush.bf16.msra.mxu1 %v4614_v35 }
  0x55   :  { %v6599_v27 = vld [vmem:[#allocation8 + $0x61c] sm:$0xf0] }
  0x56   :  { %v5605_v28 = vld [vmem:[#allocation8 + $0x9c0] sm:$0xf]  ;;  %v5126_v39 = vor.u32 %v6599_v27, %v5125_v26  ;;  %3521 = vmatpush.bf16.msra.mxu2 %v4870_v36  ;;  %v7103_v36 = vmov 8.0  }
  0x57   :  { %v6719_v29 = vld [vmem:[#allocation8 + $0x9dc] sm:$0xf0]  ;;  %6924 = vrcp.f32 %v7103_v36 }
  0x58   :  { %v5861_v30 = vld [vmem:[#allocation8 + $0xbc0] sm:$0xf]  ;;  %v5606_v40 = vor.u32 %v6719_v29, %v5605_v28  ;;  %3534 = vmatpush.bf16.msra.mxu3 %v5126_v39  ;;  %v7193_v39 = vld [vmem:[#allocation2 + $0x18] sm:$0xff] }
  0x59   :  { %v6783_v32 = vld [vmem:[#allocation8 + $0xbdc] sm:$0xf0] }
  0x5a   :  { %v6117_v33 = vld [vmem:[#allocation8 + $0xdc0] sm:$0xf]  ;;  %v5862_v41 = vor.u32 %v6783_v32, %v5861_v30  ;;  %3540 = vmatpush.bf16.msrb.mxu0 %v5606_v40  ;;  %v7182_v32 = vld [vmem:[#allocation2] sm:$0xff] }
  0x5b   :  { %v6847_v34 = vld [vmem:[#allocation8 + $0xddc] sm:$0xf0]  ;;  %v99_v35 = vrot.slane %v7182_v32, 4 }
  0x5c   :  { %v6373_v37 = vld [vmem:[#allocation8 + $0xfc0] sm:$0xf]  ;;  %v6118_v42 = vor.u32 %v6847_v34, %v6117_v33  ;;  %3553 = vmatpush.bf16.msrb.mxu1 %v5862_v41 }
  0x5d   :  { %v6911_v38 = vld [vmem:[#allocation8 + $0xfdc] sm:$0xf0] }
  0x5e   :  { %v5573_v43 = vld [vmem:[#allocation8 + $0x980] sm:$0xf]  ;;  %v6374_v46 = vor.u32 %v6911_v38, %v6373_v37  ;;  %3566 = vmatpush.bf16.msrb.mxu2 %v6118_v42  ;;  %v7189_v37 = vld [vmem:[#allocation2 + $0x8] sm:$0xff] }
  0x5f   :  { %v6711_v44 = vld [vmem:[#allocation8 + $0x99c] sm:$0xf0]  ;;  %v105_v41 = vrot.slane %v7189_v37, 4 }
  0x60   :  { %v5829_v45 = vld [vmem:[#allocation8 + $0xb80] sm:$0xf]  ;;  %v5574_v52 = vor.u32 %v6711_v44, %v5573_v43  ;;  %3579 = vmatpush.bf16.msrb.mxu3 %v6374_v46  ;;  %v117_v43 = vrot.slane %v7193_v39, 4  ;;  %v7200_v44 = vld [vmem:[#allocation2 + $0x20] sm:$0xff] }
  0x61   :  { %v6775_v47 = vld [vmem:[#allocation8 + $0xb9c] sm:$0xf0] }
  0x62   :  { %v6085_v48 = vld [vmem:[#allocation8 + $0xd80] sm:$0xf]  ;;  %v5830_v55 = vor.u32 %v6775_v47, %v5829_v45  ;;  %3541 = vmatpush.bf16.msrb.mxu0 %v5574_v52  ;;  %v100_v47 = vadd.f32 %v99_v35, %v7182_v32 }
  0x63   :  { %v6839_v49 = vld [vmem:[#allocation8 + $0xd9c] sm:$0xf0] }
  0x64   :  { %v6341_v50 = vld [vmem:[#allocation8 + $0xf80] sm:$0xf]  ;;  %v6086_v56 = vor.u32 %v6839_v49, %v6085_v48  ;;  %3554 = vmatpush.bf16.msrb.mxu1 %v5830_v55  ;;  %v123_v48 = vrot.slane %v7200_v44, 4  ;;  %v118_v55 = vadd.f32 %v117_v43, %v7193_v39 }
  0x65   :  { %v6903_v51 = vld [vmem:[#allocation8 + $0xf9c] sm:$0xf0] }
  0x66   :  { %v5541_v53 = vld [vmem:[#allocation8 + $0x940] sm:$0xf]  ;;  %v6342_v60 = vor.u32 %v6903_v51, %v6341_v50  ;;  %3567 = vmatpush.bf16.msrb.mxu2 %v6086_v56  ;;  %v7209_v50 = vld [vmem:[#allocation2 + $0x28] sm:$0xff] }
  0x67   :  { %v6703_v54 = vld [vmem:[#allocation8 + $0x95c] sm:$0xf0] }
  0x68   :  { %v5797_v57 = vld [vmem:[#allocation8 + $0xb40] sm:$0xf]  ;;  %v5542_v5 = vor.u32 %v6703_v54, %v5541_v53  ;;  %3580 = vmatpush.bf16.msrb.mxu3 %v6342_v60  ;;  %v106_v53 = vadd.f32 %v105_v41, %v7189_v37  ;;  %v124_v60 = vadd.f32 %v123_v48, %v7200_v44 }
  0x69   :  { %v6767_v58 = vld [vmem:[#allocation8 + $0xb5c] sm:$0xf0] }
  0x6a   :  { %v6053_v59 = vld [vmem:[#allocation8 + $0xd40] sm:$0xf]  ;;  %v5798_v9 = vor.u32 %v6767_v58, %v5797_v57  ;;  %3542 = vmatpush.bf16.msrb.mxu0 %v5542_v5 }
  0x6b   :  { %v6831_v61 = vld [vmem:[#allocation8 + $0xd5c] sm:$0xf0] }
  0x6c   :  { %v6309_v62 = vld [vmem:[#allocation8 + $0xf40] sm:$0xf]  ;;  %v6054_v10 = vor.u32 %v6831_v61, %v6053_v59  ;;  %3555 = vmatpush.bf16.msrb.mxu1 %v5798_v9  ;;  %v101_v59 = vrot.slane %v100_v47, 2 }
  0x6d   :  { %v6895_v63 = vld [vmem:[#allocation8 + $0xf5c] sm:$0xf0] }
  0x6e   :  { %v5509_v0 = vld [vmem:[#allocation8 + $0x900] sm:$0xf]  ;;  %v6310_v14 = vor.u32 %v6895_v63, %v6309_v62  ;;  %3568 = vmatpush.bf16.msrb.mxu2 %v6054_v10  ;;  %v107_v62 = vrot.slane %v106_v53, 2 }
  0x6f   :  { %v6695_v1 = vld [vmem:[#allocation8 + $0x91c] sm:$0xf0] }
  0x70   :  { %v5765_v2 = vld [vmem:[#allocation8 + $0xb00] sm:$0xf]  ;;  %v5510_v21 = vor.u32 %v6695_v1, %v5509_v0  ;;  %3581 = vmatpush.bf16.msrb.mxu3 %v6310_v14  ;;  %v119_v0 = vrot.slane %v118_v55, 2  ;;  %v129_v1 = vrot.slane %v7209_v50, 4 }
  0x71   :  { %v6759_v3 = vld [vmem:[#allocation8 + $0xb1c] sm:$0xf0] }
  0x72   :  { %v6021_v4 = vld [vmem:[#allocation8 + $0xd00] sm:$0xf]  ;;  %v5766_v22 = vor.u32 %v6759_v3, %v5765_v2  ;;  %3543 = vmatpush.bf16.msrb.mxu0 %v5510_v21  ;;  %v7223_v2 = vpop.eup %6924 }
  0x73   :  { %v6823_v6 = vld [vmem:[#allocation8 + $0xd1c] sm:$0xf0]  ;;  %vm152_vm0 = vweird.f32 %v7223_v2 }
  0x74   :  { %v6277_v7 = vld [vmem:[#allocation8 + $0xf00] sm:$0xf]  ;;  %v6022_v23 = vor.u32 %v6823_v6, %v6021_v4  ;;  %3556 = vmatpush.bf16.msrb.mxu1 %v5766_v22  ;;  %v102_v6 = vadd.f32 %v101_v59, %v100_v47 }
  0x75   :  { %v6887_v8 = vld [vmem:[#allocation8 + $0xf1c] sm:$0xf0] }
  0x76   :  { %v7150_v11 = vld [vmem:[#allocation8 + $0x8c0] sm:$0xf]  ;;  %v6278_v27 = vor.u32 %v6887_v8, %v6277_v7  ;;  %3569 = vmatpush.bf16.msrb.mxu2 %v6022_v23  ;;  %v125_v7 = vrot.slane %v124_v60, 2 }
  0x77   :  { %v7152_v12 = vld [vmem:[#allocation8 + $0x8dc] sm:$0xf0] }
  0x78   :  { %v7154_v13 = vld [vmem:[#allocation8 + $0xac0] sm:$0xf]  ;;  %v5478_v28 = vor.u32 %v7152_v12, %v7150_v11  ;;  %3582 = vmatpush.bf16.msrb.mxu3 %v6278_v27  ;;  %v148_v12 = vmul.f32 8.0, %v7223_v2 }
  0x79   :  { %v7156_v15 = vld [vmem:[#allocation8 + $0xadc] sm:$0xf0] }
  0x7a   :  { %v7158_v16 = vld [vmem:[#allocation8 + $0xcc0] sm:$0xf]  ;;  %v5734_v29 = vor.u32 %v7156_v15, %v7154_v13  ;;  %3544 = vmatpush.bf16.msrb.mxu0 %v5478_v28  ;;  %v108_v13 = vadd.f32 %v107_v62, %v106_v53  ;;  %v149_v22 = vsub.f32 1.0, %v148_v12 }
  0x7b   :  { %v7160_v17 = vld [vmem:[#allocation8 + $0xcdc] sm:$0xf0] }
  0x7c   :  { %v7162_v18 = vld [vmem:[#allocation8 + $0xec0] sm:$0xf]  ;;  %v5990_v33 = vor.u32 %v7160_v17, %v7158_v16  ;;  %3557 = vmatpush.bf16.msrb.mxu1 %v5734_v29  ;;  %v103_v17 = vrot.slane %v102_v6, 1  ;;  %v109_v23 = vrot.slane %v108_v13, 1  ;;  %v150_v41 = vmul.f32 %v7223_v2, %v149_v22 }
  0x7d   :  { %v7164_v19 = vld [vmem:[#allocation8 + $0xedc] sm:$0xf0] }
  0x7e   :  { %v7166_v20 = vld [vmem:[#allocation8 + $0x880] sm:$0xf]  ;;  %v6246_v34 = vor.u32 %v7164_v19, %v7162_v18  ;;  %3570 = vmatpush.bf16.msrb.mxu2 %v5990_v33  ;;  %v120_v18 = vadd.f32 %v119_v0, %v118_v55  ;;  %v126_v19 = vadd.f32 %v125_v7, %v124_v60  ;;  %v104_v47 = vadd.f32 %v103_v17, %v102_v6 }
  0x7f   :  { %v7168_v24 = vld [vmem:[#allocation8 + $0x89c] sm:$0xf0]  ;;  %v110_v48 = vadd.f32 %v109_v23, %v108_v13 }
  0x80   :  { %v7170_v25 = vld [vmem:[#allocation8 + $0xa80] sm:$0xf]  ;;  %v5446_v40 = vor.u32 %v7168_v24, %v7166_v20  ;;  %3583 = vmatpush.bf16.msrb.mxu3 %v6246_v34  ;;  %v121_v28 = vrot.slane %v120_v18, 1  ;;  %v127_v29 = vrot.slane %v126_v19, 1 }
  0x81   :  { %v7172_v26 = vld [vmem:[#allocation8 + $0xa9c] sm:$0xf0] }
  0x82   :  { %v7178_v30 = vld [vmem:[#allocation8 + $0xc80] sm:$0xf]  ;;  %v5702_v46 = vor.u32 %v7172_v26, %v7170_v25  ;;  %v130_v25 = vadd.f32 %v129_v1, %v7209_v50  ;;  %3545 = vmatpush.bf16.msrb.mxu0 %v5446_v40 }
  0x83   :  { %v7180_v31 = vld [vmem:[#allocation8 + $0xc9c] sm:$0xf0] }
  0x84   :  { %v7191_v38 = vld [vmem:[#allocation2 + $0x10] sm:$0xff]  ;;  %v5958_v56 = vor.u32 %v7180_v31, %v7178_v30  ;;  %3558 = vmatpush.bf16.msrb.mxu1 %v5702_v46  ;;  %v151_v46 = vadd.f32 %v7223_v2, %v150_v41 }
  0x85   :  { %v111_v42 = vrot.slane %v7191_v38, 4  ;;  %v7202_v45 = vld [vmem:[#allocation2 + $0x30] sm:$0xff] }
  0x86   :  { %v135_v49 = vrot.slane %v7202_v45, 4  ;;  %v6213_v51 = vld [vmem:[#allocation8 + $0xe80] sm:$0xf]  ;;  %3571 = vmatpush.bf16.msrb.mxu2 %v5958_v56  ;;  %v7237_v60 = vsel %vm152_vm0, %v7223_v2, %v151_v46 }
  0x87   :  { %v6871_v52 = vld [vmem:[#allocation8 + $0xe9c] sm:$0xf0]  ;;  %v112_v54 = vadd.f32 %v111_v42, %v7191_v38  ;;  %v155_v62 = vmul.f32 %v7237_v60, %v110_v48 }
  0x88   :  { %v7216_v57 = vld [vmem:[#allocation8 + $0x840] sm:$0xf]  ;;  %v136_v61 = vadd.f32 %v135_v49, %v7202_v45  ;;  %v6214_v3 = vor.u32 %v6871_v52, %v6213_v51  ;;  %v122_v51 = vadd.f32 %v121_v28, %v120_v18  ;;  %v128_v52 = vadd.f32 %v127_v29, %v126_v19 }
  0x89   :  { %v7218_v58 = vld [vmem:[#allocation8 + $0x85c] sm:$0xf0]  ;;  %v113_v63 = vrot.slane %v112_v54, 2  ;;  %v7250_v6 = vsub.f32 %v7189_v37, %v155_v62 }
  0x8a   :  { %v5669_v4 = vld [vmem:[#allocation8 + $0xa40] sm:$0xf]  ;;  %v137_v8 = vrot.slane %v136_v61, 2  ;;  %v5414_v9 = vor.u32 %v7218_v58, %v7216_v57  ;;  %3584 = vmatpush.bf16.msrb.mxu3 %v6214_v3  ;;  %v7232_v57 = vld [vmem:[#allocation2 + $0x38] sm:$0xff]  ;;  %v157_v0 = vmul.f32 %v7237_v60, %v122_v51  ;;  %v158_v1 = vmul.f32 %v7237_v60, %v128_v52 }
  0x8b   :  { %v6735_v5 = vld [vmem:[#allocation8 + $0xa5c] sm:$0xf0]  ;;  %v114_v14 = vadd.f32 %v113_v63, %v112_v54  ;;  %v131_v54 = vrot.slane %v130_v25, 2  ;;  %v171_v37 = vmul.f32 %v7250_v6, %v7250_v6 }
  0x8c   :  { %v5925_v10 = vld [vmem:[#allocation8 + $0xc40] sm:$0xf]  ;;  %v138_v20 = vadd.f32 %v137_v8, %v136_v61  ;;  %v5670_v26 = vor.u32 %v6735_v5, %v5669_v4  ;;  %3546 = vmatpush.bf16.msrb.mxu0 %v5414_v9  ;;  %v154_v61 = vmul.f32 %v7237_v60, %v104_v47  ;;  %v141_v5 = vrot.slane %v7232_v57, 4 }
  0x8d   :  { %v6799_v11 = vld [vmem:[#allocation8 + $0xc5c] sm:$0xf0]  ;;  %v115_v24 = vrot.slane %v114_v14, 1  ;;  %v132_v4 = vadd.f32 %v131_v54, %v130_v25  ;;  %v7256_v8 = vsub.f32 %v7193_v39, %v157_v0  ;;  %v7259_v9 = vsub.f32 %v7200_v44, %v158_v1 }
  0x8e   :  { %v6181_v15 = vld [vmem:[#allocation8 + $0xe40] sm:$0xf]  ;;  %v139_v30 = vrot.slane %v138_v20, 1  ;;  %v5926_v31 = vor.u32 %v6799_v11, %v5925_v10  ;;  %3559 = vmatpush.bf16.msrb.mxu1 %v5670_v26  ;;  %v7247_v2 = vsub.f32 %v7182_v32, %v154_v61  ;;  %v184_v13 = vrot.slane %v171_v37, 4 }
  0x8f   :  { %v6863_v16 = vld [vmem:[#allocation8 + $0xe5c] sm:$0xf0]  ;;  %v116_v49 = vadd.f32 %v115_v24, %v114_v14  ;;  %v173_v39 = vmul.f32 %v7256_v8, %v7256_v8  ;;  %v174_v44 = vmul.f32 %v7259_v9, %v7259_v9  ;;  %v133_v11 = vrot.slane %v132_v4, 1 }
  0x90   :  { %v5381_v21 = vld [vmem:[#allocation8 + $0x800] sm:$0xf]  ;;  %v6182_v33 = vor.u32 %v6863_v16, %v6181_v15  ;;  %v140_v53 = vadd.f32 %v139_v30, %v138_v20  ;;  %3572 = vmatpush.bf16.msrb.mxu2 %v5926_v31  ;;  %v170_v32 = vmul.f32 %v7247_v2, %v7247_v2  ;;  %v142_v15 = vadd.f32 %v141_v5, %v7232_v57 }
  0x91   :  { %v6663_v27 = vld [vmem:[#allocation8 + $0x81c] sm:$0xf0]  ;;  %v156_v63 = vmul.f32 %v7237_v60, %v116_v49  ;;  %v196_v16 = vrot.slane %v173_v39, 4  ;;  %v202_v17 = vrot.slane %v174_v44, 4  ;;  %v185_v20 = vadd.f32 %v184_v13, %v171_v37 }
  0x92   :  { %v5637_v34 = vld [vmem:[#allocation8 + $0xa00] sm:$0xf]  ;;  %v5382_v55 = vor.u32 %v6663_v27, %v5381_v21  ;;  %3585 = vmatpush.bf16.msrb.mxu3 %v6182_v33  ;;  %v160_v3 = vmul.f32 %v7237_v60, %v140_v53  ;;  %v178_v12 = vrot.slane %v170_v32, 4  ;;  %v134_v25 = vadd.f32 %v133_v11, %v132_v4  ;;  %v7298_v11 = vld [vmem:[#allocation7] sm:$0xff] }
  0x93   :  { %v6727_v35 = vld [vmem:[#allocation8 + $0xa1c] sm:$0xf0]  ;;  %v7253_v7 = vsub.f32 %v7191_v38, %v156_v63  ;;  %v197_v22 = vadd.f32 %v196_v16, %v173_v39  ;;  %v203_v23 = vadd.f32 %v202_v17, %v174_v44  ;;  %v186_v27 = vrot.slane %v185_v20, 2  ;;  %v7305_v16 = vld [vmem:[#allocation8 + $0x1c4] sm:$0xf] }
  0x94   :  { %v5893_v36 = vld [vmem:[#allocation8 + $0xc00] sm:$0xf]  ;;  %v5638_v56 = vor.u32 %v6727_v35, %v5637_v34  ;;  %3547 = vmatpush.bf16.msrb.mxu0 %v5382_v55  ;;  %v7262_v10 = vsub.f32 %v7202_v45, %v160_v3  ;;  %v179_v19 = vadd.f32 %v178_v12, %v170_v32  ;;  %v143_v29 = vrot.slane %v142_v15, 2  ;;  %v7307_v17 = vld [vmem:[#allocation8 + $0x1e0] sm:$0xf0] }
  0x95   :  { %v6791_v42 = vld [vmem:[#allocation8 + $0xc1c] sm:$0xf0]  ;;  %v172_v38 = vmul.f32 %v7253_v7, %v7253_v7  ;;  %v198_v30 = vrot.slane %v197_v22, 2  ;;  %v204_v31 = vrot.slane %v203_v23, 2  ;;  %v187_v35 = vadd.f32 %v186_v27, %v185_v20 }
  0x96   :  { %v6149_v43 = vld [vmem:[#allocation8 + $0xe00] sm:$0xf]  ;;  %v5894_v58 = vor.u32 %v6791_v42, %v5893_v36  ;;  %3560 = vmatpush.bf16.msrb.mxu1 %v5638_v56  ;;  %v176_v45 = vmul.f32 %v7262_v10, %v7262_v10  ;;  %v180_v26 = vrot.slane %v179_v19, 2  ;;  %v144_v49 = vadd.f32 %v143_v29, %v142_v15 }
  0x97   :  { %v6855_v40 = vld [vmem:[#allocation8 + $0xe1c] sm:$0xf0]  ;;  %v190_v14 = vrot.slane %v172_v38, 4  ;;  %v199_v41 = vadd.f32 %v198_v30, %v197_v22  ;;  %v205_v42 = vadd.f32 %v204_v31, %v203_v23  ;;  %v188_v47 = vrot.slane %v187_v35, 1 }
  0x98   :  { %v6150_v59 = vor.u32 %v6855_v40, %v6149_v43  ;;  %3573 = vmatpush.bf16.msrb.mxu2 %v5894_v58  ;;  %v214_v18 = vrot.slane %v176_v45, 4  ;;  %v181_v34 = vadd.f32 %v180_v26, %v179_v19  ;;  %v159_v43 = vmul.f32 %v7237_v60, %v134_v25 }
  0x99   :  { %v191_v21 = vadd.f32 %v190_v14, %v172_v38  ;;  %v200_v51 = vrot.slane %v199_v41, 1  ;;  %v206_v46 = vrot.slane %v205_v42, 1  ;;  %v189_v54 = vadd.f32 %v188_v47, %v187_v35 }
  0x9a   :  { %3586 = vmatpush.bf16.msrb.mxu3 %v6150_v59  ;;  %v215_v24 = vadd.f32 %v214_v18, %v176_v45  ;;  %v182_v40 = vrot.slane %v181_v34, 1  ;;  %v7279_v59 = vsub.f32 %v7209_v50, %v159_v43  ;;  %v145_v0 = vrot.slane %v144_v49, 1  ;;  %v7295_v45 = vld [vmem:[#allocation5] sm:$0xff] }
  0x9b   :  { %v192_v28 = vrot.slane %v191_v21, 2  ;;  %v201_v56 = vadd.f32 %v200_v51, %v199_v41  ;;  %v207_v58 = vadd.f32 %v206_v46, %v205_v42  ;;  %v227_v62 = vmul.f32 %v189_v54, %v7237_v60  ;;  %v7348_v46 = vld [vmem:[#allocation8 + $0x3c4] sm:$0xf] }
  0x9c   :  { %v216_v33 = vrot.slane %v215_v24, 2  ;;  %v183_v53 = vadd.f32 %v182_v40, %v181_v34  ;;  %v175_v38 = vmul.f32 %v7279_v59, %v7279_v59  ;;  %v146_v39 = vadd.f32 %v145_v0, %v144_v49 }
  0x9d   :  { %v193_v36 = vadd.f32 %v192_v28, %v191_v21  ;;  %v229_v1 = vmul.f32 %v201_v56, %v7237_v60  ;;  %v7285_v5 = vadd.f32 1e-05, %v227_v62  ;;  %v230_v50 = vmul.f32 %v207_v58, %v7237_v60  ;;  %v7362_v62 = vld [vmem:[#allocation8 + $0x5c4] sm:$0xf] }
  0x9e   :  { %v217_v52 = vadd.f32 %v216_v33, %v215_v24  ;;  %v226_v61 = vmul.f32 %v183_v53, %v7237_v60  ;;  %v208_v13 = vrot.slane %v175_v38, 4  ;;  %v161_v14 = vmul.f32 %v7237_v60, %v146_v39 }
  0x9f   :  { %v194_v48 = vrot.slane %v193_v36, 1  ;;  %v7289_v37 = vadd.f32 1e-05, %v229_v1  ;;  %v7301_v12 = vadd.f32 1e-05, %v230_v50  ;;  %v324_v15 = vperm.slane %v7295_v45, 0 }
  0xa0   :  { %v218_v3 = vrot.slane %v217_v52, 1  ;;  %v234_v4 = vadd.f32 1e-05, %v226_v61  ;;  %v366_v20 = vperm.slane %v7298_v11, 0  ;;  %v325_v21 = vperm.slane %v7295_v45, 1 }
  0xa1   :  { %v195_v55 = vadd.f32 %v194_v48, %v193_v36  ;;  %v326_v22 = vperm.slane %v7295_v45, 2  ;;  %v327_v23 = vperm.slane %v7295_v45, 3  ;;  %v367_v26 = vperm.slane %v7298_v11, 1 }
  0xa2   :  { %6926 = vrsqrt.f32 %v234_v4  ;;  %v219_v44 = vadd.f32 %v218_v3, %v217_v52  ;;  %v368_v27 = vperm.slane %v7298_v11, 2  ;;  %v369_v28 = vperm.slane %v7298_v11, 3  ;;  %v7350_v52 = vld [vmem:[#allocation8 + $0x3e0] sm:$0xf0] }
  0xa3   :  { %v228_v63 = vmul.f32 %v195_v55, %v7237_v60  ;;  %6928 = vrsqrt.f32 %v7285_v5  ;;  %v4586_v31 = vor.u32 %v7305_v16, %v7307_v17  ;;  %v7326_v33 = vadd.f32 %v208_v13, %v175_v38 }
  0xa4   :  { %v232_v18 = vmul.f32 %v219_v44, %v7237_v60  ;;  %v7329_v34 = vsub.f32 %v7232_v57, %v161_v14  ;;  %vm248_vm1 = vweird.f32 %v234_v4  ;;  %vm258_vm2 = vweird.f32 %v7285_v5 }
  0xa5   :  { %v7287_v32 = vadd.f32 1e-05, %v228_v63  ;;  %vm278_vm5 = vweird.f32 %v7289_v37  ;;  %v7364_v63 = vld [vmem:[#allocation8 + $0x5e0] sm:$0xf0]  ;;  %v4842_v50 = vor.u32 %v7348_v46, %v7350_v52  ;;  %vm288_vm11 = vweird.f32 %v7301_v12 }
  0xa6   :  { %v7335_v42 = vadd.f32 1e-05, %v232_v18  ;;  %v6571_v52 = vld [vmem:[#allocation8 + $0x544] sm:$0xf] }
  0xa7   :  { %6930 = vrsqrt.f32 %v7287_v32  ;;  %vm268_vm3 = vweird.f32 %v7287_v32 }
  0xa8   :  { %6932 = vrsqrt.f32 %v7289_v37  ;;  %v6927_v19 = vpop.eup %6926  ;;  %vm308_vm0 = vweird.f32 %v7335_v42 }
  0xa9   :  { %6934 = vrsqrt.f32 %v7301_v12  ;;  %v7315_v24 = vpop.eup %6928  ;;  %v243_v25 = vmul.f32 %v6927_v19, %v234_v4  ;;  %vm249_vm4 = vweird.f32 %v6927_v19 }
  0xaa   :  { %v253_v30 = vmul.f32 %v7315_v24, %v7285_v5  ;;  %vm259_vm6 = vweird.f32 %v7315_v24  ;;  %6936 = vrsqrt.f32 %v7335_v42  ;;  %vm7357_vm8 = vmor %vm248_vm1, %vm249_vm4 }
  0xab   :  { %v244_v36 = vmul.f32 %v6927_v19, %v243_v25  ;;  %vm7371_vm10 = vmor %vm258_vm2, %vm259_vm6  ;;  %v177_v25 = vmul.f32 %v7329_v34, %v7329_v34 }
  0xac   :  { %v254_v43 = vmul.f32 %v7315_v24, %v253_v30 }
  0xad   :  { %v7320_v29 = vpop.eup %6930  ;;  %v245_v47 = vmul.f32 0.5, %v244_v36  ;;  %v220_v18 = vrot.slane %v177_v25, 4 }
  0xae   :  { %v7331_v35 = vpop.eup %6932  ;;  %v263_v41 = vmul.f32 %v7320_v29, %v7287_v32  ;;  %v255_v49 = vmul.f32 0.5, %v254_v43  ;;  %vm269_vm7 = vweird.f32 %v7320_v29  ;;  %v5098_v32 = vor.u32 %v7362_v62, %v7364_v63 }
  0xaf   :  { %v273_v40 = vmul.f32 %v7331_v35, %v7289_v37  ;;  %v7342_v57 = vpop.eup %6934  ;;  %v246_v54 = vsub.f32 1.5, %v245_v47  ;;  %vm279_vm9 = vweird.f32 %v7331_v35  ;;  %vm7383_vm12 = vmor %vm268_vm3, %vm269_vm7  ;;  %v7409_v37 = vld [vmem:[#allocation8 + $0x7c4] sm:$0xf] }
  0xb0   :  { %v264_v48 = vmul.f32 %v7320_v29, %v263_v41  ;;  %v283_v53 = vmul.f32 %v7342_v57, %v7301_v12  ;;  %v256_v58 = vsub.f32 1.5, %v255_v49  ;;  %vm289_vm13 = vweird.f32 %v7342_v57  ;;  %vm7395_vm14 = vmor %vm278_vm5, %vm279_vm9  ;;  %v7411_v41 = vld [vmem:[#allocation8 + $0x7e0] sm:$0xf0] }
  0xb1   :  { %v274_v51 = vmul.f32 %v7331_v35, %v273_v40  ;;  %v247_v1 = vmul.f32 %v6927_v19, %v246_v54  ;;  %v7413_v40 = vpop.eup %6936  ;;  %vm7424_vm15 = vmor %vm288_vm11, %vm289_vm13  ;;  %v210_v49 = vrot.slane %v7326_v33, 2 }
  0xb2   :  { %v265_v55 = vmul.f32 0.5, %v264_v48  ;;  %v284_v0 = vmul.f32 %v7342_v57, %v283_v53  ;;  %v257_v38 = vmul.f32 %v7315_v24, %v256_v58  ;;  %v328_v48 = vperm.slane %v7295_v45, 4 }
  0xb3   :  { %v275_v61 = vmul.f32 0.5, %v274_v51  ;;  %v251_v13 = vsel %vm7357_vm8, %v6927_v19, %v247_v1  ;;  %v303_v56 = vmul.f32 %v7413_v40, %v7335_v42  ;;  %vm309_vm1 = vweird.f32 %v7413_v40 }
  0xb4   :  { %v266_v4 = vsub.f32 1.5, %v265_v55  ;;  %v285_v44 = vmul.f32 0.5, %v284_v0  ;;  %v340_v30 = vmul.f32 %v324_v15, %v251_v13  ;;  %v261_v19 = vsel %vm7371_vm10, %v7315_v24, %v257_v38  ;;  %vm7473_vm2 = vmor %vm308_vm0, %vm309_vm1 }
  0xb5   :  { %v276_v5 = vsub.f32 1.5, %v275_v61  ;;  %v341_v47 = vmul.f32 %v325_v21, %v261_v19  ;;  %v5354_v55 = vor.u32 %v7409_v37, %v7411_v41  ;;  %v5063_v19 = vld [vmem:[#allocation8 + $0x5a0] sm:$0xf0]  ;;  %v330_v37 = vperm.slane %v7295_v45, 6 }
  0xb6   :  { %v267_v14 = vmul.f32 %v7320_v29, %v266_v4  ;;  %v286_v43 = vsub.f32 1.5, %v285_v44  ;;  %v348_v51 = vperm.slane %v340_v30, 0  ;;  %v221_v24 = vadd.f32 %v220_v18, %v177_v25  ;;  %v4519_v25 = vld [vmem:[#allocation8 + $0x160] sm:$0xf0] }
  0xb7   :  { %v277_v36 = vmul.f32 %v7331_v35, %v276_v5  ;;  %v349_v54 = vperm.slane %v341_v47, 0  ;;  %v4551_v5 = vld [vmem:[#allocation8 + $0x1a0] sm:$0xf0] }
  0xb8   :  { %v271_v15 = vsel %vm7383_vm12, %v7320_v29, %v267_v14  ;;  %v287_v53 = vmul.f32 %v7342_v57, %v286_v43  ;;  %v356_v58 = vmul.f32 %v348_v51, %v7247_v2  ;;  %v4807_v14 = vld [vmem:[#allocation8 + $0x3a0] sm:$0xf0] }
  0xb9   :  { %v342_v21 = vmul.f32 %v326_v22, %v271_v15  ;;  %v281_v29 = vsel %vm7395_vm14, %v7331_v35, %v277_v36  ;;  %v211_v35 = vadd.f32 %v210_v49, %v7326_v33  ;;  %v357_v0 = vmul.f32 %v349_v54, %v7250_v6  ;;  %v6451_v33 = vld [vmem:[#allocation8 + $0x184] sm:$0xf] }
  0xba   :  { %v343_v12 = vmul.f32 %v327_v23, %v281_v29  ;;  %v291_v22 = vsel %vm7424_vm15, %v7342_v57, %v287_v53  ;;  %v304_v23 = vmul.f32 %v7413_v40, %v303_v56  ;;  %v382_v3 = vadd.f32 %v366_v20, %v356_v58  ;;  %v6515_v20 = vld [vmem:[#allocation8 + $0x384] sm:$0xf] }
  0xbb   :  { %v350_v61 = vperm.slane %v342_v21, 0  ;;  %v344_v2 = vmul.f32 %v328_v48, %v291_v22  ;;  %v212_v38 = vrot.slane %v211_v35, 1  ;;  %v383_v39 = vadd.f32 %v367_v26, %v357_v0  ;;  %v6643_v43 = vld [vmem:[#allocation8 + $0x784] sm:$0xf] }
  0xbc   :  { %v351_v1 = vperm.slane %v343_v12, 0  ;;  %v305_v6 = vmul.f32 0.5, %v304_v23  ;;  %v7457_v44 = vpack.c.bf16 %v382_v3, %v382_v3  ;;  %v4554_v49 = vor.u32 %v6451_v33, %v4551_v5  ;;  %v6443_v51 = vld [vmem:[#allocation8 + $0x144] sm:$0xf] }
  0xbd   :  { %v358_v4 = vmul.f32 %v350_v61, %v7253_v7  ;;  %v213_v7 = vadd.f32 %v212_v38, %v211_v35  ;;  %v7461_v30 = vpack.c.bf16 %v383_v39, %v383_v39  ;;  %v352_v47 = vperm.slane %v344_v2, 0  ;;  %v4775_v54 = vld [vmem:[#allocation8 + $0x360] sm:$0xf0] }
  0xbe   :  { %v359_v57 = vmul.f32 %v351_v1, %v7256_v8  ;;  %v6579_v8 = vld [vmem:[#allocation8 + $0x584] sm:$0xf]  ;;  %v306_v36 = vsub.f32 1.5, %v305_v6  ;;  %3496 = vmatmul.bf16.vlgmr.msra.gmra.mxu0 %v7457_v44  ;;  %v4810_v42 = vor.u32 %v6515_v20, %v4807_v14  ;;  %v222_v53 = vrot.slane %v221_v24, 2 }
  0xbf   :  { %v384_v13 = vadd.f32 %v368_v27, %v358_v4  ;;  %v5319_v27 = vld [vmem:[#allocation8 + $0x7a0] sm:$0xf0]  ;;  %3509 = vmatmul.bf16.vlgmr.msra.gmra.mxu1 %v7461_v30  ;;  %3592 = vmatpush.bf16.msra.mxu0 %v4586_v31  ;;  %v5066_v16 = vor.u32 %v6579_v8, %v5063_v19  ;;  %v370_v12 = vperm.slane %v7298_v11, 4  ;;  %v360_v56 = vmul.f32 %v352_v47, %v7259_v9 }
  0xc0   :  { %v385_v26 = vadd.f32 %v369_v28, %v359_v57  ;;  %v231_v28 = vmul.f32 %v213_v7, %v7237_v60  ;;  %v307_v21 = vmul.f32 %v7413_v40, %v306_v36  ;;  %3605 = vmatpush.bf16.msra.mxu1 %v4842_v50  ;;  %v5322_v17 = vor.u32 %v6643_v43, %v5319_v27  ;;  %v6507_v31 = vld [vmem:[#allocation8 + $0x344] sm:$0xf] }
  0xc1   :  { %v7467_v41 = vpack.c.bf16 %v384_v13, %v384_v13  ;;  %v5031_v50 = vld [vmem:[#allocation8 + $0x560] sm:$0xf0]  ;;  %v223_v62 = vadd.f32 %v222_v53, %v221_v24  ;;  %v4522_v63 = vor.u32 %v6443_v51, %v4519_v25  ;;  %v4778_v35 = vor.u32 %v6507_v31, %v4775_v54 }
  0xc2   :  { %v7479_v48 = vpack.c.bf16 %v385_v26, %v385_v26  ;;  %v7489_v29 = vadd.f32 1e-05, %v231_v28  ;;  %v311_v46 = vsel %vm7473_vm2, %v7413_v40, %v307_v21  ;;  %v5287_v61 = vld [vmem:[#allocation8 + $0x760] sm:$0xf0]  ;;  %v372_v40 = vperm.slane %v7298_v11, 6 }
  0xc3   :  { %3522 = vmatmul.bf16.vlgmr.msra.gmra.mxu2 %v7467_v41  ;;  %v346_v58 = vmul.f32 %v330_v37, %v311_v46  ;;  %3593 = vmatpush.bf16.msra.mxu0 %v4554_v49  ;;  %v6435_v22 = vld [vmem:[#allocation8 + $0x104] sm:$0xf]  ;;  %v5034_v23 = vor.u32 %v6571_v52, %v5031_v50  ;;  %v386_v39 = vadd.f32 %v370_v12, %v360_v56 }
  0xc4   :  { %3535 = vmatmul.bf16.vlgmr.msra.gmra.mxu3 %v7479_v48  ;;  %3618 = vmatpush.bf16.msra.mxu2 %v5098_v32  ;;  %6938 = vrsqrt.f32 %v7489_v29  ;;  %v6635_v32 = vld [vmem:[#allocation8 + $0x744] sm:$0xf]  ;;  %vm298_vm3 = vweird.f32 %v7489_v29 }
  0xc5   :  { %3631 = vmatpush.bf16.msra.mxu3 %v5354_v55  ;;  %3606 = vmatpush.bf16.msra.mxu1 %v4810_v42  ;;  %v4487_v0 = vld [vmem:[#allocation8 + $0x120] sm:$0xf0]  ;;  %v354_v1 = vperm.slane %v346_v58, 0  ;;  %v224_v55 = vrot.slane %v223_v62, 1  ;;  %v5290_v4 = vor.u32 %v6635_v32, %v5287_v61  ;;  %v7508_v27 = vpack.c.bf16 %v386_v39, %v386_v39 }
  0xc6   :  { %v6499_v3 = vld [vmem:[#allocation8 + $0x304] sm:$0xf]  ;;  %v4490_v5 = vor.u32 %v6435_v22, %v4487_v0  ;;  %v329_v32 = vperm.slane %v7295_v45, 5 }
  0xc7   :  { %v4743_v9 = vld [vmem:[#allocation8 + $0x320] sm:$0xf0]  ;;  %v362_v57 = vmul.f32 %v354_v1, %v7262_v10  ;;  %v225_v33 = vadd.f32 %v224_v55, %v223_v62  ;;  %3594 = vmatpush.bf16.msra.mxu0 %v4522_v63 }
  0xc8   :  { %3619 = vmatpush.bf16.msra.mxu2 %v5066_v16  ;;  %v6563_v2 = vld [vmem:[#allocation8 + $0x504] sm:$0xf]  ;;  %v4746_v14 = vor.u32 %v6499_v3, %v4743_v9 }
  0xc9   :  { %3632 = vmatpush.bf16.msra.mxu3 %v5322_v17  ;;  %v4999_v38 = vld [vmem:[#allocation8 + $0x520] sm:$0xf0]  ;;  %3607 = vmatpush.bf16.msra.mxu1 %v4778_v35  ;;  %v388_v7 = vadd.f32 %v372_v40, %v362_v57  ;;  %v233_v8 = vmul.f32 %v225_v33, %v7237_v60 }
  0xca   :  { %v6627_v6 = vld [vmem:[#allocation8 + $0x704] sm:$0xf]  ;;  %v7503_v20 = vpop.eup %6938  ;;  %v5002_v19 = vor.u32 %v6563_v2, %v4999_v38 }
  0xcb   :  { %v5255_v13 = vld [vmem:[#allocation8 + $0x720] sm:$0xf0]  ;;  %v293_v10 = vmul.f32 %v7503_v20, %v7489_v29  ;;  %v7510_v28 = vadd.f32 1e-05, %v233_v8  ;;  %3595 = vmatpush.bf16.msra.mxu0 %v4490_v5  ;;  %v7513_v21 = vpack.c.bf16 %v388_v7, %v388_v7  ;;  %vm299_vm4 = vweird.f32 %v7503_v20 }
  0xcc   :  { %v6427_v18 = vld [vmem:[#allocation8 + $0xc4] sm:$0xf]  ;;  %3620 = vmatpush.bf16.msra.mxu2 %v5034_v23  ;;  %v5258_v43 = vor.u32 %v6627_v6, %v5255_v13  ;;  %vm7524_vm5 = vmor %vm298_vm3, %vm299_vm4 }
  0xcd   :  { %v4455_v26 = vld [vmem:[#allocation8 + $0xe0] sm:$0xf0]  ;;  %3633 = vmatpush.bf16.msra.mxu3 %v5290_v4  ;;  %v294_v60 = vmul.f32 %v7503_v20, %v293_v10  ;;  %3608 = vmatpush.bf16.msra.mxu1 %v4746_v14  ;;  %6940 = vrsqrt.f32 %v7510_v28  ;;  %vm318_vm6 = vweird.f32 %v7510_v28 }
  0xce   :  { %v6491_v36 = vld [vmem:[#allocation8 + $0x2c4] sm:$0xf]  ;;  %v4458_v24 = vor.u32 %v6427_v18, %v4455_v26  ;;  %3548 = vmatmul.bf16.vlgmr.msrb.gmra.mxu0 %v7508_v27 }
  0xcf   :  { %v4711_v37 = vld [vmem:[#allocation8 + $0x2e0] sm:$0xf0]  ;;  %v295_v17 = vmul.f32 0.5, %v294_v60 }
  0xd0   :  { %v6555_v47 = vld [vmem:[#allocation8 + $0x4c4] sm:$0xf]  ;;  %v4714_v42 = vor.u32 %v6491_v36, %v4711_v37  ;;  %3621 = vmatpush.bf16.msra.mxu2 %v5002_v19  ;;  %3596 = vmatpush.bf16.msra.mxu0 %v4458_v24  ;;  %v371_v37 = vperm.slane %v7298_v11, 5 }
  0xd1   :  { %v4967_v15 = vld [vmem:[#allocation8 + $0x4e0] sm:$0xf0]  ;;  %3634 = vmatpush.bf16.msra.mxu3 %v5258_v43  ;;  %v296_v50 = vsub.f32 1.5, %v295_v17 }
  0xd2   :  { %v6619_v49 = vld [vmem:[#allocation8 + $0x6c4] sm:$0xf]  ;;  %v4970_v16 = vor.u32 %v6555_v47, %v4967_v15  ;;  %3609 = vmatpush.bf16.msra.mxu1 %v4714_v42 }
  0xd3   :  { %v5223_v51 = vld [vmem:[#allocation8 + $0x6e0] sm:$0xf0]  ;;  %3574 = vmatmul.bf16.vlgmr.msrb.gmra.mxu2 %v7513_v21  ;;  %v297_v0 = vmul.f32 %v7503_v20, %v296_v50  ;;  %v7530_v23 = vpop.eup %6940 }
  0xd4   :  { %v6419_v25 = vld [vmem:[#allocation8 + $0x84] sm:$0xf]  ;;  %v5226_v12 = vor.u32 %v6619_v49, %v5223_v51  ;;  %3622 = vmatpush.bf16.msra.mxu2 %v4970_v16  ;;  %v313_v2 = vmul.f32 %v7530_v23, %v7510_v28  ;;  %vm319_vm7 = vweird.f32 %v7530_v23 }
  0xd5   :  { %v4423_v53 = vld [vmem:[#allocation8 + $0xa0] sm:$0xf0]  ;;  %v301_v4 = vsel %vm7524_vm5, %v7503_v20, %v297_v0  ;;  %vm7546_vm8 = vmor %vm318_vm6, %vm319_vm7 }
  0xd6   :  { %v6483_v31 = vld [vmem:[#allocation8 + $0x284] sm:$0xf]  ;;  %v4426_v56 = vor.u32 %v6419_v25, %v4423_v53  ;;  %3635 = vmatpush.bf16.msra.mxu3 %v5226_v12  ;;  %v345_v5 = vmul.f32 %v329_v32, %v301_v4  ;;  %v314_v18 = vmul.f32 %v7530_v23, %v313_v2 }
  0xd7   :  { %v4679_v54 = vld [vmem:[#allocation8 + $0x2a0] sm:$0xf0] }
  0xd8   :  { %v6547_v46 = vld [vmem:[#allocation8 + $0x484] sm:$0xf]  ;;  %v4682_v61 = vor.u32 %v6483_v31, %v4679_v54  ;;  %3597 = vmatpush.bf16.msra.mxu0 %v4426_v56  ;;  %v353_v36 = vperm.slane %v345_v5, 0  ;;  %v315_v15 = vmul.f32 0.5, %v314_v18 }
  0xd9   :  { %v4935_v52 = vld [vmem:[#allocation8 + $0x4a0] sm:$0xf0] }
  0xda   :  { %v6611_v58 = vld [vmem:[#allocation8 + $0x684] sm:$0xf]  ;;  %v4938_v1 = vor.u32 %v6547_v46, %v4935_v52  ;;  %3610 = vmatpush.bf16.msra.mxu1 %v4682_v61  ;;  %v361_v60 = vmul.f32 %v353_v36, %v7279_v59  ;;  %v316_v31 = vsub.f32 1.5, %v315_v15  ;;  %v331_v59 = vperm.slane %v7295_v45, 7 }
  0xdb   :  { %v5191_v62 = vld [vmem:[#allocation8 + $0x6a0] sm:$0xf0] }
  0xdc   :  { %v6411_v22 = vld [vmem:[#allocation8 + $0x44] sm:$0xf]  ;;  %v5194_v3 = vor.u32 %v6611_v58, %v5191_v62  ;;  %3623 = vmatpush.bf16.msra.mxu2 %v4938_v1  ;;  %v387_v52 = vadd.f32 %v371_v37, %v361_v60  ;;  %v317_v58 = vmul.f32 %v7530_v23, %v316_v31 }
  0xdd   :  { %v4391_v35 = vld [vmem:[#allocation8 + $0x60] sm:$0xf0] }
  0xde   :  { %v6475_v40 = vld [vmem:[#allocation8 + $0x244] sm:$0xf]  ;;  %v4394_v38 = vor.u32 %v6411_v22, %v4391_v35  ;;  %3636 = vmatpush.bf16.msra.mxu3 %v5194_v3  ;;  %v7552_v61 = vpack.c.bf16 %v387_v52, %v387_v52  ;;  %v321_v45 = vsel %vm7546_vm8, %v7530_v23, %v317_v58 }
  0xdf   :  { %v4647_v55 = vld [vmem:[#allocation8 + $0x260] sm:$0xf0] }
  0xe0   :  { %v6539_v29 = vld [vmem:[#allocation8 + $0x444] sm:$0xf]  ;;  %v4650_v6 = vor.u32 %v6475_v40, %v4647_v55  ;;  %3598 = vmatpush.bf16.msra.mxu0 %v4394_v38  ;;  %3561 = vmatmul.bf16.vlgmr.msrb.gmra.mxu1 %v7552_v61  ;;  %v347_v55 = vmul.f32 %v331_v59, %v321_v45  ;;  %v373_v38 = vperm.slane %v7298_v11, 7 }
  0xe1   :  { %v4903_v9 = vld [vmem:[#allocation8 + $0x460] sm:$0xf0] }
  0xe2   :  { %v6603_v39 = vld [vmem:[#allocation8 + $0x644] sm:$0xf]  ;;  %v4906_v26 = vor.u32 %v6539_v29, %v4903_v9  ;;  %3611 = vmatpush.bf16.msra.mxu1 %v4650_v6  ;;  %v355_v2 = vperm.slane %v347_v55, 0 }
  0xe3   :  { %v5159_v57 = vld [vmem:[#allocation8 + $0x660] sm:$0xf0] }
  0xe4   :  { %v6403_v33 = vld [vmem:[#allocation8 + $0x4] sm:$0xf]  ;;  %v5162_v10 = vor.u32 %v6603_v39, %v5159_v57  ;;  %3624 = vmatpush.bf16.msra.mxu2 %v4906_v26  ;;  %v363_v6 = vmul.f32 %v355_v2, %v7329_v34 }
  0xe5   :  { %v4359_v13 = vld [vmem:[#allocation8 + $0x20] sm:$0xf0] }
  0xe6   :  { %v6467_v14 = vld [vmem:[#allocation8 + $0x204] sm:$0xf]  ;;  %v4362_v24 = vor.u32 %v6403_v33, %v4359_v13  ;;  %3637 = vmatpush.bf16.msra.mxu3 %v5162_v10  ;;  %v389_v11 = vadd.f32 %v373_v38, %v363_v6 }
  0xe7   :  { %v4615_v7 = vld [vmem:[#allocation8 + $0x220] sm:$0xf0] }
  0xe8   :  { %v6531_v8 = vld [vmem:[#allocation8 + $0x404] sm:$0xf]  ;;  %v4618_v42 = vor.u32 %v6467_v14, %v4615_v7  ;;  %3599 = vmatpush.bf16.msra.mxu0 %v4362_v24 }
  0xe9   :  { %v6715_v20 = vld [vmem:[#allocation8 + $0x9c4] sm:$0xf] }
  0xea   :  { %v5607_v19 = vld [vmem:[#allocation8 + $0x9e0] sm:$0xf0]  ;;  %3612 = vmatpush.bf16.msra.mxu1 %v4618_v42 }
  0xeb   :  { %v4871_v43 = vld [vmem:[#allocation8 + $0x420] sm:$0xf0]  ;;  %v5610_v25 = vor.u32 %v6715_v20, %v5607_v19  ;;  %3600 = vmatmul.bf16.vlgmr.msra.gmra.mxu0 %v7457_v44 }
  0xec   :  { %v6595_v47 = vld [vmem:[#allocation8 + $0x604] sm:$0xf]  ;;  %v4874_v54 = vor.u32 %v6531_v8, %v4871_v43 }
  0xed   :  { %v5127_v49 = vld [vmem:[#allocation8 + $0x620] sm:$0xf0]  ;;  %3644 = vmatpush.bf16.msrb.mxu0 %v5610_v25 }
  0xee   :  { %v6779_v51 = vld [vmem:[#allocation8 + $0xbc4] sm:$0xf]  ;;  %v5130_v56 = vor.u32 %v6595_v47, %v5127_v49  ;;  %3625 = vmatpush.bf16.msra.mxu2 %v4874_v54  ;;  %v7562_v47 = vpack.c.bf16 %v389_v11, %v389_v11  ;;  %v4845_v11 = vld [vmem:[#allocation8 + $0x3c8] sm:$0xf] }
  0xef   :  { %v5863_v53 = vld [vmem:[#allocation8 + $0xbe0] sm:$0xf0] }
  0xf0   :  { %v6843_v16 = vld [vmem:[#allocation8 + $0xdc4] sm:$0xf]  ;;  %v5866_v62 = vor.u32 %v6779_v51, %v5863_v53  ;;  %3638 = vmatpush.bf16.msra.mxu3 %v5130_v56  ;;  %3613 = vmatmul.bf16.vlgmr.msra.gmra.mxu1 %v7461_v30 }
  0xf1   :  { %v6119_v17 = vld [vmem:[#allocation8 + $0xde0] sm:$0xf0]  ;;  %3626 = vmatmul.bf16.vlgmr.msra.gmra.mxu2 %v7467_v41  ;;  %3587 = vmatmul.bf16.vlgmr.msrb.gmra.mxu3 %v7562_v47 }
  0xf2   :  { %v6707_v12 = vld [vmem:[#allocation8 + $0x984] sm:$0xf]  ;;  %v6122_v63 = vor.u32 %v6843_v16, %v6119_v17  ;;  %3657 = vmatpush.bf16.msrb.mxu1 %v5866_v62 }
  0xf3   :  { %v5575_v46 = vld [vmem:[#allocation8 + $0x9a0] sm:$0xf0] }
  0xf4   :  { %v6771_v32 = vld [vmem:[#allocation8 + $0xb84] sm:$0xf]  ;;  %v5578_v22 = vor.u32 %v6707_v12, %v5575_v46  ;;  %3670 = vmatpush.bf16.msrb.mxu2 %v6122_v63 }
  0xf5   :  { %v5831_v28 = vld [vmem:[#allocation8 + $0xba0] sm:$0xf0] }
  0xf6   :  { %v6835_v35 = vld [vmem:[#allocation8 + $0xd84] sm:$0xf]  ;;  %v5834_v3 = vor.u32 %v6771_v32, %v5831_v28  ;;  %3645 = vmatpush.bf16.msrb.mxu0 %v5578_v22 }
  0xf7   :  { %v6087_v0 = vld [vmem:[#allocation8 + $0xda0] sm:$0xf0] }
  0xf8   :  { %v6699_v1 = vld [vmem:[#allocation8 + $0x944] sm:$0xf]  ;;  %v6090_v29 = vor.u32 %v6835_v35, %v6087_v0  ;;  %3658 = vmatpush.bf16.msrb.mxu1 %v5834_v3 }
  0xf9   :  { %v5543_v40 = vld [vmem:[#allocation8 + $0x960] sm:$0xf0] }
  0xfa   :  { %v6763_v9 = vld [vmem:[#allocation8 + $0xb44] sm:$0xf]  ;;  %v5546_v39 = vor.u32 %v6699_v1, %v5543_v40  ;;  %3671 = vmatpush.bf16.msrb.mxu2 %v6090_v29 }
  0xfb   :  { %v5799_v4 = vld [vmem:[#allocation8 + $0xb60] sm:$0xf0] }
  0xfc   :  { %v6827_v57 = vld [vmem:[#allocation8 + $0xd44] sm:$0xf]  ;;  %v5802_v7 = vor.u32 %v6763_v9, %v5799_v4  ;;  %3646 = vmatpush.bf16.msrb.mxu0 %v5546_v39 }
  0xfd   :  { %v6055_v23 = vld [vmem:[#allocation8 + $0xd60] sm:$0xf0] }
  0xfe   :  { %v6691_v33 = vld [vmem:[#allocation8 + $0x904] sm:$0xf]  ;;  %v6058_v18 = vor.u32 %v6827_v57, %v6055_v23  ;;  %3659 = vmatpush.bf16.msrb.mxu1 %v5802_v7  ;;  %v4589_v57 = vld [vmem:[#allocation8 + $0x1c8] sm:$0xf] }
  0xff   :  { %v5511_v5 = vld [vmem:[#allocation8 + $0x920] sm:$0xf0]  ;;  %v6464_v23 = vld [vmem:[#allocation8 + $0x1e4] sm:$0xf0] }
 0x100   :  { %v6907_v13 = vld [vmem:[#allocation8 + $0xfc4] sm:$0xf]  ;;  %v5514_v8 = vor.u32 %v6691_v33, %v5511_v5  ;;  %3672 = vmatpush.bf16.msrb.mxu2 %v6058_v18 }
 0x101   :  { %v6375_v14 = vld [vmem:[#allocation8 + $0xfe0] sm:$0xf0]  ;;  %3639 = vmatmul.bf16.vlgmr.msra.gmra.mxu3 %v7479_v48 }
 0x102   :  { %v6755_v26 = vld [vmem:[#allocation8 + $0xb04] sm:$0xf]  ;;  %v6378_v37 = vor.u32 %v6907_v13, %v6375_v14  ;;  %3647 = vmatpush.bf16.msrb.mxu0 %v5514_v8 }
 0x103   :  { %v5767_v20 = vld [vmem:[#allocation8 + $0xb20] sm:$0xf0] }
 0x104   :  { %v6819_v19 = vld [vmem:[#allocation8 + $0xd04] sm:$0xf]  ;;  %v5770_v24 = vor.u32 %v6755_v26, %v5767_v20  ;;  %3683 = vmatpush.bf16.msrb.mxu3 %v6378_v37  ;;  %v4590_v20 = vor.u32 %v6464_v23, %v4589_v57  ;;  %v6592_v37 = vld [vmem:[#allocation8 + $0x5e4] sm:$0xf0] }
 0x105   :  { %v6023_v36 = vld [vmem:[#allocation8 + $0xd20] sm:$0xf0]  ;;  %v4461_v57 = vld [vmem:[#allocation8 + $0xc8] sm:$0xf] }
 0x106   :  { %v6683_v10 = vld [vmem:[#allocation8 + $0x8c4] sm:$0xf]  ;;  %v6026_v49 = vor.u32 %v6819_v19, %v6023_v36  ;;  %3660 = vmatpush.bf16.msrb.mxu1 %v5770_v24  ;;  %v6528_v19 = vld [vmem:[#allocation8 + $0x3e4] sm:$0xf0] }
 0x107   :  { %v5479_v43 = vld [vmem:[#allocation8 + $0x8e0] sm:$0xf0]  ;;  %v5101_v36 = vld [vmem:[#allocation8 + $0x5c8] sm:$0xf] }
 0x108   :  { %v6899_v15 = vld [vmem:[#allocation8 + $0xf84] sm:$0xf]  ;;  %v5482_v60 = vor.u32 %v6683_v10, %v5479_v43  ;;  %3673 = vmatpush.bf16.msrb.mxu2 %v6026_v49  ;;  %v4557_v43 = vld [vmem:[#allocation8 + $0x188] sm:$0xf] }
 0x109   :  { %v6343_v34 = vld [vmem:[#allocation8 + $0xfa0] sm:$0xf0]  ;;  %v6432_v23 = vld [vmem:[#allocation8 + $0xe4] sm:$0xf0] }
 0x10a   :  { %v6747_v51 = vld [vmem:[#allocation8 + $0xac4] sm:$0xf]  ;;  %v6346_v16 = vor.u32 %v6899_v15, %v6343_v34  ;;  %3648 = vmatpush.bf16.msrb.mxu0 %v5482_v60  ;;  %v6456_v15 = vld [vmem:[#allocation8 + $0x1a4] sm:$0xf0]  ;;  %v5102_v60 = vor.u32 %v6592_v37, %v5101_v36 }
 0x10b   :  { %v5735_v42 = vld [vmem:[#allocation8 + $0xae0] sm:$0xf0]  ;;  %v5293_v36 = vld [vmem:[#allocation8 + $0x748] sm:$0xf] }
 0x10c   :  { %v6811_v25 = vld [vmem:[#allocation8 + $0xcc4] sm:$0xf]  ;;  %v5738_v46 = vor.u32 %v6747_v51, %v5735_v42  ;;  %3684 = vmatpush.bf16.msrb.mxu3 %v6346_v16  ;;  %v4846_v51 = vor.u32 %v6528_v19, %v4845_v11  ;;  %v4813_v42 = vld [vmem:[#allocation8 + $0x388] sm:$0xf] }
 0x10d   :  { %v5991_v53 = vld [vmem:[#allocation8 + $0xce0] sm:$0xf0]  ;;  %v6520_v16 = vld [vmem:[#allocation8 + $0x3a4] sm:$0xf0] }
 0x10e   :  { %v6675_v17 = vld [vmem:[#allocation8 + $0x884] sm:$0xf]  ;;  %v5994_v52 = vor.u32 %v6811_v25, %v5991_v53  ;;  %3661 = vmatpush.bf16.msrb.mxu1 %v5738_v46  ;;  %v4558_v53 = vor.u32 %v6456_v15, %v4557_v43  ;;  %v6448_v46 = vld [vmem:[#allocation8 + $0x164] sm:$0xf0] }
 0x10f   :  { %v5447_v31 = vld [vmem:[#allocation8 + $0x8a0] sm:$0xf0]  ;;  %v6424_v19 = vld [vmem:[#allocation8 + $0xa4] sm:$0xf0] }
 0x110   :  { %v6891_v54 = vld [vmem:[#allocation8 + $0xf44] sm:$0xf]  ;;  %v5450_v59 = vor.u32 %v6675_v17, %v5447_v31  ;;  %3674 = vmatpush.bf16.msrb.mxu2 %v5994_v52  ;;  %v5069_v17 = vld [vmem:[#allocation8 + $0x588] sm:$0xf] }
 0x111   :  { %v6311_v12 = vld [vmem:[#allocation8 + $0xf60] sm:$0xf0]  ;;  %v6584_v31 = vld [vmem:[#allocation8 + $0x5a4] sm:$0xf0] }
 0x112   :  { %v6739_v50 = vld [vmem:[#allocation8 + $0xa84] sm:$0xf]  ;;  %v6314_v63 = vor.u32 %v6891_v54, %v6311_v12  ;;  %3649 = vmatpush.bf16.msrb.mxu0 %v5450_v59  ;;  %v4525_v12 = vld [vmem:[#allocation8 + $0x148] sm:$0xf]  ;;  %v5070_v59 = vor.u32 %v6584_v31, %v5069_v17 }
 0x113   :  { %v5703_v56 = vld [vmem:[#allocation8 + $0xaa0] sm:$0xf0]  ;;  %v6640_v37 = vld [vmem:[#allocation8 + $0x764] sm:$0xf0] }
 0x114   :  { %v6803_v58 = vld [vmem:[#allocation8 + $0xc84] sm:$0xf]  ;;  %v5706_v0 = vor.u32 %v6739_v50, %v5703_v56  ;;  %3685 = vmatpush.bf16.msrb.mxu3 %v6314_v63  ;;  %v4814_v50 = vor.u32 %v6520_v16, %v4813_v42  ;;  %v4781_v56 = vld [vmem:[#allocation8 + $0x348] sm:$0xf] }
 0x115   :  { %v5959_v62 = vld [vmem:[#allocation8 + $0xca0] sm:$0xf0]  ;;  %v6512_v63 = vld [vmem:[#allocation8 + $0x364] sm:$0xf0] }
 0x116   :  { %v6667_v32 = vld [vmem:[#allocation8 + $0x844] sm:$0xf]  ;;  %v5962_v45 = vor.u32 %v6803_v58, %v5959_v62  ;;  %3662 = vmatpush.bf16.msrb.mxu1 %v5706_v0  ;;  %v4526_v62 = vor.u32 %v6448_v46, %v4525_v12  ;;  %v6440_v0 = vld [vmem:[#allocation8 + $0x124] sm:$0xf0] }
 0x117   :  { %v5415_v22 = vld [vmem:[#allocation8 + $0x860] sm:$0xf0]  ;;  %v4397_v42 = vld [vmem:[#allocation8 + $0x48] sm:$0xf] }
 0x118   :  { %v6883_v28 = vld [vmem:[#allocation8 + $0xf04] sm:$0xf]  ;;  %v5418_v40 = vor.u32 %v6667_v32, %v5415_v22  ;;  %3675 = vmatpush.bf16.msrb.mxu2 %v5962_v45  ;;  %v5037_v32 = vld [vmem:[#allocation8 + $0x548] sm:$0xf] }
 0x119   :  { %v6279_v35 = vld [vmem:[#allocation8 + $0xf20] sm:$0xf0]  ;;  %v6576_v22 = vld [vmem:[#allocation8 + $0x564] sm:$0xf0] }
 0x11a   :  { %v6731_v1 = vld [vmem:[#allocation8 + $0xa44] sm:$0xf]  ;;  %v6282_v9 = vor.u32 %v6883_v28, %v6279_v35  ;;  %3650 = vmatpush.bf16.msrb.mxu0 %v5418_v40  ;;  %v4493_v35 = vld [vmem:[#allocation8 + $0x108] sm:$0xf]  ;;  %v4782_v40 = vor.u32 %v6512_v63, %v4781_v56 }
 0x11b   :  { %v5671_v55 = vld [vmem:[#allocation8 + $0xa60] sm:$0xf0]  ;;  %v5357_v45 = vld [vmem:[#allocation8 + $0x7c8] sm:$0xf] }
 0x11c   :  { %v6795_v3 = vld [vmem:[#allocation8 + $0xc44] sm:$0xf]  ;;  %v5674_v33 = vor.u32 %v6731_v1, %v5671_v55  ;;  %3686 = vmatpush.bf16.msrb.mxu3 %v6282_v9  ;;  %v6656_v1 = vld [vmem:[#allocation8 + $0x7e4] sm:$0xf0]  ;;  %v5038_v55 = vor.u32 %v6576_v22, %v5037_v32 }
 0x11d   :  { %v5927_v29 = vld [vmem:[#allocation8 + $0xc60] sm:$0xf0]  ;;  %v4749_v9 = vld [vmem:[#allocation8 + $0x308] sm:$0xf] }
 0x11e   :  { %v6875_v4 = vld [vmem:[#allocation8 + $0xec4] sm:$0xf]  ;;  %v5930_v5 = vor.u32 %v6795_v3, %v5927_v29  ;;  %3663 = vmatpush.bf16.msrb.mxu1 %v5674_v33  ;;  %v4494_v29 = vor.u32 %v6440_v0, %v4493_v35  ;;  %v5325_v33 = vld [vmem:[#allocation8 + $0x788] sm:$0xf] }
 0x11f   :  { %v6659_v2 = vld [vmem:[#allocation8 + $0x804] sm:$0xf]  ;;  %v6632_v16 = vld [vmem:[#allocation8 + $0x724] sm:$0xf0] }
 0x120   :  { %v5383_v38 = vld [vmem:[#allocation8 + $0x820] sm:$0xf0]  ;;  %3676 = vmatpush.bf16.msrb.mxu2 %v5930_v5  ;;  %v6648_v5 = vld [vmem:[#allocation8 + $0x7a4] sm:$0xf0] }
 0x121   :  { %v6247_v39 = vld [vmem:[#allocation8 + $0xee0] sm:$0xf0]  ;;  %v5386_v7 = vor.u32 %v6659_v2, %v5383_v38  ;;  %v5005_v2 = vld [vmem:[#allocation8 + $0x508] sm:$0xf]  ;;  %v5358_v38 = vor.u32 %v6656_v1, %v5357_v45  ;;  %v5326_v11 = vor.u32 %v6648_v5, %v5325_v33 }
 0x122   :  { %v6723_v6 = vld [vmem:[#allocation8 + $0xa04] sm:$0xf]  ;;  %v6250_v8 = vor.u32 %v6875_v4, %v6247_v39  ;;  %v6504_v4 = vld [vmem:[#allocation8 + $0x324] sm:$0xf0] }
 0x123   :  { %v5639_v13 = vld [vmem:[#allocation8 + $0xa20] sm:$0xf0]  ;;  %3651 = vmatpush.bf16.msrb.mxu0 %v5386_v7  ;;  %v6568_v39 = vld [vmem:[#allocation8 + $0x524] sm:$0xf0] }
 0x124   :  { %v6867_v14 = vld [vmem:[#allocation8 + $0xe84] sm:$0xf]  ;;  %v5642_v34 = vor.u32 %v6723_v6, %v5639_v13  ;;  %3687 = vmatpush.bf16.msrb.mxu3 %v6250_v8  ;;  %v4750_v6 = vor.u32 %v6504_v4, %v4749_v9  ;;  %v5006_v13 = vor.u32 %v6568_v39, %v5005_v2  ;;  %v4717_v7 = vld [vmem:[#allocation8 + $0x2c8] sm:$0xf] }
 0x125   :  { %v6787_v18 = vld [vmem:[#allocation8 + $0xc04] sm:$0xf]  ;;  %v6560_v8 = vld [vmem:[#allocation8 + $0x4e4] sm:$0xf0] }
 0x126   :  { %v5895_v26 = vld [vmem:[#allocation8 + $0xc20] sm:$0xf0]  ;;  %3664 = vmatpush.bf16.msrb.mxu1 %v5642_v34  ;;  %3652 = vmatmul.bf16.vlgmr.msrb.gmra.mxu0 %v7508_v27  ;;  %v4685_v34 = vld [vmem:[#allocation8 + $0x288] sm:$0xf] }
 0x127   :  { %v6215_v10 = vld [vmem:[#allocation8 + $0xea0] sm:$0xf0]  ;;  %v5898_v24 = vor.u32 %v6787_v18, %v5895_v26  ;;  %3696 = vmatpush.bf16.msra.mxu0 %v4590_v20  ;;  %v6496_v18 = vld [vmem:[#allocation8 + $0x2e4] sm:$0xf0] }
 0x128   :  { %v6859_v49 = vld [vmem:[#allocation8 + $0xe44] sm:$0xf]  ;;  %v6218_v25 = vor.u32 %v6867_v14, %v6215_v10  ;;  %v4462_v14 = vor.u32 %v6432_v23, %v4461_v57  ;;  %v4973_v26 = vld [vmem:[#allocation8 + $0x4c8] sm:$0xf]  ;;  %v4718_v10 = vor.u32 %v6496_v18, %v4717_v7 }
 0x129   :  { %v6183_v54 = vld [vmem:[#allocation8 + $0xe60] sm:$0xf0]  ;;  %3677 = vmatpush.bf16.msrb.mxu2 %v5898_v24  ;;  %3665 = vmatmul.bf16.vlgmr.msrb.gmra.mxu1 %v7552_v61  ;;  %v4429_v20 = vld [vmem:[#allocation8 + $0x88] sm:$0xf]  ;;  %v4974_v43 = vor.u32 %v6560_v8, %v4973_v26 }
 0x12a   :  { %v6851_v52 = vld [vmem:[#allocation8 + $0xe04] sm:$0xf]  ;;  %3709 = vmatpush.bf16.msra.mxu1 %v4846_v51  ;;  %3688 = vmatpush.bf16.msrb.mxu3 %v6218_v25  ;;  %v6186_v58 = vor.u32 %v6859_v49, %v6183_v54  ;;  %v4430_v15 = vor.u32 %v6424_v19, %v4429_v20  ;;  %v6488_v24 = vld [vmem:[#allocation8 + $0x2a4] sm:$0xf0]  ;;  %v5294_v51 = vor.u32 %v6640_v37, %v5293_v36 }
 0x12b   :  { %3697 = vmatpush.bf16.msra.mxu0 %v4558_v53  ;;  %v6151_v28 = vld [vmem:[#allocation8 + $0xe20] sm:$0xf0]  ;;  %v4941_v49 = vld [vmem:[#allocation8 + $0x488] sm:$0xf]  ;;  %v4686_v17 = vor.u32 %v6488_v24, %v4685_v34 }
 0x12c   :  { %3678 = vmatmul.bf16.vlgmr.msrb.gmra.mxu2 %v7513_v21  ;;  %v6154_v3 = vor.u32 %v6851_v52, %v6151_v28  ;;  %v6416_v25 = vld [vmem:[#allocation8 + $0x64] sm:$0xf0] }
 0x12d   :  { %3722 = vmatpush.bf16.msra.mxu2 %v5102_v60  ;;  %v6552_v60 = vld [vmem:[#allocation8 + $0x4a4] sm:$0xf0]  ;;  %v4398_v12 = vor.u32 %v6416_v25, %v4397_v42 }
 0x12e   :  { %3710 = vmatpush.bf16.msra.mxu1 %v4814_v50  ;;  %3689 = vmatpush.bf16.msrb.mxu3 %v6186_v58  ;;  %v5261_v53 = vld [vmem:[#allocation8 + $0x708] sm:$0xf]  ;;  %v4942_v54 = vor.u32 %v6552_v60, %v4941_v49 }
 0x12f   :  { %3698 = vmatpush.bf16.msra.mxu0 %v4526_v62  ;;  %v5229_v31 = vld [vmem:[#allocation8 + $0x6c8] sm:$0xf] }
 0x130   :  { %v4653_v46 = vld [vmem:[#allocation8 + $0x248] sm:$0xf] }
 0x131   :  { %3723 = vmatpush.bf16.msra.mxu2 %v5070_v59  ;;  %v6480_v52 = vld [vmem:[#allocation8 + $0x264] sm:$0xf0]  ;;  %v5262_v59 = vor.u32 %v6632_v16, %v5261_v53 }
 0x132   :  { %3711 = vmatpush.bf16.msra.mxu1 %v4782_v40  ;;  %3690 = vmatpush.bf16.msrb.mxu3 %v6154_v3  ;;  %v4909_v50 = vld [vmem:[#allocation8 + $0x448] sm:$0xf]  ;;  %v4654_v28 = vor.u32 %v6480_v52, %v4653_v46 }
 0x133   :  { %3699 = vmatpush.bf16.msra.mxu0 %v4494_v29  ;;  %v6544_v56 = vld [vmem:[#allocation8 + $0x464] sm:$0xf0] }
 0x134   :  { %v4365_v58 = vld [vmem:[#allocation8 + $0x8] sm:$0xf]  ;;  %v4910_v0 = vor.u32 %v6544_v56, %v4909_v50 }
 0x135   :  { %3724 = vmatpush.bf16.msra.mxu2 %v5038_v55  ;;  %3691 = vmatmul.bf16.vlgmr.msrb.gmra.mxu3 %v7562_v47  ;;  %v6408_v62 = vld [vmem:[#allocation8 + $0x24] sm:$0xf0] }
 0x136   :  { %3735 = vmatpush.bf16.msra.mxu3 %v5358_v38  ;;  %3712 = vmatpush.bf16.msra.mxu1 %v4750_v6  ;;  %v6624_v63 = vld [vmem:[#allocation8 + $0x6e4] sm:$0xf0]  ;;  %v4366_v45 = vor.u32 %v6408_v62, %v4365_v58 }
 0x137   :  { %3700 = vmatpush.bf16.msra.mxu0 %v4462_v14  ;;  %v5613_v32 = vld [vmem:[#allocation8 + $0x9c8] sm:$0xf]  ;;  %v5230_v3 = vor.u32 %v6624_v63, %v5229_v31 }
 0x138   :  { %v6720_v22 = vld [vmem:[#allocation8 + $0x9e4] sm:$0xf0] }
 0x139   :  { %3725 = vmatpush.bf16.msra.mxu2 %v5006_v13  ;;  %v5197_v35 = vld [vmem:[#allocation8 + $0x688] sm:$0xf]  ;;  %v5614_v9 = vor.u32 %v6720_v22, %v5613_v32 }
 0x13a   :  { %3736 = vmatpush.bf16.msra.mxu3 %v5326_v11  ;;  %3713 = vmatpush.bf16.msra.mxu1 %v4718_v10  ;;  %v4621_v1 = vld [vmem:[#allocation8 + $0x208] sm:$0xf] }
 0x13b   :  { %3701 = vmatpush.bf16.msra.mxu0 %v4430_v15  ;;  %v6472_v40 = vld [vmem:[#allocation8 + $0x224] sm:$0xf0] }
 0x13c   :  { %v4877_v55 = vld [vmem:[#allocation8 + $0x408] sm:$0xf]  ;;  %v4622_v23 = vor.u32 %v6472_v40, %v4621_v1 }
 0x13d   :  { %3726 = vmatpush.bf16.msra.mxu2 %v4974_v43  ;;  %v6536_v29 = vld [vmem:[#allocation8 + $0x424] sm:$0xf0] }
 0x13e   :  { %3737 = vmatpush.bf16.msra.mxu3 %v5294_v51  ;;  %3714 = vmatpush.bf16.msra.mxu1 %v4686_v17  ;;  %v5869_v4 = vld [vmem:[#allocation8 + $0xbc8] sm:$0xf]  ;;  %v4878_v6 = vor.u32 %v6536_v29, %v4877_v55 }
 0x13f   :  { %3702 = vmatpush.bf16.msra.mxu0 %v4398_v12  ;;  %v6784_v2 = vld [vmem:[#allocation8 + $0xbe4] sm:$0xf0] }
 0x140   :  { %v6616_v38 = vld [vmem:[#allocation8 + $0x6a4] sm:$0xf0]  ;;  %v5870_v13 = vor.u32 %v6784_v2, %v5869_v4 }
 0x141   :  { %3727 = vmatpush.bf16.msra.mxu2 %v4942_v54  ;;  %v6125_v39 = vld [vmem:[#allocation8 + $0xdc8] sm:$0xf]  ;;  %v5198_v14 = vor.u32 %v6616_v38, %v5197_v35 }
 0x142   :  { %3738 = vmatpush.bf16.msra.mxu3 %v5262_v59  ;;  %v6848_v57 = vld [vmem:[#allocation8 + $0xde4] sm:$0xf0]  ;;  %3715 = vmatpush.bf16.msra.mxu1 %v4654_v28 }
 0x143   :  { %v5581_v33 = vld [vmem:[#allocation8 + $0x988] sm:$0xf]  ;;  %3703 = vmatpush.bf16.msra.mxu0 %v4366_v45  ;;  %v6126_v18 = vor.u32 %v6848_v57, %v6125_v39 }
 0x144   :  { %v6712_v5 = vld [vmem:[#allocation8 + $0x9a4] sm:$0xf0] }
 0x145   :  { %3728 = vmatpush.bf16.msra.mxu2 %v4910_v0  ;;  %v5165_v7 = vld [vmem:[#allocation8 + $0x648] sm:$0xf]  ;;  %v5582_v20 = vor.u32 %v6712_v5, %v5581_v33 }
 0x146   :  { %3739 = vmatpush.bf16.msra.mxu3 %v5230_v3  ;;  %v5837_v26 = vld [vmem:[#allocation8 + $0xb88] sm:$0xf]  ;;  %3716 = vmatpush.bf16.msra.mxu1 %v4622_v23 }
 0x147   :  { %3748 = vmatpush.bf16.msrb.mxu0 %v5614_v9  ;;  %v6776_v11 = vld [vmem:[#allocation8 + $0xba4] sm:$0xf0] }
 0x148   :  { %v6608_v8 = vld [vmem:[#allocation8 + $0x664] sm:$0xf0]  ;;  %3704 = vmatmul.bf16.vlgmr.msra.gmra.mxu0 %v7457_v44  ;;  %v5838_v15 = vor.u32 %v6776_v11, %v5837_v26 }
 0x149   :  { %v6093_v19 = vld [vmem:[#allocation8 + $0xd88] sm:$0xf]  ;;  %3729 = vmatpush.bf16.msra.mxu2 %v4878_v6  ;;  %v5166_v34 = vor.u32 %v6608_v8, %v5165_v7  ;;  %3717 = vmatmul.bf16.vlgmr.msra.gmra.mxu1 %v7461_v30 }
 0x14a   :  { %v6840_v36 = vld [vmem:[#allocation8 + $0xda4] sm:$0xf0]  ;;  %3761 = vmatpush.bf16.msrb.mxu1 %v5870_v13  ;;  %3740 = vmatpush.bf16.msra.mxu3 %v5198_v14 }
 0x14b   :  { %v5549_v37 = vld [vmem:[#allocation8 + $0x948] sm:$0xf]  ;;  %v6094_v49 = vor.u32 %v6840_v36, %v6093_v19  ;;  %3749 = vmatpush.bf16.msrb.mxu0 %v5582_v20 }
 0x14c   :  { %v6704_v10 = vld [vmem:[#allocation8 + $0x964] sm:$0xf0]  ;;  %3730 = vmatmul.bf16.vlgmr.msra.gmra.mxu2 %v7467_v41 }
 0x14d   :  { %v5133_v43 = vld [vmem:[#allocation8 + $0x608] sm:$0xf]  ;;  %3774 = vmatpush.bf16.msrb.mxu2 %v6126_v18  ;;  %v5550_v25 = vor.u32 %v6704_v10, %v5549_v37 }
 0x14e   :  { %v6600_v24 = vld [vmem:[#allocation8 + $0x624] sm:$0xf0]  ;;  %3762 = vmatpush.bf16.msrb.mxu1 %v5838_v15  ;;  %3741 = vmatpush.bf16.msra.mxu3 %v5166_v34 }
 0x14f   :  { %v5805_v51 = vld [vmem:[#allocation8 + $0xb48] sm:$0xf]  ;;  %v5134_v46 = vor.u32 %v6600_v24, %v5133_v43  ;;  %3750 = vmatpush.bf16.msrb.mxu0 %v5550_v25  ;;  %v6460_v25 = vld [vmem:[#allocation8 + $0x1cc] sm:$0xf] }
 0x150   :  { %v6768_v60 = vld [vmem:[#allocation8 + $0xb64] sm:$0xf0] }
 0x151   :  { %v6381_v42 = vld [vmem:[#allocation8 + $0xfc8] sm:$0xf]  ;;  %v5806_v12 = vor.u32 %v6768_v60, %v5805_v51  ;;  %3775 = vmatpush.bf16.msrb.mxu2 %v6094_v49 }
 0x152   :  { %v6061_v53 = vld [vmem:[#allocation8 + $0xd48] sm:$0xf]  ;;  %3742 = vmatpush.bf16.msra.mxu3 %v5134_v46 }
 0x153   :  { %v6832_v16 = vld [vmem:[#allocation8 + $0xd64] sm:$0xf0]  ;;  %3763 = vmatpush.bf16.msrb.mxu1 %v5806_v12 }
 0x154   :  { %v6912_v17 = vld [vmem:[#allocation8 + $0xfe4] sm:$0xf0]  ;;  %v6062_v52 = vor.u32 %v6832_v16, %v6061_v53  ;;  %v4591_v53 = vld [vmem:[#allocation8 + $0x1e8] sm:$0xf0] }
 0x155   :  { %v5517_v31 = vld [vmem:[#allocation8 + $0x908] sm:$0xf]  ;;  %v6382_v56 = vor.u32 %v6912_v17, %v6381_v42  ;;  %3743 = vmatmul.bf16.vlgmr.msra.gmra.mxu3 %v7479_v48 }
 0x156   :  { %v6696_v54 = vld [vmem:[#allocation8 + $0x924] sm:$0xf0]  ;;  %3776 = vmatpush.bf16.msrb.mxu2 %v6062_v52 }
 0x157   :  { %v5773_v50 = vld [vmem:[#allocation8 + $0xb08] sm:$0xf]  ;;  %v5518_v62 = vor.u32 %v6696_v54, %v5517_v31  ;;  %3787 = vmatpush.bf16.msrb.mxu3 %v6382_v56  ;;  %v4847_v56 = vld [vmem:[#allocation8 + $0x3e8] sm:$0xf0] }
 0x158   :  { %v6760_v59 = vld [vmem:[#allocation8 + $0xb24] sm:$0xf0] }
 0x159   :  { %v6349_v58 = vld [vmem:[#allocation8 + $0xf88] sm:$0xf]  ;;  %v5774_v0 = vor.u32 %v6760_v59, %v5773_v50  ;;  %3751 = vmatpush.bf16.msrb.mxu0 %v5518_v62  ;;  %v6524_v59 = vld [vmem:[#allocation8 + $0x3cc] sm:$0xf]  ;;  %v4594_v62 = vor.u32 %v6460_v25, %v4591_v53 }
 0x15a   :  { %v6029_v63 = vld [vmem:[#allocation8 + $0xd08] sm:$0xf]  ;;  %v6564_v25 = vld [vmem:[#allocation8 + $0x50c] sm:$0xf] }
 0x15b   :  { %v6824_v32 = vld [vmem:[#allocation8 + $0xd24] sm:$0xf0]  ;;  %3764 = vmatpush.bf16.msrb.mxu1 %v5774_v0  ;;  %v5007_v53 = vld [vmem:[#allocation8 + $0x528] sm:$0xf0] }
 0x15c   :  { %v6904_v22 = vld [vmem:[#allocation8 + $0xfa4] sm:$0xf0]  ;;  %v6030_v45 = vor.u32 %v6824_v32, %v6029_v63  ;;  %v6588_v63 = vld [vmem:[#allocation8 + $0x5cc] sm:$0xf] }
 0x15d   :  { %v5485_v28 = vld [vmem:[#allocation8 + $0x8c8] sm:$0xf]  ;;  %v6350_v55 = vor.u32 %v6904_v22, %v6349_v58  ;;  %v5103_v32 = vld [vmem:[#allocation8 + $0x5e8] sm:$0xf0] }
 0x15e   :  { %v6688_v35 = vld [vmem:[#allocation8 + $0x8e4] sm:$0xf0]  ;;  %3777 = vmatpush.bf16.msrb.mxu2 %v6030_v45  ;;  %v4850_v45 = vor.u32 %v6524_v59, %v4847_v56  ;;  %v6636_v59 = vld [vmem:[#allocation8 + $0x74c] sm:$0xf] }
 0x15f   :  { %v5741_v1 = vld [vmem:[#allocation8 + $0xac8] sm:$0xf]  ;;  %v5486_v29 = vor.u32 %v6688_v35, %v5485_v28  ;;  %3788 = vmatpush.bf16.msrb.mxu3 %v6350_v55  ;;  %v6452_v28 = vld [vmem:[#allocation8 + $0x18c] sm:$0xf]  ;;  %v5106_v55 = vor.u32 %v6588_v63, %v5103_v32 }
 0x160   :  { %v6752_v40 = vld [vmem:[#allocation8 + $0xae4] sm:$0xf0]  ;;  %v4559_v35 = vld [vmem:[#allocation8 + $0x1a8] sm:$0xf0] }
 0x161   :  { %v6317_v3 = vld [vmem:[#allocation8 + $0xf48] sm:$0xf]  ;;  %v5742_v57 = vor.u32 %v6752_v40, %v5741_v1  ;;  %3752 = vmatpush.bf16.msrb.mxu0 %v5486_v29  ;;  %v4815_v29 = vld [vmem:[#allocation8 + $0x3a8] sm:$0xf0] }
 0x162   :  { %v5997_v9 = vld [vmem:[#allocation8 + $0xcc8] sm:$0xf]  ;;  %v5295_v63 = vld [vmem:[#allocation8 + $0x768] sm:$0xf0] }
 0x163   :  { %v6816_v4 = vld [vmem:[#allocation8 + $0xce4] sm:$0xf0]  ;;  %3765 = vmatpush.bf16.msrb.mxu1 %v5742_v57  ;;  %v4527_v57 = vld [vmem:[#allocation8 + $0x168] sm:$0xf0] }
 0x164   :  { %v6896_v2 = vld [vmem:[#allocation8 + $0xf64] sm:$0xf0]  ;;  %v5998_v23 = vor.u32 %v6816_v4, %v5997_v9  ;;  %v4562_v4 = vor.u32 %v6452_v28, %v4559_v35  ;;  %v6420_v32 = vld [vmem:[#allocation8 + $0x8c] sm:$0xf]  ;;  %v7583_v35 = vpop.f32.mrf.mxu2 }
 0x165   :  { %v5453_v38 = vld [vmem:[#allocation8 + $0x888] sm:$0xf]  ;;  %v6318_v6 = vor.u32 %v6896_v2, %v6317_v3  ;;  %v6516_v3 = vld [vmem:[#allocation8 + $0x38c] sm:$0xf] }
 0x166   :  { %v6680_v39 = vld [vmem:[#allocation8 + $0x8a4] sm:$0xf0]  ;;  %3778 = vmatpush.bf16.msrb.mxu2 %v5998_v23  ;;  %v6580_v2 = vld [vmem:[#allocation8 + $0x58c] sm:$0xf] }
 0x167   :  { %v5709_v33 = vld [vmem:[#allocation8 + $0xa88] sm:$0xf]  ;;  %v5454_v14 = vor.u32 %v6680_v39, %v5453_v38  ;;  %3789 = vmatpush.bf16.msrb.mxu3 %v6318_v6  ;;  %v5071_v38 = vld [vmem:[#allocation8 + $0x5a8] sm:$0xf0] }
 0x168   :  { %v6744_v5 = vld [vmem:[#allocation8 + $0xaa4] sm:$0xf0]  ;;  %v6444_v39 = vld [vmem:[#allocation8 + $0x14c] sm:$0xf] }
 0x169   :  { %v6285_v13 = vld [vmem:[#allocation8 + $0xf08] sm:$0xf]  ;;  %v5710_v20 = vor.u32 %v6744_v5, %v5709_v33  ;;  %3753 = vmatpush.bf16.msrb.mxu0 %v5454_v14  ;;  %v4818_v33 = vor.u32 %v6516_v3, %v4815_v29  ;;  %v6508_v14 = vld [vmem:[#allocation8 + $0x34c] sm:$0xf]  ;;  %v7585_v29 = vpop.f32.mrf.mxu3 }
 0x16a   :  { %v5965_v7 = vld [vmem:[#allocation8 + $0xc88] sm:$0xf]  ;;  %v6628_v3 = vld [vmem:[#allocation8 + $0x70c] sm:$0xf] }
 0x16b   :  { %v6808_v18 = vld [vmem:[#allocation8 + $0xca4] sm:$0xf0]  ;;  %3766 = vmatpush.bf16.msrb.mxu1 %v5710_v20  ;;  %v5359_v20 = vld [vmem:[#allocation8 + $0x7e8] sm:$0xf0] }
 0x16c   :  { %v6888_v26 = vld [vmem:[#allocation8 + $0xf24] sm:$0xf0]  ;;  %v5966_v19 = vor.u32 %v6808_v18, %v5965_v7  ;;  %v4783_v7 = vld [vmem:[#allocation8 + $0x368] sm:$0xf0] }
 0x16d   :  { %v5421_v11 = vld [vmem:[#allocation8 + $0x848] sm:$0xf]  ;;  %v6286_v10 = vor.u32 %v6888_v26, %v6285_v13  ;;  %v5074_v13 = vor.u32 %v6580_v2, %v5071_v38  ;;  %v6652_v18 = vld [vmem:[#allocation8 + $0x7cc] sm:$0xf]  ;;  %v4530_v26 = vor.u32 %v6444_v39, %v4527_v57 }
 0x16e   :  { %v6672_v8 = vld [vmem:[#allocation8 + $0x864] sm:$0xf0]  ;;  %3779 = vmatpush.bf16.msrb.mxu2 %v5966_v19  ;;  %v6436_v19 = vld [vmem:[#allocation8 + $0x10c] sm:$0xf] }
 0x16f   :  { %v5677_v36 = vld [vmem:[#allocation8 + $0xa48] sm:$0xf]  ;;  %v5422_v15 = vor.u32 %v6672_v8, %v5421_v11  ;;  %3790 = vmatpush.bf16.msrb.mxu3 %v6286_v10  ;;  %v6572_v11 = vld [vmem:[#allocation8 + $0x54c] sm:$0xf] }
 0x170   :  { %v6736_v37 = vld [vmem:[#allocation8 + $0xa64] sm:$0xf0]  ;;  %v5039_v8 = vld [vmem:[#allocation8 + $0x568] sm:$0xf0] }
 0x171   :  { %v6253_v43 = vld [vmem:[#allocation8 + $0xec8] sm:$0xf]  ;;  %v5678_v42 = vor.u32 %v6736_v37, %v5677_v36  ;;  %3754 = vmatpush.bf16.msrb.mxu0 %v5422_v15  ;;  %v4495_v36 = vld [vmem:[#allocation8 + $0x128] sm:$0xf0]  ;;  %v4786_v37 = vor.u32 %v6508_v14, %v4783_v7  ;;  %v7578_v15 = vpop.f32.mrf.mxu0 }
 0x172   :  { %v5933_v34 = vld [vmem:[#allocation8 + $0xc48] sm:$0xf]  ;;  %v6548_v2 = vld [vmem:[#allocation8 + $0x48c] sm:$0xf] }
 0x173   :  { %v6800_v24 = vld [vmem:[#allocation8 + $0xc64] sm:$0xf0]  ;;  %3767 = vmatpush.bf16.msrb.mxu1 %v5678_v42  ;;  %v4498_v42 = vor.u32 %v6436_v19, %v4495_v36  ;;  %v4943_v38 = vld [vmem:[#allocation8 + $0x4a8] sm:$0xf0]  ;;  %v7587_v36 = vld [vmem:[#allocation10] sm:$0xff] }
 0x174   :  { %v6880_v49 = vld [vmem:[#allocation8 + $0xee4] sm:$0xf0]  ;;  %v5934_v17 = vor.u32 %v6800_v24, %v5933_v34  ;;  %v6500_v34 = vld [vmem:[#allocation8 + $0x30c] sm:$0xf] }
 0x175   :  { %v5389_v51 = vld [vmem:[#allocation8 + $0x808] sm:$0xf]  ;;  %v6254_v46 = vor.u32 %v6880_v49, %v6253_v43  ;;  %v5042_v43 = vor.u32 %v6572_v11, %v5039_v8  ;;  %v4751_v24 = vld [vmem:[#allocation8 + $0x328] sm:$0xf0]  ;;  %v5362_v49 = vor.u32 %v6652_v18, %v5359_v20 }
 0x176   :  { %v6664_v60 = vld [vmem:[#allocation8 + $0x824] sm:$0xf0]  ;;  %3780 = vmatpush.bf16.msrb.mxu2 %v5934_v17  ;;  %v6428_v17 = vld [vmem:[#allocation8 + $0xcc] sm:$0xf] }
 0x177   :  { %v6221_v16 = vld [vmem:[#allocation8 + $0xe88] sm:$0xf]  ;;  %v5390_v52 = vor.u32 %v6664_v60, %v5389_v51  ;;  %3791 = vmatpush.bf16.msrb.mxu3 %v6254_v46  ;;  %v6644_v51 = vld [vmem:[#allocation8 + $0x78c] sm:$0xf]  ;;  %v7580_v60 = vpop.f32.mrf.mxu1 }
 0x178   :  { %v5645_v31 = vld [vmem:[#allocation8 + $0xa08] sm:$0xf]  ;;  %v6492_v46 = vld [vmem:[#allocation8 + $0x2cc] sm:$0xf] }
 0x179   :  { %v6728_v54 = vld [vmem:[#allocation8 + $0xa24] sm:$0xf0]  ;;  %3755 = vmatpush.bf16.msrb.mxu0 %v5390_v52  ;;  %v4719_v52 = vld [vmem:[#allocation8 + $0x2e8] sm:$0xf0] }
 0x17a   :  { %v5901_v12 = vld [vmem:[#allocation8 + $0xc08] sm:$0xf]  ;;  %v5646_v22 = vor.u32 %v6728_v54, %v5645_v31  ;;  %v4463_v31 = vld [vmem:[#allocation8 + $0xe8] sm:$0xf0]  ;;  %v4754_v54 = vor.u32 %v6500_v34, %v4751_v24  ;;  %v4722_v28 = vor.u32 %v6492_v46, %v4719_v52  ;;  %v3525_v24 = vpop.f32.mrf.mxu2 }
 0x17b   :  { %v6792_v50 = vld [vmem:[#allocation8 + $0xc24] sm:$0xf0]  ;;  %v4466_v56 = vor.u32 %v6428_v17, %v4463_v31  ;;  %v5263_v39 = vld [vmem:[#allocation8 + $0x728] sm:$0xf0]  ;;  %v3538_v17 = vpop.f32.mrf.mxu3 }
 0x17c   :  { %v6872_v58 = vld [vmem:[#allocation8 + $0xea4] sm:$0xf0]  ;;  %v5902_v0 = vor.u32 %v6792_v50, %v5901_v12  ;;  %3768 = vmatpush.bf16.msrb.mxu1 %v5646_v22  ;;  %3756 = vmatmul.bf16.vlgmr.msrb.gmra.mxu0 %v7508_v27  ;;  %v5010_v12 = vor.u32 %v6564_v25, %v5007_v53  ;;  %v4431_v22 = vld [vmem:[#allocation8 + $0xa8] sm:$0xf0]  ;;  %v5266_v14 = vor.u32 %v6628_v3, %v5263_v39 }
 0x17d   :  { %v6222_v1 = vor.u32 %v6872_v58, %v6221_v16  ;;  %v6189_v40 = vld [vmem:[#allocation8 + $0xe48] sm:$0xf]  ;;  %3800 = vmatpush.bf16.msra.mxu0 %v4594_v62  ;;  %v5327_v16 = vld [vmem:[#allocation8 + $0x7a8] sm:$0xf0] }
 0x17e   :  { %v6864_v9 = vld [vmem:[#allocation8 + $0xe64] sm:$0xf0]  ;;  %3781 = vmatpush.bf16.msrb.mxu2 %v5902_v0  ;;  %v5330_v50 = vor.u32 %v6644_v51, %v5327_v16  ;;  %v6556_v58 = vld [vmem:[#allocation8 + $0x4cc] sm:$0xf] }
 0x17f   :  { %v6157_v23 = vld [vmem:[#allocation8 + $0xe08] sm:$0xf]  ;;  %3792 = vmatpush.bf16.msrb.mxu3 %v6222_v1  ;;  %v6190_v5 = vor.u32 %v6864_v9, %v6189_v40  ;;  %3769 = vmatmul.bf16.vlgmr.msrb.gmra.mxu1 %v7552_v61  ;;  %v4975_v62 = vld [vmem:[#allocation8 + $0x4e8] sm:$0xf0]  ;;  %v3512_v9 = vpop.f32.mrf.mxu1 }
 0x180   :  { %3813 = vmatpush.bf16.msra.mxu1 %v4850_v45  ;;  %v6856_v6 = vld [vmem:[#allocation8 + $0xe24] sm:$0xf0]  ;;  %v4978_v0 = vor.u32 %v6556_v58, %v4975_v62  ;;  %v3499_v45 = vpop.f32.mrf.mxu0  ;;  %v6484_v1 = vld [vmem:[#allocation8 + $0x28c] sm:$0xf] }
 0x181   :  { %3801 = vmatpush.bf16.msra.mxu0 %v4562_v4  ;;  %3782 = vmatmul.bf16.vlgmr.msrb.gmra.mxu2 %v7513_v21  ;;  %v6158_v10 = vor.u32 %v6856_v6, %v6157_v23  ;;  %v4687_v40 = vld [vmem:[#allocation8 + $0x2a8] sm:$0xf0]  ;;  %v4434_v4 = vor.u32 %v6420_v32, %v4431_v22  ;;  %v912_v32 = vperm.slane %v7587_v36, 0 }
 0x182   :  { %3826 = vmatpush.bf16.msra.mxu2 %v5106_v55  ;;  %v5298_v55 = vor.u32 %v6636_v59, %v5295_v63  ;;  %v6412_v57 = vld [vmem:[#allocation8 + $0x4c] sm:$0xf] }
 0x183   :  { %3793 = vmatpush.bf16.msrb.mxu3 %v6190_v5  ;;  %v4399_v23 = vld [vmem:[#allocation8 + $0x68] sm:$0xf0]  ;;  %v4946_v5 = vor.u32 %v6548_v2, %v4943_v38 }
 0x184   :  { %3814 = vmatpush.bf16.msra.mxu1 %v4818_v33  ;;  %v4690_v33 = vor.u32 %v6484_v1, %v4687_v40  ;;  %v6476_v6 = vld [vmem:[#allocation8 + $0x24c] sm:$0xf]  ;;  %v4402_v18 = vor.u32 %v6412_v57, %v4399_v23  ;;  %v7592_v23 = vpop.f32.mrf.mxu2 }
 0x185   :  { %3802 = vmatpush.bf16.msra.mxu0 %v4530_v26  ;;  %v6620_v7 = vld [vmem:[#allocation8 + $0x6cc] sm:$0xf] }
 0x186   :  { %3827 = vmatpush.bf16.msra.mxu2 %v5074_v13  ;;  %v4655_v13 = vld [vmem:[#allocation8 + $0x268] sm:$0xf0] }
 0x187   :  { %3794 = vmatpush.bf16.msrb.mxu3 %v6158_v10  ;;  %v6540_v26 = vld [vmem:[#allocation8 + $0x44c] sm:$0xf] }
 0x188   :  { %3815 = vmatpush.bf16.msra.mxu1 %v4786_v37  ;;  %v4911_v11 = vld [vmem:[#allocation8 + $0x468] sm:$0xf0]  ;;  %v4658_v37 = vor.u32 %v6476_v6, %v4655_v13  ;;  %v7589_v51 = vpop.f32.mrf.mxu0  ;;  %v3498_v6 = vadd.f32 %v7578_v15, %v912_v32 }
 0x189   :  { %3803 = vmatpush.bf16.msra.mxu0 %v4498_v42  ;;  %v5231_v8 = vld [vmem:[#allocation8 + $0x6e8] sm:$0xf0] }
 0x18a   :  { %3828 = vmatpush.bf16.msra.mxu2 %v5042_v43  ;;  %3795 = vmatmul.bf16.vlgmr.msrb.gmra.mxu3 %v7562_v47  ;;  %v6404_v20 = vld [vmem:[#allocation8 + $0xc] sm:$0xf]  ;;  %v5234_v16 = vor.u32 %v6620_v7, %v5231_v8 }
 0x18b   :  { %3839 = vmatpush.bf16.msra.mxu3 %v5362_v49  ;;  %v4367_v19 = vld [vmem:[#allocation8 + $0x28] sm:$0xf0]  ;;  %v4914_v49 = vor.u32 %v6540_v26, %v4911_v11 }
 0x18c   :  { %3816 = vmatpush.bf16.msra.mxu1 %v4754_v54  ;;  %v6716_v10 = vld [vmem:[#allocation8 + $0x9cc] sm:$0xf]  ;;  %v4370_v31 = vor.u32 %v6404_v20, %v4367_v19 }
 0x18d   :  { %3804 = vmatpush.bf16.msra.mxu0 %v4466_v56  ;;  %v5615_v43 = vld [vmem:[#allocation8 + $0x9e8] sm:$0xf0] }
 0x18e   :  { %3829 = vmatpush.bf16.msra.mxu2 %v5010_v12  ;;  %v6612_v34 = vld [vmem:[#allocation8 + $0x68c] sm:$0xf] }
 0x18f   :  { %3840 = vmatpush.bf16.msra.mxu3 %v5330_v50  ;;  %v6468_v42 = vld [vmem:[#allocation8 + $0x20c] sm:$0xf]  ;;  %v5618_v50 = vor.u32 %v6716_v10, %v5615_v43 }
 0x190   :  { %3817 = vmatpush.bf16.msra.mxu1 %v4722_v28  ;;  %v4623_v25 = vld [vmem:[#allocation8 + $0x228] sm:$0xf0] }
 0x191   :  { %3805 = vmatpush.bf16.msra.mxu0 %v4434_v4  ;;  %v6532_v53 = vld [vmem:[#allocation8 + $0x40c] sm:$0xf]  ;;  %v4626_v58 = vor.u32 %v6468_v42, %v4623_v25 }
 0x192   :  { %3830 = vmatpush.bf16.msra.mxu2 %v4978_v0  ;;  %v4879_v54 = vld [vmem:[#allocation8 + $0x428] sm:$0xf0] }
 0x193   :  { %3841 = vmatpush.bf16.msra.mxu3 %v5298_v55  ;;  %v6780_v12 = vld [vmem:[#allocation8 + $0xbcc] sm:$0xf]  ;;  %v4882_v22 = vor.u32 %v6532_v53, %v4879_v54 }
 0x194   :  { %3818 = vmatpush.bf16.msra.mxu1 %v4690_v33  ;;  %v5871_v46 = vld [vmem:[#allocation8 + $0xbe8] sm:$0xf0] }
 0x195   :  { %3806 = vmatpush.bf16.msra.mxu0 %v4402_v18  ;;  %v5199_v52 = vld [vmem:[#allocation8 + $0x6a8] sm:$0xf0]  ;;  %v5874_v28 = vor.u32 %v6780_v12, %v5871_v46 }
 0x196   :  { %3831 = vmatpush.bf16.msra.mxu2 %v4946_v5  ;;  %v6844_v59 = vld [vmem:[#allocation8 + $0xdcc] sm:$0xf]  ;;  %v5202_v0 = vor.u32 %v6612_v34, %v5199_v52  ;;  %v3551_v5 = vpop.f32.mrf.mxu0  ;;  %v3511_v34 = vadd.f32 %v7580_v60, %v3498_v6 }
 0x197   :  { %3842 = vmatpush.bf16.msra.mxu3 %v5266_v14  ;;  %v6127_v56 = vld [vmem:[#allocation8 + $0xde8] sm:$0xf0] }
 0x198   :  { %3819 = vmatpush.bf16.msra.mxu1 %v4658_v37  ;;  %v6708_v62 = vld [vmem:[#allocation8 + $0x98c] sm:$0xf]  ;;  %v6130_v1 = vor.u32 %v6844_v59, %v6127_v56  ;;  %v3577_v56 = vpop.f32.mrf.mxu2  ;;  %v3524_v60 = vadd.f32 %v7583_v35, %v3511_v34 }
 0x199   :  { %v5583_v63 = vld [vmem:[#allocation8 + $0x9a8] sm:$0xf0]  ;;  %3807 = vmatpush.bf16.msra.mxu0 %v4370_v31 }
 0x19a   :  { %3832 = vmatpush.bf16.msra.mxu2 %v4914_v49  ;;  %v6604_v45 = vld [vmem:[#allocation8 + $0x64c] sm:$0xf]  ;;  %v5586_v9 = vor.u32 %v6708_v62, %v5583_v63  ;;  %v3537_v35 = vadd.f32 %v7585_v29, %v3524_v60 }
 0x19b   :  { %3843 = vmatpush.bf16.msra.mxu3 %v5234_v16  ;;  %v6772_v40 = vld [vmem:[#allocation8 + $0xb8c] sm:$0xf] }
 0x19c   :  { %v5839_v55 = vld [vmem:[#allocation8 + $0xba8] sm:$0xf0]  ;;  %3820 = vmatpush.bf16.msra.mxu1 %v4626_v58  ;;  %3808 = vmatmul.bf16.vlgmr.msra.gmra.mxu0 %v7457_v44 }
 0x19d   :  { %v5167_v3 = vld [vmem:[#allocation8 + $0x668] sm:$0xf0]  ;;  %3852 = vmatpush.bf16.msrb.mxu0 %v5618_v50  ;;  %v5842_v33 = vor.u32 %v6772_v40, %v5839_v55  ;;  %v3562_v50 = vpop.f32.mrf.mxu1 }
 0x19e   :  { %v6836_v4 = vld [vmem:[#allocation8 + $0xd8c] sm:$0xf]  ;;  %3833 = vmatpush.bf16.msra.mxu2 %v4882_v22  ;;  %v5170_v13 = vor.u32 %v6604_v45, %v5167_v3  ;;  %v7600_v3 = vpop.f32.mrf.mxu0 }
 0x19f   :  { %v6095_v2 = vld [vmem:[#allocation8 + $0xda8] sm:$0xf0]  ;;  %3844 = vmatpush.bf16.msra.mxu3 %v5202_v0  ;;  %3821 = vmatmul.bf16.vlgmr.msra.gmra.mxu1 %v7461_v30 }
 0x1a0   :  { %v6700_v38 = vld [vmem:[#allocation8 + $0x94c] sm:$0xf]  ;;  %3865 = vmatpush.bf16.msrb.mxu1 %v5874_v28  ;;  %v6098_v7 = vor.u32 %v6836_v4, %v6095_v2  ;;  %v7605_v29 = vpop.f32.mrf.mxu2 }
 0x1a1   :  { %v5551_v39 = vld [vmem:[#allocation8 + $0x968] sm:$0xf0]  ;;  %3853 = vmatpush.bf16.msrb.mxu0 %v5586_v9  ;;  %3834 = vmatmul.bf16.vlgmr.msra.gmra.mxu2 %v7467_v41 }
 0x1a2   :  { %v6596_v57 = vld [vmem:[#allocation8 + $0x60c] sm:$0xf]  ;;  %3878 = vmatpush.bf16.msrb.mxu2 %v6130_v1  ;;  %v5554_v8 = vor.u32 %v6700_v38, %v5551_v39 }
 0x1a3   :  { %v5135_v14 = vld [vmem:[#allocation8 + $0x628] sm:$0xf0]  ;;  %3845 = vmatpush.bf16.msra.mxu3 %v5170_v13  ;;  %v3550_v13 = vadd.f32 %v7589_v51, %v3537_v35 }
 0x1a4   :  { %v6764_v18 = vld [vmem:[#allocation8 + $0xb4c] sm:$0xf]  ;;  %3866 = vmatpush.bf16.msrb.mxu1 %v5842_v33  ;;  %v5138_v24 = vor.u32 %v6596_v57, %v5135_v14 }
 0x1a5   :  { %v5807_v26 = vld [vmem:[#allocation8 + $0xb68] sm:$0xf0]  ;;  %3854 = vmatpush.bf16.msrb.mxu0 %v5554_v8  ;;  %v3563_v51 = vadd.f32 %v3562_v50, %v3550_v13 }
 0x1a6   :  { %v6908_v11 = vld [vmem:[#allocation8 + $0xfcc] sm:$0xf]  ;;  %v5810_v15 = vor.u32 %v6764_v18, %v5807_v26  ;;  %3879 = vmatpush.bf16.msrb.mxu2 %v6098_v7  ;;  %v3564_v26 = vpop.f32.mrf.mxu1 }
 0x1a7   :  { %v6828_v20 = vld [vmem:[#allocation8 + $0xd4c] sm:$0xf]  ;;  %3846 = vmatpush.bf16.msra.mxu3 %v5138_v24  ;;  %v4533_v26 = vld [vmem:[#allocation8 + $0x150] sm:$0xf] }
 0x1a8   :  { %v6063_v19 = vld [vmem:[#allocation8 + $0xd68] sm:$0xf0]  ;;  %3867 = vmatpush.bf16.msrb.mxu1 %v5810_v15 }
 0x1a9   :  { %v6383_v37 = vld [vmem:[#allocation8 + $0xfe8] sm:$0xf0]  ;;  %v6066_v49 = vor.u32 %v6828_v20, %v6063_v19 }
 0x1aa   :  { %v6692_v10 = vld [vmem:[#allocation8 + $0x90c] sm:$0xf]  ;;  %v6386_v53 = vor.u32 %v6908_v11, %v6383_v37  ;;  %3847 = vmatmul.bf16.vlgmr.msra.gmra.mxu3 %v7479_v48 }
 0x1ab   :  { %v5519_v43 = vld [vmem:[#allocation8 + $0x928] sm:$0xf0]  ;;  %3880 = vmatpush.bf16.msrb.mxu2 %v6066_v49 }
 0x1ac   :  { %v6756_v42 = vld [vmem:[#allocation8 + $0xb0c] sm:$0xf]  ;;  %v5522_v17 = vor.u32 %v6692_v10, %v5519_v43  ;;  %3891 = vmatpush.bf16.msrb.mxu3 %v6386_v53 }
 0x1ad   :  { %v5775_v25 = vld [vmem:[#allocation8 + $0xb28] sm:$0xf0] }
 0x1ae   :  { %v6900_v16 = vld [vmem:[#allocation8 + $0xf8c] sm:$0xf]  ;;  %v5778_v59 = vor.u32 %v6756_v42, %v5775_v25  ;;  %3855 = vmatpush.bf16.msrb.mxu0 %v5522_v17  ;;  %v3603_v25 = vpop.f32.mrf.mxu0  ;;  %v6465_v17 = vld [vmem:[#allocation8 + $0x1ec] sm:$0xf0] }
 0x1af   :  { %v6820_v31 = vld [vmem:[#allocation8 + $0xd0c] sm:$0xf] }
 0x1b0   :  { %v6031_v54 = vld [vmem:[#allocation8 + $0xd28] sm:$0xf0]  ;;  %3868 = vmatpush.bf16.msrb.mxu1 %v5778_v59 }
 0x1b1   :  { %v6351_v12 = vld [vmem:[#allocation8 + $0xfa8] sm:$0xf0]  ;;  %v6034_v58 = vor.u32 %v6820_v31, %v6031_v54  ;;  %v3576_v31 = vadd.f32 %v7592_v23, %v3563_v51  ;;  %v5365_v51 = vld [vmem:[#allocation8 + $0x7d0] sm:$0xf] }
 0x1b2   :  { %v6684_v46 = vld [vmem:[#allocation8 + $0x8cc] sm:$0xf]  ;;  %v6354_v32 = vor.u32 %v6900_v16, %v6351_v12  ;;  %v4597_v16 = vld [vmem:[#allocation8 + $0x1d0] sm:$0xf] }
 0x1b3   :  { %v5487_v52 = vld [vmem:[#allocation8 + $0x8e8] sm:$0xf0]  ;;  %3881 = vmatpush.bf16.msrb.mxu2 %v6034_v58  ;;  %v4853_v58 = vld [vmem:[#allocation8 + $0x3d0] sm:$0xf] }
 0x1b4   :  { %v6748_v62 = vld [vmem:[#allocation8 + $0xacc] sm:$0xf]  ;;  %v5490_v28 = vor.u32 %v6684_v46, %v5487_v52  ;;  %3892 = vmatpush.bf16.msrb.mxu3 %v6354_v32  ;;  %v4598_v32 = vor.u32 %v6465_v17, %v4597_v16  ;;  %v4501_v16 = vld [vmem:[#allocation8 + $0x110] sm:$0xf] }
 0x1b5   :  { %v5743_v63 = vld [vmem:[#allocation8 + $0xae8] sm:$0xf0]  ;;  %v6441_v17 = vld [vmem:[#allocation8 + $0x12c] sm:$0xf0] }
 0x1b6   :  { %v6892_v22 = vld [vmem:[#allocation8 + $0xf4c] sm:$0xf]  ;;  %v5746_v9 = vor.u32 %v6748_v62, %v5743_v63  ;;  %3856 = vmatpush.bf16.msrb.mxu0 %v5490_v28  ;;  %v6529_v62 = vld [vmem:[#allocation8 + $0x3ec] sm:$0xf0] }
 0x1b7   :  { %v6812_v0 = vld [vmem:[#allocation8 + $0xccc] sm:$0xf]  ;;  %v6593_v28 = vld [vmem:[#allocation8 + $0x5ec] sm:$0xf0] }
 0x1b8   :  { %v5999_v45 = vld [vmem:[#allocation8 + $0xce8] sm:$0xf0]  ;;  %3869 = vmatpush.bf16.msrb.mxu1 %v5746_v9 }
 0x1b9   :  { %v6319_v1 = vld [vmem:[#allocation8 + $0xf68] sm:$0xf0]  ;;  %v6002_v4 = vor.u32 %v6812_v0, %v5999_v45  ;;  %v3588_v0 = vpop.f32.mrf.mxu3  ;;  %v3614_v45 = vpop.f32.mrf.mxu1 }
 0x1ba   :  { %v6676_v40 = vld [vmem:[#allocation8 + $0x88c] sm:$0xf]  ;;  %v6322_v39 = vor.u32 %v6892_v22, %v6319_v1  ;;  %v5109_v22 = vld [vmem:[#allocation8 + $0x5d0] sm:$0xf] }
 0x1bb   :  { %v5455_v55 = vld [vmem:[#allocation8 + $0x8a8] sm:$0xf0]  ;;  %3882 = vmatpush.bf16.msrb.mxu2 %v6002_v4  ;;  %v4565_v1 = vld [vmem:[#allocation8 + $0x190] sm:$0xf]  ;;  %v4854_v4 = vor.u32 %v6529_v62, %v4853_v58 }
 0x1bc   :  { %v6740_v2 = vld [vmem:[#allocation8 + $0xa8c] sm:$0xf]  ;;  %v5458_v33 = vor.u32 %v6676_v40, %v5455_v55  ;;  %3893 = vmatpush.bf16.msrb.mxu3 %v6322_v39  ;;  %v6457_v40 = vld [vmem:[#allocation8 + $0x1ac] sm:$0xf0]  ;;  %v3589_v55 = vadd.f32 %v3588_v0, %v3576_v31 }
 0x1bd   :  { %v5711_v38 = vld [vmem:[#allocation8 + $0xaa8] sm:$0xf0]  ;;  %v5013_v58 = vld [vmem:[#allocation8 + $0x510] sm:$0xf] }
 0x1be   :  { %v6884_v57 = vld [vmem:[#allocation8 + $0xf0c] sm:$0xf]  ;;  %v5714_v11 = vor.u32 %v6740_v2, %v5711_v38  ;;  %3857 = vmatpush.bf16.msrb.mxu0 %v5458_v33  ;;  %v913_v2 = vperm.slane %v7587_v36, 1  ;;  %v3629_v38 = vpop.f32.mrf.mxu2  ;;  %v5110_v33 = vor.u32 %v6593_v28, %v5109_v22  ;;  %v4320_v13 = vmax.f32 %v3589_v55, 0.0  ;;  %v6569_v62 = vld [vmem:[#allocation8 + $0x52c] sm:$0xf0] }
 0x1bf   :  { %v6804_v5 = vld [vmem:[#allocation8 + $0xc8c] sm:$0xf]  ;;  %v6433_v22 = vld [vmem:[#allocation8 + $0xec] sm:$0xf0] }
 0x1c0   :  { %v5967_v6 = vld [vmem:[#allocation8 + $0xca8] sm:$0xf0]  ;;  %3870 = vmatpush.bf16.msrb.mxu1 %v5714_v11  ;;  %v6449_v11 = vld [vmem:[#allocation8 + $0x16c] sm:$0xf0]  ;;  %4328 = vst [vmem:[#allocation11] sm:$0xff] %v4320_v13 }
 0x1c1   :  { %v6287_v14 = vld [vmem:[#allocation8 + $0xf28] sm:$0xf0]  ;;  %v5970_v8 = vor.u32 %v6804_v5, %v5967_v6  ;;  %v4821_v5 = vld [vmem:[#allocation8 + $0x390] sm:$0xf]  ;;  %v3590_v25 = vpop.f32.mrf.mxu3 }
 0x1c2   :  { %v6668_v7 = vld [vmem:[#allocation8 + $0x84c] sm:$0xf]  ;;  %v6290_v37 = vor.u32 %v6884_v57, %v6287_v14  ;;  %v6521_v6 = vld [vmem:[#allocation8 + $0x3ac] sm:$0xf0]  ;;  %v4566_v14 = vor.u32 %v6457_v40, %v4565_v1 }
 0x1c3   :  { %v5423_v18 = vld [vmem:[#allocation8 + $0x868] sm:$0xf0]  ;;  %3883 = vmatpush.bf16.msrb.mxu2 %v5970_v8  ;;  %v6497_v1 = vld [vmem:[#allocation8 + $0x2ec] sm:$0xf0] }
 0x1c4   :  { %v6732_v20 = vld [vmem:[#allocation8 + $0xa4c] sm:$0xf]  ;;  %v5426_v43 = vor.u32 %v6668_v7, %v5423_v18  ;;  %3894 = vmatpush.bf16.msrb.mxu3 %v6290_v37  ;;  %v5077_v7 = vld [vmem:[#allocation8 + $0x590] sm:$0xf] }
 0x1c5   :  { %v5679_v19 = vld [vmem:[#allocation8 + $0xa68] sm:$0xf0]  ;;  %v6585_v18 = vld [vmem:[#allocation8 + $0x5ac] sm:$0xf0] }
 0x1c6   :  { %v6876_v10 = vld [vmem:[#allocation8 + $0xecc] sm:$0xf]  ;;  %v5682_v53 = vor.u32 %v6732_v20, %v5679_v19  ;;  %3858 = vmatpush.bf16.msrb.mxu0 %v5426_v43  ;;  %v3602_v20 = vadd.f32 %v7600_v3, %v913_v2  ;;  %v4822_v19 = vor.u32 %v6521_v6, %v4821_v5  ;;  %v5078_v43 = vor.u32 %v6585_v18, %v5077_v7  ;;  %v3616_v3 = vpop.f32.mrf.mxu1  ;;  %v5301_v55 = vld [vmem:[#allocation8 + $0x750] sm:$0xf] }
 0x1c7   :  { %v6796_v15 = vld [vmem:[#allocation8 + $0xc4c] sm:$0xf]  ;;  %v6641_v38 = vld [vmem:[#allocation8 + $0x76c] sm:$0xf0] }
 0x1c8   :  { %v5935_v34 = vld [vmem:[#allocation8 + $0xc68] sm:$0xf0]  ;;  %3871 = vmatpush.bf16.msrb.mxu1 %v5682_v53  ;;  %v6657_v53 = vld [vmem:[#allocation8 + $0x7ec] sm:$0xf0]  ;;  %v3615_v31 = vadd.f32 %v3614_v45, %v3602_v20  ;;  %v5302_v18 = vor.u32 %v6641_v38, %v5301_v55 }
 0x1c9   :  { %v6255_v24 = vld [vmem:[#allocation8 + $0xee8] sm:$0xf0]  ;;  %v5938_v12 = vor.u32 %v6796_v15, %v5935_v34  ;;  %v4789_v15 = vld [vmem:[#allocation8 + $0x350] sm:$0xf]  ;;  %v3640_v2 = vpop.f32.mrf.mxu3 }
 0x1ca   :  { %v6660_v49 = vld [vmem:[#allocation8 + $0x80c] sm:$0xf]  ;;  %v6258_v56 = vor.u32 %v6876_v10, %v6255_v24  ;;  %v6513_v34 = vld [vmem:[#allocation8 + $0x36c] sm:$0xf0]  ;;  %v4534_v24 = vor.u32 %v6449_v11, %v4533_v26  ;;  %v3628_v28 = vadd.f32 %v7605_v29, %v3615_v31 }
 0x1cb   :  { %v5391_v42 = vld [vmem:[#allocation8 + $0x828] sm:$0xf0]  ;;  %3884 = vmatpush.bf16.msrb.mxu2 %v5938_v12  ;;  %v4725_v45 = vld [vmem:[#allocation8 + $0x2d0] sm:$0xf] }
 0x1cc   :  { %v6868_v54 = vld [vmem:[#allocation8 + $0xe8c] sm:$0xf]  ;;  %v5394_v50 = vor.u32 %v6660_v49, %v5391_v42  ;;  %3895 = vmatpush.bf16.msrb.mxu3 %v6258_v56  ;;  %v5045_v49 = vld [vmem:[#allocation8 + $0x550] sm:$0xf]  ;;  %v5366_v56 = vor.u32 %v6657_v53, %v5365_v51  ;;  %v3641_v29 = vadd.f32 %v3640_v2, %v3628_v28  ;;  %v4726_v5 = vor.u32 %v6497_v1, %v4725_v45  ;;  %v3679_v51 = vpop.f32.mrf.mxu2 }
 0x1cd   :  { %v6724_v46 = vld [vmem:[#allocation8 + $0xa0c] sm:$0xf]  ;;  %v6577_v42 = vld [vmem:[#allocation8 + $0x56c] sm:$0xf0] }
 0x1ce   :  { %v5647_v52 = vld [vmem:[#allocation8 + $0xa28] sm:$0xf0]  ;;  %3859 = vmatpush.bf16.msrb.mxu0 %v5394_v50  ;;  %v5333_v50 = vld [vmem:[#allocation8 + $0x790] sm:$0xf]  ;;  %v3666_v6 = vpop.f32.mrf.mxu1 }
 0x1cf   :  { %v6788_v59 = vld [vmem:[#allocation8 + $0xc0c] sm:$0xf]  ;;  %v5650_v23 = vor.u32 %v6724_v46, %v5647_v52  ;;  %v5046_v46 = vor.u32 %v6577_v42, %v5045_v49  ;;  %v4757_v52 = vld [vmem:[#allocation8 + $0x310] sm:$0xf] }
 0x1d0   :  { %v5903_v60 = vld [vmem:[#allocation8 + $0xc28] sm:$0xf0]  ;;  %v6489_v7 = vld [vmem:[#allocation8 + $0x2ac] sm:$0xf0] }
 0x1d1   :  { %v6223_v63 = vld [vmem:[#allocation8 + $0xea8] sm:$0xf0]  ;;  %v5906_v35 = vor.u32 %v6788_v59, %v5903_v60  ;;  %3872 = vmatpush.bf16.msrb.mxu1 %v5650_v23  ;;  %3860 = vmatmul.bf16.vlgmr.msrb.gmra.mxu0 %v7508_v27  ;;  %v6505_v59 = vld [vmem:[#allocation8 + $0x32c] sm:$0xf0]  ;;  %v4502_v60 = vor.u32 %v6441_v17, %v4501_v16  ;;  %v5014_v23 = vor.u32 %v6569_v62, %v5013_v58  ;;  %v3642_v17 = vpop.f32.mrf.mxu3 }
 0x1d2   :  { %v6860_v9 = vld [vmem:[#allocation8 + $0xe4c] sm:$0xf]  ;;  %v6226_v39 = vor.u32 %v6868_v54, %v6223_v63  ;;  %3904 = vmatpush.bf16.msra.mxu0 %v4598_v32  ;;  %v4790_v54 = vor.u32 %v6513_v34, %v4789_v15  ;;  %v6649_v63 = vld [vmem:[#allocation8 + $0x7ac] sm:$0xf0]  ;;  %v4758_v0 = vor.u32 %v6505_v59, %v4757_v52 }
 0x1d3   :  { %v6191_v57 = vld [vmem:[#allocation8 + $0xe68] sm:$0xf0]  ;;  %3885 = vmatpush.bf16.msrb.mxu2 %v5906_v35  ;;  %v4469_v32 = vld [vmem:[#allocation8 + $0xd0] sm:$0xf]  ;;  %v5334_v40 = vor.u32 %v6649_v63, %v5333_v50 }
 0x1d4   :  { %v6852_v8 = vld [vmem:[#allocation8 + $0xe0c] sm:$0xf]  ;;  %3896 = vmatpush.bf16.msrb.mxu3 %v6226_v39  ;;  %v6194_v37 = vor.u32 %v6860_v9, %v6191_v57  ;;  %3873 = vmatmul.bf16.vlgmr.msrb.gmra.mxu1 %v7552_v61  ;;  %v4470_v9 = vor.u32 %v6433_v22, %v4469_v32  ;;  %v4981_v35 = vld [vmem:[#allocation8 + $0x4d0] sm:$0xf]  ;;  %v3653_v39 = vpop.f32.mrf.mxu0 }
 0x1d5   :  { %3917 = vmatpush.bf16.msra.mxu1 %v4854_v4  ;;  %v6159_v10 = vld [vmem:[#allocation8 + $0xe28] sm:$0xf0]  ;;  %v6561_v4 = vld [vmem:[#allocation8 + $0x4ec] sm:$0xf0] }
 0x1d6   :  { %3905 = vmatpush.bf16.msra.mxu0 %v4566_v14  ;;  %3886 = vmatmul.bf16.vlgmr.msrb.gmra.mxu2 %v7513_v21  ;;  %v6162_v12 = vor.u32 %v6852_v8, %v6159_v10  ;;  %v4437_v57 = vld [vmem:[#allocation8 + $0x90] sm:$0xf]  ;;  %v4982_v13 = vor.u32 %v6561_v4, %v4981_v35 }
 0x1d7   :  { %3930 = vmatpush.bf16.msra.mxu2 %v5110_v33  ;;  %v6425_v33 = vld [vmem:[#allocation8 + $0xac] sm:$0xf0] }
 0x1d8   :  { %3897 = vmatpush.bf16.msrb.mxu3 %v6194_v37  ;;  %v4693_v14 = vld [vmem:[#allocation8 + $0x290] sm:$0xf]  ;;  %v4438_v11 = vor.u32 %v6425_v33, %v4437_v57 }
 0x1d9   :  { %3918 = vmatpush.bf16.msra.mxu1 %v4822_v19  ;;  %v5269_v26 = vld [vmem:[#allocation8 + $0x710] sm:$0xf]  ;;  %v4694_v15 = vor.u32 %v6489_v7, %v4693_v14 }
 0x1da   :  { %3906 = vmatpush.bf16.msra.mxu0 %v4534_v24  ;;  %v4949_v8 = vld [vmem:[#allocation8 + $0x490] sm:$0xf] }
 0x1db   :  { %3931 = vmatpush.bf16.msra.mxu2 %v5078_v43  ;;  %v6553_v20 = vld [vmem:[#allocation8 + $0x4ac] sm:$0xf0]  ;;  %v3654_v43 = vadd.f32 %v3653_v39, %v3641_v29  ;;  %v3681_v29 = vpop.f32.mrf.mxu2 }
 0x1dc   :  { %3898 = vmatpush.bf16.msrb.mxu3 %v6162_v12  ;;  %v6633_v19 = vld [vmem:[#allocation8 + $0x72c] sm:$0xf0]  ;;  %v4950_v34 = vor.u32 %v6553_v20, %v4949_v8 }
 0x1dd   :  { %3919 = vmatpush.bf16.msra.mxu1 %v4790_v54  ;;  %v4405_v37 = vld [vmem:[#allocation8 + $0x50] sm:$0xf]  ;;  %v5270_v42 = vor.u32 %v6633_v19, %v5269_v26  ;;  %v3667_v52 = vadd.f32 %v3666_v6, %v3654_v43 }
 0x1de   :  { %3907 = vmatpush.bf16.msra.mxu0 %v4502_v60  ;;  %v6417_v10 = vld [vmem:[#allocation8 + $0x6c] sm:$0xf0]  ;;  %v3668_v60 = vpop.f32.mrf.mxu1 }
 0x1df   :  { %3932 = vmatpush.bf16.msra.mxu2 %v5046_v46  ;;  %3899 = vmatmul.bf16.vlgmr.msrb.gmra.mxu3 %v7562_v47  ;;  %v4661_v24 = vld [vmem:[#allocation8 + $0x250] sm:$0xf]  ;;  %v4406_v53 = vor.u32 %v6417_v10, %v4405_v37  ;;  %v3655_v46 = vpop.f32.mrf.mxu0  ;;  %v3680_v4 = vadd.f32 %v3679_v51, %v3667_v52 }
 0x1e0   :  { %3943 = vmatpush.bf16.msra.mxu3 %v5366_v56  ;;  %v6481_v49 = vld [vmem:[#allocation8 + $0x26c] sm:$0xf0] }
 0x1e1   :  { %3920 = vmatpush.bf16.msra.mxu1 %v4758_v0  ;;  %v5237_v25 = vld [vmem:[#allocation8 + $0x6d0] sm:$0xf]  ;;  %v4662_v59 = vor.u32 %v6481_v49, %v4661_v24 }
 0x1e2   :  { %3908 = vmatpush.bf16.msra.mxu0 %v4470_v9  ;;  %v4917_v3 = vld [vmem:[#allocation8 + $0x450] sm:$0xf] }
 0x1e3   :  { %3933 = vmatpush.bf16.msra.mxu2 %v5014_v23  ;;  %v6545_v16 = vld [vmem:[#allocation8 + $0x46c] sm:$0xf0] }
 0x1e4   :  { %3944 = vmatpush.bf16.msra.mxu3 %v5334_v40  ;;  %v6625_v31 = vld [vmem:[#allocation8 + $0x6ec] sm:$0xf0]  ;;  %v4918_v62 = vor.u32 %v6545_v16, %v4917_v3 }
 0x1e5   :  { %3921 = vmatpush.bf16.msra.mxu1 %v4726_v5  ;;  %v4373_v54 = vld [vmem:[#allocation8 + $0x10] sm:$0xf]  ;;  %v5238_v28 = vor.u32 %v6625_v31, %v5237_v25 }
 0x1e6   :  { %3909 = vmatpush.bf16.msra.mxu0 %v4438_v11  ;;  %v6409_v12 = vld [vmem:[#allocation8 + $0x2c] sm:$0xf0] }
 0x1e7   :  { %3934 = vmatpush.bf16.msra.mxu2 %v4982_v13  ;;  %v5621_v56 = vld [vmem:[#allocation8 + $0x9d0] sm:$0xf]  ;;  %v4374_v0 = vor.u32 %v6409_v12, %v4373_v54 }
 0x1e8   :  { %3945 = vmatpush.bf16.msra.mxu3 %v5302_v18  ;;  %v6721_v50 = vld [vmem:[#allocation8 + $0x9ec] sm:$0xf0]  ;;  %v3692_v18 = vpop.f32.mrf.mxu3 }
 0x1e9   :  { %3922 = vmatpush.bf16.msra.mxu1 %v4694_v15  ;;  %v5205_v58 = vld [vmem:[#allocation8 + $0x690] sm:$0xf]  ;;  %v5622_v55 = vor.u32 %v6721_v50, %v5621_v56  ;;  %v3693_v19 = vadd.f32 %v3692_v18, %v3680_v4 }
 0x1ea   :  { %v4629_v63 = vld [vmem:[#allocation8 + $0x210] sm:$0xf]  ;;  %3910 = vmatpush.bf16.msra.mxu0 %v4406_v53 }
 0x1eb   :  { %3935 = vmatpush.bf16.msra.mxu2 %v4950_v34  ;;  %v6473_v32 = vld [vmem:[#allocation8 + $0x22c] sm:$0xf0]  ;;  %v4321_v51 = vmax.f32 %v3693_v19, 0.0 }
 0x1ec   :  { %v4885_v22 = vld [vmem:[#allocation8 + $0x410] sm:$0xf]  ;;  %3946 = vmatpush.bf16.msra.mxu3 %v5270_v42  ;;  %v4630_v2 = vor.u32 %v6473_v32, %v4629_v63 }
 0x1ed   :  { %v6537_v23 = vld [vmem:[#allocation8 + $0x42c] sm:$0xf0]  ;;  %3923 = vmatpush.bf16.msra.mxu1 %v4662_v59  ;;  %4329 = vst [vmem:[#allocation11 + $0x8] sm:$0xff] %v4321_v51 }
 0x1ee   :  { %v5877_v45 = vld [vmem:[#allocation8 + $0xbd0] sm:$0xf]  ;;  %v4886_v57 = vor.u32 %v6537_v23, %v4885_v22  ;;  %3911 = vmatpush.bf16.msra.mxu0 %v4374_v0 }
 0x1ef   :  { %v6785_v1 = vld [vmem:[#allocation8 + $0xbec] sm:$0xf0]  ;;  %3936 = vmatpush.bf16.msra.mxu2 %v4918_v62 }
 0x1f0   :  { %v6617_v40 = vld [vmem:[#allocation8 + $0x6ac] sm:$0xf0]  ;;  %v5878_v33 = vor.u32 %v6785_v1, %v5877_v45  ;;  %3947 = vmatpush.bf16.msra.mxu3 %v5238_v28  ;;  %v3694_v22 = vpop.f32.mrf.mxu3  ;;  %v7618_v1 = vpop.f32.mrf.mxu0 }
 0x1f1   :  { %v6133_v9 = vld [vmem:[#allocation8 + $0xdd0] sm:$0xf]  ;;  %v5206_v5 = vor.u32 %v6617_v40, %v5205_v58  ;;  %3924 = vmatpush.bf16.msra.mxu1 %v4630_v2  ;;  %3912 = vmatmul.bf16.vlgmr.msra.gmra.mxu0 %v7457_v44 }
 0x1f2   :  { %v6849_v35 = vld [vmem:[#allocation8 + $0xdec] sm:$0xf0]  ;;  %3956 = vmatpush.bf16.msrb.mxu0 %v5622_v55 }
 0x1f3   :  { %v5589_v38 = vld [vmem:[#allocation8 + $0x990] sm:$0xf]  ;;  %v6134_v13 = vor.u32 %v6849_v35, %v6133_v9  ;;  %3937 = vmatpush.bf16.msra.mxu2 %v4886_v57 }
 0x1f4   :  { %v6713_v39 = vld [vmem:[#allocation8 + $0x9ac] sm:$0xf0]  ;;  %3948 = vmatpush.bf16.msra.mxu3 %v5206_v5  ;;  %3925 = vmatmul.bf16.vlgmr.msra.gmra.mxu1 %v7461_v30  ;;  %v7620_v5 = vpop.f32.mrf.mxu1 }
 0x1f5   :  { %v5173_v6 = vld [vmem:[#allocation8 + $0x650] sm:$0xf]  ;;  %v5590_v11 = vor.u32 %v6713_v39, %v5589_v38  ;;  %3969 = vmatpush.bf16.msrb.mxu1 %v5878_v33 }
 0x1f6   :  { %v5845_v14 = vld [vmem:[#allocation8 + $0xb90] sm:$0xf]  ;;  %3938 = vmatmul.bf16.vlgmr.msra.gmra.mxu2 %v7467_v41 }
 0x1f7   :  { %v6777_v7 = vld [vmem:[#allocation8 + $0xbac] sm:$0xf0]  ;;  %3982 = vmatpush.bf16.msrb.mxu2 %v6134_v13  ;;  %3957 = vmatpush.bf16.msrb.mxu0 %v5590_v11 }
 0x1f8   :  { %v6609_v26 = vld [vmem:[#allocation8 + $0x66c] sm:$0xf0]  ;;  %v5846_v34 = vor.u32 %v6777_v7, %v5845_v14 }
 0x1f9   :  { %v6101_v8 = vld [vmem:[#allocation8 + $0xd90] sm:$0xf]  ;;  %v5174_v24 = vor.u32 %v6609_v26, %v5173_v6 }
 0x1fa   :  { %v6841_v20 = vld [vmem:[#allocation8 + $0xdac] sm:$0xf0]  ;;  %3970 = vmatpush.bf16.msrb.mxu1 %v5846_v34 }
 0x1fb   :  { %v5557_v37 = vld [vmem:[#allocation8 + $0x950] sm:$0xf]  ;;  %v6102_v42 = vor.u32 %v6841_v20, %v6101_v8  ;;  %3949 = vmatpush.bf16.msra.mxu3 %v5174_v24 }
 0x1fc   :  { %v6705_v10 = vld [vmem:[#allocation8 + $0x96c] sm:$0xf0] }
 0x1fd   :  { %v5141_v43 = vld [vmem:[#allocation8 + $0x610] sm:$0xf]  ;;  %v5558_v16 = vor.u32 %v6705_v10, %v5557_v37  ;;  %3983 = vmatpush.bf16.msrb.mxu2 %v6102_v42 }
 0x1fe   :  { %v6601_v15 = vld [vmem:[#allocation8 + $0x62c] sm:$0xf0] }
 0x1ff   :  { %v6389_v49 = vld [vmem:[#allocation8 + $0xfd0] sm:$0xf]  ;;  %v5142_v52 = vor.u32 %v6601_v15, %v5141_v43  ;;  %3958 = vmatpush.bf16.msrb.mxu0 %v5558_v16  ;;  %v3707_v15 = vpop.f32.mrf.mxu0  ;;  %v7623_v16 = vpop.f32.mrf.mxu2 }
 0x200   :  { %v5813_v25 = vld [vmem:[#allocation8 + $0xb50] sm:$0xf] }
 0x201   :  { %v6769_v53 = vld [vmem:[#allocation8 + $0xb6c] sm:$0xf0]  ;;  %3950 = vmatpush.bf16.msra.mxu3 %v5142_v52  ;;  %v6461_v52 = vld [vmem:[#allocation8 + $0x1d4] sm:$0xf] }
 0x202   :  { %v6913_v3 = vld [vmem:[#allocation8 + $0xfec] sm:$0xf0]  ;;  %v5814_v46 = vor.u32 %v6769_v53, %v5813_v25 }
 0x203   :  { %v6069_v17 = vld [vmem:[#allocation8 + $0xd50] sm:$0xf]  ;;  %v6390_v60 = vor.u32 %v6913_v3, %v6389_v49 }
 0x204   :  { %v6833_v31 = vld [vmem:[#allocation8 + $0xd6c] sm:$0xf0]  ;;  %3971 = vmatpush.bf16.msrb.mxu1 %v5814_v46  ;;  %3951 = vmatmul.bf16.vlgmr.msra.gmra.mxu3 %v7479_v48 }
 0x205   :  { %v5525_v54 = vld [vmem:[#allocation8 + $0x910] sm:$0xf]  ;;  %v6070_v59 = vor.u32 %v6833_v31, %v6069_v17  ;;  %3995 = vmatpush.bf16.msrb.mxu3 %v6390_v60 }
 0x206   :  { %v6697_v12 = vld [vmem:[#allocation8 + $0x92c] sm:$0xf0] }
 0x207   :  { %v5781_v56 = vld [vmem:[#allocation8 + $0xb10] sm:$0xf]  ;;  %v5526_v62 = vor.u32 %v6697_v12, %v5525_v54  ;;  %3984 = vmatpush.bf16.msrb.mxu2 %v6070_v59  ;;  %v3720_v12 = vpop.f32.mrf.mxu1  ;;  %v4599_v59 = vld [vmem:[#allocation8 + $0x1f0] sm:$0xf0] }
 0x208   :  { %v6761_v50 = vld [vmem:[#allocation8 + $0xb2c] sm:$0xf0] }
 0x209   :  { %v6357_v58 = vld [vmem:[#allocation8 + $0xf90] sm:$0xf]  ;;  %v5782_v45 = vor.u32 %v6761_v50, %v5781_v56  ;;  %3959 = vmatpush.bf16.msrb.mxu0 %v5526_v62 }
 0x20a   :  { %v6037_v63 = vld [vmem:[#allocation8 + $0xd10] sm:$0xf] }
 0x20b   :  { %v6825_v32 = vld [vmem:[#allocation8 + $0xd2c] sm:$0xf0]  ;;  %3972 = vmatpush.bf16.msrb.mxu1 %v5782_v45  ;;  %v4602_v45 = vor.u32 %v6461_v52, %v4599_v59  ;;  %v6501_v52 = vld [vmem:[#allocation8 + $0x314] sm:$0xf] }
 0x20c   :  { %v6905_v28 = vld [vmem:[#allocation8 + $0xfac] sm:$0xf0]  ;;  %v6038_v40 = vor.u32 %v6825_v32, %v6037_v63  ;;  %v4759_v59 = vld [vmem:[#allocation8 + $0x330] sm:$0xf0] }
 0x20d   :  { %v5493_v0 = vld [vmem:[#allocation8 + $0x8d0] sm:$0xf]  ;;  %v6358_v35 = vor.u32 %v6905_v28, %v6357_v58  ;;  %v6525_v28 = vld [vmem:[#allocation8 + $0x3d4] sm:$0xf] }
 0x20e   :  { %v6689_v23 = vld [vmem:[#allocation8 + $0x8ec] sm:$0xf0]  ;;  %3985 = vmatpush.bf16.msrb.mxu2 %v6038_v40  ;;  %v6589_v40 = vld [vmem:[#allocation8 + $0x5d4] sm:$0xf] }
 0x20f   :  { %v5749_v55 = vld [vmem:[#allocation8 + $0xad0] sm:$0xf]  ;;  %v5494_v2 = vor.u32 %v6689_v23, %v5493_v0  ;;  %3996 = vmatpush.bf16.msrb.mxu3 %v6358_v35  ;;  %v4855_v0 = vld [vmem:[#allocation8 + $0x3f0] sm:$0xf0] }
 0x210   :  { %v6753_v9 = vld [vmem:[#allocation8 + $0xaec] sm:$0xf0]  ;;  %v6453_v35 = vld [vmem:[#allocation8 + $0x194] sm:$0xf] }
 0x211   :  { %v6325_v4 = vld [vmem:[#allocation8 + $0xf50] sm:$0xf]  ;;  %v5750_v6 = vor.u32 %v6753_v9, %v5749_v55  ;;  %3960 = vmatpush.bf16.msrb.mxu0 %v5494_v2  ;;  %v5111_v55 = vld [vmem:[#allocation8 + $0x5f0] sm:$0xf0] }
 0x212   :  { %v6005_v38 = vld [vmem:[#allocation8 + $0xcd0] sm:$0xf] }
 0x213   :  { %v6817_v39 = vld [vmem:[#allocation8 + $0xcec] sm:$0xf0]  ;;  %3973 = vmatpush.bf16.msrb.mxu1 %v5750_v6  ;;  %v6517_v6 = vld [vmem:[#allocation8 + $0x394] sm:$0xf] }
 0x214   :  { %v6897_v57 = vld [vmem:[#allocation8 + $0xf6c] sm:$0xf0]  ;;  %v6006_v13 = vor.u32 %v6817_v39, %v6005_v38  ;;  %v4858_v38 = vor.u32 %v6525_v28, %v4855_v0  ;;  %v914_v39 = vperm.slane %v7587_v36, 2  ;;  %v4471_v28 = vld [vmem:[#allocation8 + $0xf0] sm:$0xf0]  ;;  %v4762_v0 = vor.u32 %v6501_v52, %v4759_v59 }
 0x215   :  { %v5461_v33 = vld [vmem:[#allocation8 + $0x890] sm:$0xf]  ;;  %v6326_v18 = vor.u32 %v6897_v57, %v6325_v4  ;;  %v4567_v4 = vld [vmem:[#allocation8 + $0x1b0] sm:$0xf0] }
 0x216   :  { %v6681_v29 = vld [vmem:[#allocation8 + $0x8ac] sm:$0xf0]  ;;  %3986 = vmatpush.bf16.msrb.mxu2 %v6006_v13  ;;  %v4823_v13 = vld [vmem:[#allocation8 + $0x3b0] sm:$0xf0] }
 0x217   :  { %v5717_v14 = vld [vmem:[#allocation8 + $0xa90] sm:$0xf]  ;;  %v5462_v11 = vor.u32 %v6681_v29, %v5461_v33  ;;  %3997 = vmatpush.bf16.msrb.mxu3 %v6326_v18  ;;  %v5114_v29 = vor.u32 %v6589_v40, %v5111_v55  ;;  %v4570_v18 = vor.u32 %v6453_v35, %v4567_v4  ;;  %v4727_v40 = vld [vmem:[#allocation8 + $0x2f0] sm:$0xf0] }
 0x218   :  { %v6745_v7 = vld [vmem:[#allocation8 + $0xaac] sm:$0xf0]  ;;  %v6557_v4 = vld [vmem:[#allocation8 + $0x4d4] sm:$0xf] }
 0x219   :  { %v6293_v26 = vld [vmem:[#allocation8 + $0xf10] sm:$0xf]  ;;  %v5718_v43 = vor.u32 %v6745_v7, %v5717_v14  ;;  %3961 = vmatpush.bf16.msrb.mxu0 %v5462_v11  ;;  %v3733_v14 = vpop.f32.mrf.mxu2  ;;  %v5079_v11 = vld [vmem:[#allocation8 + $0x5b0] sm:$0xf0] }
 0x21a   :  { %v5973_v8 = vld [vmem:[#allocation8 + $0xc90] sm:$0xf]  ;;  %v6485_v14 = vld [vmem:[#allocation8 + $0x294] sm:$0xf] }
 0x21b   :  { %v6809_v20 = vld [vmem:[#allocation8 + $0xcac] sm:$0xf0]  ;;  %3974 = vmatpush.bf16.msrb.mxu1 %v5718_v43  ;;  %v6717_v52 = vld [vmem:[#allocation8 + $0x9d4] sm:$0xf] }
 0x21c   :  { %v6889_v19 = vld [vmem:[#allocation8 + $0xf2c] sm:$0xf0]  ;;  %v5974_v34 = vor.u32 %v6809_v20, %v5973_v8  ;;  %v7626_v8 = vpop.f32.mrf.mxu3  ;;  %v6445_v20 = vld [vmem:[#allocation8 + $0x154] sm:$0xf] }
 0x21d   :  { %v5429_v37 = vld [vmem:[#allocation8 + $0x850] sm:$0xf]  ;;  %v6294_v49 = vor.u32 %v6889_v19, %v6293_v26  ;;  %v6581_v26 = vld [vmem:[#allocation8 + $0x594] sm:$0xf] }
 0x21e   :  { %v6673_v10 = vld [vmem:[#allocation8 + $0x86c] sm:$0xf0]  ;;  %3987 = vmatpush.bf16.msrb.mxu2 %v5974_v34  ;;  %v4535_v19 = vld [vmem:[#allocation8 + $0x170] sm:$0xf0]  ;;  %v5082_v34 = vor.u32 %v6581_v26, %v5079_v11 }
 0x21f   :  { %v5685_v51 = vld [vmem:[#allocation8 + $0xa50] sm:$0xf]  ;;  %v5430_v25 = vor.u32 %v6673_v10, %v5429_v37  ;;  %3998 = vmatpush.bf16.msrb.mxu3 %v6294_v49  ;;  %v3706_v37 = vadd.f32 %v7618_v1, %v914_v39  ;;  %v4826_v10 = vor.u32 %v6517_v6, %v4823_v13  ;;  %v6653_v49 = vld [vmem:[#allocation8 + $0x7d4] sm:$0xf]  ;;  %v3770_v39 = vpop.f32.mrf.mxu1  ;;  %v3757_v6 = vpop.f32.mrf.mxu0 }
 0x220   :  { %v6737_v24 = vld [vmem:[#allocation8 + $0xa6c] sm:$0xf0]  ;;  %v6437_v1 = vld [vmem:[#allocation8 + $0x114] sm:$0xf] }
 0x221   :  { %v6261_v42 = vld [vmem:[#allocation8 + $0xed0] sm:$0xf]  ;;  %v5686_v46 = vor.u32 %v6737_v24, %v5685_v51  ;;  %3962 = vmatpush.bf16.msrb.mxu0 %v5430_v25  ;;  %v6509_v51 = vld [vmem:[#allocation8 + $0x354] sm:$0xf] }
 0x222   :  { %v5941_v53 = vld [vmem:[#allocation8 + $0xc50] sm:$0xf]  ;;  %v4791_v24 = vld [vmem:[#allocation8 + $0x370] sm:$0xf0] }
 0x223   :  { %v6801_v3 = vld [vmem:[#allocation8 + $0xc6c] sm:$0xf0]  ;;  %3975 = vmatpush.bf16.msrb.mxu1 %v5686_v46  ;;  %v6573_v25 = vld [vmem:[#allocation8 + $0x554] sm:$0xf] }
 0x224   :  { %v6881_v17 = vld [vmem:[#allocation8 + $0xeec] sm:$0xf0]  ;;  %v5942_v50 = vor.u32 %v6801_v3, %v5941_v53  ;;  %v5047_v53 = vld [vmem:[#allocation8 + $0x570] sm:$0xf0] }
 0x225   :  { %v5397_v31 = vld [vmem:[#allocation8 + $0x810] sm:$0xf]  ;;  %v6262_v63 = vor.u32 %v6881_v17, %v6261_v42  ;;  %v4538_v42 = vor.u32 %v6445_v20, %v4535_v19  ;;  %v5367_v3 = vld [vmem:[#allocation8 + $0x7f0] sm:$0xf0]  ;;  %v5050_v46 = vor.u32 %v6573_v25, %v5047_v53 }
 0x226   :  { %v6665_v54 = vld [vmem:[#allocation8 + $0x82c] sm:$0xf0]  ;;  %3988 = vmatpush.bf16.msrb.mxu2 %v5942_v50  ;;  %v4503_v17 = vld [vmem:[#allocation8 + $0x130] sm:$0xf0] }
 0x227   :  { %v6229_v56 = vld [vmem:[#allocation8 + $0xe90] sm:$0xf]  ;;  %v5398_v32 = vor.u32 %v6665_v54, %v5397_v31  ;;  %3999 = vmatpush.bf16.msrb.mxu3 %v6262_v63  ;;  %v3719_v31 = vadd.f32 %v7620_v5, %v3706_v37  ;;  %v4794_v54 = vor.u32 %v6509_v51, %v4791_v24  ;;  %v6645_v50 = vld [vmem:[#allocation8 + $0x794] sm:$0xf]  ;;  %v3746_v63 = vpop.f32.mrf.mxu3 }
 0x228   :  { %v5653_v60 = vld [vmem:[#allocation8 + $0xa10] sm:$0xf]  ;;  %v6629_v26 = vld [vmem:[#allocation8 + $0x714] sm:$0xf] }
 0x229   :  { %v6729_v58 = vld [vmem:[#allocation8 + $0xa2c] sm:$0xf0]  ;;  %3963 = vmatpush.bf16.msrb.mxu0 %v5398_v32  ;;  %v5335_v32 = vld [vmem:[#allocation8 + $0x7b0] sm:$0xf0]  ;;  %v3732_v5 = vadd.f32 %v7623_v16, %v3719_v31 }
 0x22a   :  { %v5909_v62 = vld [vmem:[#allocation8 + $0xc10] sm:$0xf]  ;;  %v5654_v9 = vor.u32 %v6729_v58, %v5653_v60  ;;  %v4506_v60 = vor.u32 %v6437_v1, %v4503_v17  ;;  %v6565_v58 = vld [vmem:[#allocation8 + $0x514] sm:$0xf]  ;;  %v5338_v55 = vor.u32 %v6645_v50, %v5335_v32 }
 0x22b   :  { %v6793_v22 = vld [vmem:[#allocation8 + $0xc2c] sm:$0xf0]  ;;  %v3745_v16 = vadd.f32 %v7626_v8, %v3732_v5  ;;  %v6549_v20 = vld [vmem:[#allocation8 + $0x494] sm:$0xf] }
 0x22c   :  { %v6873_v23 = vld [vmem:[#allocation8 + $0xeac] sm:$0xf0]  ;;  %v5910_v2 = vor.u32 %v6793_v22, %v5909_v62  ;;  %3976 = vmatpush.bf16.msrb.mxu1 %v5654_v9  ;;  %3964 = vmatmul.bf16.vlgmr.msrb.gmra.mxu0 %v7508_v27  ;;  %v5015_v62 = vld [vmem:[#allocation8 + $0x530] sm:$0xf0] }
 0x22d   :  { %v6230_v57 = vor.u32 %v6873_v23, %v6229_v56  ;;  %v6197_v33 = vld [vmem:[#allocation8 + $0xe50] sm:$0xf]  ;;  %4008 = vmatpush.bf16.msra.mxu0 %v4602_v45  ;;  %v5370_v56 = vor.u32 %v6653_v49, %v5367_v3  ;;  %v6429_v22 = vld [vmem:[#allocation8 + $0xd4] sm:$0xf]  ;;  %v5018_v23 = vor.u32 %v6565_v58, %v5015_v62  ;;  %v3758_v8 = vadd.f32 %v3757_v6, %v3745_v16 }
 0x22e   :  { %v6865_v7 = vld [vmem:[#allocation8 + $0xe6c] sm:$0xf0]  ;;  %3989 = vmatpush.bf16.msrb.mxu2 %v5910_v2  ;;  %v6493_v45 = vld [vmem:[#allocation8 + $0x2d4] sm:$0xf]  ;;  %v4474_v35 = vor.u32 %v6429_v22, %v4471_v28 }
 0x22f   :  { %v6165_v36 = vld [vmem:[#allocation8 + $0xe10] sm:$0xf]  ;;  %4000 = vmatpush.bf16.msrb.mxu3 %v6230_v57  ;;  %v6198_v43 = vor.u32 %v6865_v7, %v6197_v33  ;;  %3977 = vmatmul.bf16.vlgmr.msrb.gmra.mxu1 %v7552_v61  ;;  %v6637_v9 = vld [vmem:[#allocation8 + $0x754] sm:$0xf] }
 0x230   :  { %4021 = vmatpush.bf16.msra.mxu1 %v4858_v38  ;;  %v6857_v15 = vld [vmem:[#allocation8 + $0xe2c] sm:$0xf0]  ;;  %v4983_v2 = vld [vmem:[#allocation8 + $0x4f0] sm:$0xf0] }
 0x231   :  { %4009 = vmatpush.bf16.msra.mxu0 %v4570_v18  ;;  %3990 = vmatmul.bf16.vlgmr.msrb.gmra.mxu2 %v7513_v21  ;;  %v6166_v12 = vor.u32 %v6857_v15, %v6165_v36  ;;  %v5303_v38 = vld [vmem:[#allocation8 + $0x770] sm:$0xf0]  ;;  %v4986_v13 = vor.u32 %v6557_v4, %v4983_v2 }
 0x232   :  { %4034 = vmatpush.bf16.msra.mxu2 %v5114_v29  ;;  %v6421_v57 = vld [vmem:[#allocation8 + $0x94] sm:$0xf]  ;;  %v4730_v29 = vor.u32 %v6493_v45, %v4727_v40  ;;  %v5306_v18 = vor.u32 %v6637_v9, %v5303_v38 }
 0x233   :  { %4001 = vmatpush.bf16.msrb.mxu3 %v6198_v43  ;;  %v4439_v33 = vld [vmem:[#allocation8 + $0xb0] sm:$0xf0] }
 0x234   :  { %4022 = vmatpush.bf16.msra.mxu1 %v4826_v10  ;;  %v4695_v7 = vld [vmem:[#allocation8 + $0x2b0] sm:$0xf0]  ;;  %v4442_v11 = vor.u32 %v6421_v57, %v4439_v33 }
 0x235   :  { %4010 = vmatpush.bf16.msra.mxu0 %v4538_v42  ;;  %v4951_v19 = vld [vmem:[#allocation8 + $0x4b0] sm:$0xf0]  ;;  %v4698_v43 = vor.u32 %v6485_v14, %v4695_v7  ;;  %v3783_v42 = vpop.f32.mrf.mxu2  ;;  %v3796_v14 = vpop.f32.mrf.mxu3 }
 0x236   :  { %4035 = vmatpush.bf16.msra.mxu2 %v5082_v34  ;;  %v5271_v36 = vld [vmem:[#allocation8 + $0x730] sm:$0xf0]  ;;  %v4954_v15 = vor.u32 %v6549_v20, %v4951_v19 }
 0x237   :  { %4002 = vmatpush.bf16.msrb.mxu3 %v6166_v12  ;;  %v6413_v37 = vld [vmem:[#allocation8 + $0x54] sm:$0xf]  ;;  %v5274_v24 = vor.u32 %v6629_v26, %v5271_v36  ;;  %v3771_v12 = vadd.f32 %v3770_v39, %v3758_v8 }
 0x238   :  { %4023 = vmatpush.bf16.msra.mxu1 %v4794_v54  ;;  %v4407_v10 = vld [vmem:[#allocation8 + $0x70] sm:$0xf0]  ;;  %v3772_v54 = vpop.f32.mrf.mxu1 }
 0x239   :  { %4011 = vmatpush.bf16.msra.mxu0 %v4506_v60  ;;  %v6477_v34 = vld [vmem:[#allocation8 + $0x254] sm:$0xf]  ;;  %v4410_v25 = vor.u32 %v6413_v37, %v4407_v10  ;;  %v3784_v9 = vadd.f32 %v3783_v42, %v3771_v12 }
 0x23a   :  { %4036 = vmatpush.bf16.msra.mxu2 %v5050_v46  ;;  %4003 = vmatmul.bf16.vlgmr.msrb.gmra.mxu3 %v7562_v47  ;;  %v4663_v51 = vld [vmem:[#allocation8 + $0x270] sm:$0xf0] }
 0x23b   :  { %4047 = vmatpush.bf16.msra.mxu3 %v5370_v56  ;;  %v6621_v49 = vld [vmem:[#allocation8 + $0x6d4] sm:$0xf]  ;;  %v4666_v46 = vor.u32 %v6477_v34, %v4663_v51  ;;  %v3759_v56 = vpop.f32.mrf.mxu0  ;;  %v3797_v20 = vadd.f32 %v3796_v14, %v3784_v9 }
 0x23c   :  { %4024 = vmatpush.bf16.msra.mxu1 %v4762_v0  ;;  %v6541_v53 = vld [vmem:[#allocation8 + $0x454] sm:$0xf] }
 0x23d   :  { %4012 = vmatpush.bf16.msra.mxu0 %v4474_v35  ;;  %v4919_v3 = vld [vmem:[#allocation8 + $0x470] sm:$0xf0] }
 0x23e   :  { %4037 = vmatpush.bf16.msra.mxu2 %v5018_v23  ;;  %v5239_v1 = vld [vmem:[#allocation8 + $0x6f0] sm:$0xf0]  ;;  %v4922_v60 = vor.u32 %v6541_v53, %v4919_v3 }
 0x23f   :  { %4048 = vmatpush.bf16.msra.mxu3 %v5338_v55  ;;  %v6405_v17 = vld [vmem:[#allocation8 + $0x14] sm:$0xf]  ;;  %v5242_v32 = vor.u32 %v6621_v49, %v5239_v1 }
 0x240   :  { %4025 = vmatpush.bf16.msra.mxu1 %v4730_v29  ;;  %v4375_v31 = vld [vmem:[#allocation8 + $0x30] sm:$0xf0] }
 0x241   :  { %4013 = vmatpush.bf16.msra.mxu0 %v4442_v11  ;;  %v5623_v59 = vld [vmem:[#allocation8 + $0x9f0] sm:$0xf0]  ;;  %v4378_v22 = vor.u32 %v6405_v17, %v4375_v31 }
 0x242   :  { %4038 = vmatpush.bf16.msra.mxu2 %v4986_v13  ;;  %v6613_v50 = vld [vmem:[#allocation8 + $0x694] sm:$0xf]  ;;  %v5626_v45 = vor.u32 %v6717_v52, %v5623_v59  ;;  %v3785_v13 = vpop.f32.mrf.mxu2 }
 0x243   :  { %4049 = vmatpush.bf16.msra.mxu3 %v5306_v18  ;;  %v6469_v58 = vld [vmem:[#allocation8 + $0x214] sm:$0xf] }
 0x244   :  { %4026 = vmatpush.bf16.msra.mxu1 %v4698_v43  ;;  %v4631_v62 = vld [vmem:[#allocation8 + $0x230] sm:$0xf0]  ;;  %v4322_v43 = vmax.f32 %v3797_v20, 0.0 }
 0x245   :  { %v6533_v63 = vld [vmem:[#allocation8 + $0x414] sm:$0xf]  ;;  %4014 = vmatpush.bf16.msra.mxu0 %v4410_v25  ;;  %v4634_v35 = vor.u32 %v6469_v58, %v4631_v62  ;;  %v3798_v62 = vpop.f32.mrf.mxu3 }
 0x246   :  { %4039 = vmatpush.bf16.msra.mxu2 %v4954_v15  ;;  %v4887_v28 = vld [vmem:[#allocation8 + $0x430] sm:$0xf0]  ;;  %4330 = vst [vmem:[#allocation11 + $0x10] sm:$0xff] %v4322_v43  ;;  %v4861_v62 = vld [vmem:[#allocation8 + $0x3d8] sm:$0xf] }
 0x247   :  { %4050 = vmatpush.bf16.msra.mxu3 %v5274_v24  ;;  %v6781_v5 = vld [vmem:[#allocation8 + $0xbd4] sm:$0xf]  ;;  %v4890_v38 = vor.u32 %v6533_v63, %v4887_v28 }
 0x248   :  { %v5879_v0 = vld [vmem:[#allocation8 + $0xbf0] sm:$0xf0]  ;;  %4027 = vmatpush.bf16.msra.mxu1 %v4666_v46 }
 0x249   :  { %v5207_v23 = vld [vmem:[#allocation8 + $0x6b0] sm:$0xf0]  ;;  %v5882_v39 = vor.u32 %v6781_v5, %v5879_v0  ;;  %4015 = vmatpush.bf16.msra.mxu0 %v4378_v22 }
 0x24a   :  { %v6845_v40 = vld [vmem:[#allocation8 + $0xdd4] sm:$0xf]  ;;  %4040 = vmatpush.bf16.msra.mxu2 %v4922_v60  ;;  %v5210_v57 = vor.u32 %v6613_v50, %v5207_v23 }
 0x24b   :  { %v6135_v55 = vld [vmem:[#allocation8 + $0xdf0] sm:$0xf0]  ;;  %4051 = vmatpush.bf16.msra.mxu3 %v5242_v32 }
 0x24c   :  { %v6709_v4 = vld [vmem:[#allocation8 + $0x994] sm:$0xf]  ;;  %v6138_v16 = vor.u32 %v6845_v40, %v6135_v55  ;;  %4028 = vmatpush.bf16.msra.mxu1 %v4634_v35  ;;  %4016 = vmatmul.bf16.vlgmr.msra.gmra.mxu0 %v7457_v44 }
 0x24d   :  { %v5591_v2 = vld [vmem:[#allocation8 + $0x9b0] sm:$0xf0]  ;;  %4060 = vmatpush.bf16.msrb.mxu0 %v5626_v45 }
 0x24e   :  { %v6605_v33 = vld [vmem:[#allocation8 + $0x654] sm:$0xf]  ;;  %v5594_v18 = vor.u32 %v6709_v4, %v5591_v2  ;;  %4041 = vmatpush.bf16.msra.mxu2 %v4890_v38 }
 0x24f   :  { %v6773_v29 = vld [vmem:[#allocation8 + $0xb94] sm:$0xf]  ;;  %4052 = vmatpush.bf16.msra.mxu3 %v5210_v57  ;;  %4029 = vmatmul.bf16.vlgmr.msra.gmra.mxu1 %v7461_v30 }
 0x250   :  { %v5847_v6 = vld [vmem:[#allocation8 + $0xbb0] sm:$0xf0]  ;;  %4073 = vmatpush.bf16.msrb.mxu1 %v5882_v39  ;;  %v7639_v39 = vpop.f32.mrf.mxu1 }
 0x251   :  { %v5175_v7 = vld [vmem:[#allocation8 + $0x670] sm:$0xf0]  ;;  %v5850_v8 = vor.u32 %v6773_v29, %v5847_v6  ;;  %4061 = vmatpush.bf16.msrb.mxu0 %v5594_v18  ;;  %4042 = vmatmul.bf16.vlgmr.msra.gmra.mxu2 %v7467_v41 }
 0x252   :  { %v6837_v26 = vld [vmem:[#allocation8 + $0xd94] sm:$0xf]  ;;  %v5178_v15 = vor.u32 %v6605_v33, %v5175_v7  ;;  %4086 = vmatpush.bf16.msrb.mxu2 %v6138_v16  ;;  %v7642_v33 = vpop.f32.mrf.mxu0 }
 0x253   :  { %v6103_v11 = vld [vmem:[#allocation8 + $0xdb0] sm:$0xf0] }
 0x254   :  { %v6701_v19 = vld [vmem:[#allocation8 + $0x954] sm:$0xf]  ;;  %v6106_v51 = vor.u32 %v6837_v26, %v6103_v11  ;;  %4074 = vmatpush.bf16.msrb.mxu1 %v5850_v8  ;;  %4053 = vmatpush.bf16.msra.mxu3 %v5178_v15 }
 0x255   :  { %v5559_v36 = vld [vmem:[#allocation8 + $0x970] sm:$0xf0] }
 0x256   :  { %v6597_v37 = vld [vmem:[#allocation8 + $0x614] sm:$0xf]  ;;  %v5562_v25 = vor.u32 %v6701_v19, %v5559_v36  ;;  %4087 = vmatpush.bf16.msrb.mxu2 %v6106_v51 }
 0x257   :  { %v5143_v10 = vld [vmem:[#allocation8 + $0x630] sm:$0xf0] }
 0x258   :  { %v6909_v34 = vld [vmem:[#allocation8 + $0xfd4] sm:$0xf]  ;;  %v5146_v54 = vor.u32 %v6597_v37, %v5143_v10  ;;  %4062 = vmatpush.bf16.msrb.mxu0 %v5562_v25 }
 0x259   :  { %v6765_v24 = vld [vmem:[#allocation8 + $0xb54] sm:$0xf] }
 0x25a   :  { %v5815_v49 = vld [vmem:[#allocation8 + $0xb70] sm:$0xf0]  ;;  %4054 = vmatpush.bf16.msra.mxu3 %v5146_v54  ;;  %v3811_v54 = vpop.f32.mrf.mxu0 }
 0x25b   :  { %v6391_v42 = vld [vmem:[#allocation8 + $0xff0] sm:$0xf0]  ;;  %v5818_v31 = vor.u32 %v6765_v24, %v5815_v49  ;;  %v7644_v49 = vpop.f32.mrf.mxu2  ;;  %v4765_v54 = vld [vmem:[#allocation8 + $0x318] sm:$0xf] }
 0x25c   :  { %v6829_v53 = vld [vmem:[#allocation8 + $0xd54] sm:$0xf]  ;;  %v6394_v59 = vor.u32 %v6909_v34, %v6391_v42 }
 0x25d   :  { %v6071_v3 = vld [vmem:[#allocation8 + $0xd70] sm:$0xf0]  ;;  %4075 = vmatpush.bf16.msrb.mxu1 %v5818_v31  ;;  %4055 = vmatmul.bf16.vlgmr.msra.gmra.mxu3 %v7479_v48  ;;  %v6466_v31 = vld [vmem:[#allocation8 + $0x1f4] sm:$0xf0] }
 0x25e   :  { %v6693_v1 = vld [vmem:[#allocation8 + $0x914] sm:$0xf]  ;;  %v6074_v12 = vor.u32 %v6829_v53, %v6071_v3  ;;  %4099 = vmatpush.bf16.msrb.mxu3 %v6394_v59  ;;  %v3824_v3 = vpop.f32.mrf.mxu1 }
 0x25f   :  { %v5527_v17 = vld [vmem:[#allocation8 + $0x930] sm:$0xf0] }
 0x260   :  { %v6757_v46 = vld [vmem:[#allocation8 + $0xb14] sm:$0xf]  ;;  %v5530_v50 = vor.u32 %v6693_v1, %v5527_v17  ;;  %4088 = vmatpush.bf16.msrb.mxu2 %v6074_v12  ;;  %v4605_v17 = vld [vmem:[#allocation8 + $0x1d8] sm:$0xf] }
 0x261   :  { %v5783_v52 = vld [vmem:[#allocation8 + $0xb30] sm:$0xf0] }
 0x262   :  { %v6901_v56 = vld [vmem:[#allocation8 + $0xf94] sm:$0xf]  ;;  %v5786_v28 = vor.u32 %v6757_v46, %v5783_v52  ;;  %4063 = vmatpush.bf16.msrb.mxu0 %v5530_v50 }
 0x263   :  { %v6821_v60 = vld [vmem:[#allocation8 + $0xd14] sm:$0xf] }
 0x264   :  { %v6039_v58 = vld [vmem:[#allocation8 + $0xd30] sm:$0xf0]  ;;  %4076 = vmatpush.bf16.msrb.mxu1 %v5786_v28  ;;  %v5117_v28 = vld [vmem:[#allocation8 + $0x5d8] sm:$0xf] }
 0x265   :  { %v6359_v63 = vld [vmem:[#allocation8 + $0xfb0] sm:$0xf0]  ;;  %v6042_v5 = vor.u32 %v6821_v60, %v6039_v58 }
 0x266   :  { %v6685_v32 = vld [vmem:[#allocation8 + $0x8d4] sm:$0xf]  ;;  %v6362_v45 = vor.u32 %v6901_v56, %v6359_v63  ;;  %v6530_v63 = vld [vmem:[#allocation8 + $0x3f4] sm:$0xf0] }
 0x267   :  { %v5495_v22 = vld [vmem:[#allocation8 + $0x8f0] sm:$0xf0]  ;;  %4089 = vmatpush.bf16.msrb.mxu2 %v6042_v5  ;;  %v6594_v5 = vld [vmem:[#allocation8 + $0x5f4] sm:$0xf0] }
 0x268   :  { %v6749_v0 = vld [vmem:[#allocation8 + $0xad4] sm:$0xf]  ;;  %v5498_v55 = vor.u32 %v6685_v32, %v5495_v22  ;;  %4100 = vmatpush.bf16.msrb.mxu3 %v6362_v45  ;;  %v4606_v22 = vor.u32 %v6466_v31, %v4605_v17  ;;  %v6458_v45 = vld [vmem:[#allocation8 + $0x1b4] sm:$0xf0] }
 0x269   :  { %v5751_v23 = vld [vmem:[#allocation8 + $0xaf0] sm:$0xf0] }
 0x26a   :  { %v6893_v40 = vld [vmem:[#allocation8 + $0xf54] sm:$0xf]  ;;  %v5754_v57 = vor.u32 %v6749_v0, %v5751_v23  ;;  %4064 = vmatpush.bf16.msrb.mxu0 %v5498_v55  ;;  %v4573_v23 = vld [vmem:[#allocation8 + $0x198] sm:$0xf]  ;;  %v4862_v55 = vor.u32 %v6530_v63, %v4861_v62 }
 0x26b   :  { %v6813_v9 = vld [vmem:[#allocation8 + $0xcd4] sm:$0xf]  ;;  %v4477_v62 = vld [vmem:[#allocation8 + $0xd8] sm:$0xf] }
 0x26c   :  { %v6007_v35 = vld [vmem:[#allocation8 + $0xcf0] sm:$0xf0]  ;;  %4077 = vmatpush.bf16.msrb.mxu1 %v5754_v57  ;;  %v4829_v57 = vld [vmem:[#allocation8 + $0x398] sm:$0xf] }
 0x26d   :  { %v6327_v4 = vld [vmem:[#allocation8 + $0xf70] sm:$0xf0]  ;;  %v6010_v16 = vor.u32 %v6813_v9, %v6007_v35  ;;  %v7646_v9 = vld [vmem:[#allocation10] sm:$0xff]  ;;  %v6434_v63 = vld [vmem:[#allocation8 + $0xf4] sm:$0xf0] }
 0x26e   :  { %v6677_v2 = vld [vmem:[#allocation8 + $0x894] sm:$0xf]  ;;  %v6330_v13 = vor.u32 %v6893_v40, %v6327_v4  ;;  %v915_v35 = vperm.slane %v7646_v9, 3 }
 0x26f   :  { %v5463_v38 = vld [vmem:[#allocation8 + $0x8b0] sm:$0xf0]  ;;  %4090 = vmatpush.bf16.msrb.mxu2 %v6010_v16  ;;  %v6522_v16 = vld [vmem:[#allocation8 + $0x3b4] sm:$0xf0] }
 0x270   :  { %v6741_v29 = vld [vmem:[#allocation8 + $0xa94] sm:$0xf]  ;;  %v5466_v7 = vor.u32 %v6677_v2, %v5463_v38  ;;  %4101 = vmatpush.bf16.msrb.mxu3 %v6330_v13  ;;  %v5118_v38 = vor.u32 %v6594_v5, %v5117_v28  ;;  %v4574_v13 = vor.u32 %v6458_v45, %v4573_v23  ;;  %v4733_v28 = vld [vmem:[#allocation8 + $0x2d8] sm:$0xf]  ;;  %v4478_v45 = vor.u32 %v6434_v63, %v4477_v62 }
 0x271   :  { %v5719_v6 = vld [vmem:[#allocation8 + $0xab0] sm:$0xf0]  ;;  %v6498_v5 = vld [vmem:[#allocation8 + $0x2f4] sm:$0xf0] }
 0x272   :  { %v6885_v14 = vld [vmem:[#allocation8 + $0xf14] sm:$0xf]  ;;  %v5722_v36 = vor.u32 %v6741_v29, %v5719_v6  ;;  %4065 = vmatpush.bf16.msrb.mxu0 %v5466_v7  ;;  %v3837_v29 = vpop.f32.mrf.mxu2  ;;  %v6586_v7 = vld [vmem:[#allocation8 + $0x5b4] sm:$0xf0] }
 0x273   :  { %v6805_v18 = vld [vmem:[#allocation8 + $0xc94] sm:$0xf]  ;;  %v5309_v23 = vld [vmem:[#allocation8 + $0x758] sm:$0xf] }
 0x274   :  { %v5975_v26 = vld [vmem:[#allocation8 + $0xcb0] sm:$0xf0]  ;;  %4078 = vmatpush.bf16.msrb.mxu1 %v5722_v36  ;;  %v4830_v36 = vor.u32 %v6522_v16, %v4829_v57  ;;  %v4734_v57 = vor.u32 %v6498_v5, %v4733_v28  ;;  %v3861_v16 = vpop.f32.mrf.mxu0  ;;  %v6618_v28 = vld [vmem:[#allocation8 + $0x6b4] sm:$0xf0] }
 0x275   :  { %v6295_v11 = vld [vmem:[#allocation8 + $0xf30] sm:$0xf0]  ;;  %v5978_v37 = vor.u32 %v6805_v18, %v5975_v26  ;;  %v7649_v18 = vpop.f32.mrf.mxu3  ;;  %v4541_v26 = vld [vmem:[#allocation8 + $0x158] sm:$0xf] }
 0x276   :  { %v6669_v20 = vld [vmem:[#allocation8 + $0x854] sm:$0xf]  ;;  %v6298_v43 = vor.u32 %v6885_v14, %v6295_v11  ;;  %v5085_v14 = vld [vmem:[#allocation8 + $0x598] sm:$0xf] }
 0x277   :  { %v5431_v19 = vld [vmem:[#allocation8 + $0x870] sm:$0xf0]  ;;  %4091 = vmatpush.bf16.msrb.mxu2 %v5978_v37  ;;  %v6450_v11 = vld [vmem:[#allocation8 + $0x174] sm:$0xf0] }
 0x278   :  { %v6733_v10 = vld [vmem:[#allocation8 + $0xa54] sm:$0xf]  ;;  %v5434_v34 = vor.u32 %v6669_v20, %v5431_v19  ;;  %4102 = vmatpush.bf16.msrb.mxu3 %v6298_v43  ;;  %v3810_v19 = vadd.f32 %v7642_v33, %v915_v35  ;;  %v4797_v43 = vld [vmem:[#allocation8 + $0x358] sm:$0xf] }
 0x279   :  { %v5687_v8 = vld [vmem:[#allocation8 + $0xa70] sm:$0xf0]  ;;  %v4509_v33 = vld [vmem:[#allocation8 + $0x118] sm:$0xf] }
 0x27a   :  { %v6877_v15 = vld [vmem:[#allocation8 + $0xed4] sm:$0xf]  ;;  %v5690_v1 = vor.u32 %v6733_v10, %v5687_v8  ;;  %4066 = vmatpush.bf16.msrb.mxu0 %v5434_v34  ;;  %v5086_v8 = vor.u32 %v6586_v7, %v5085_v14  ;;  %v5373_v34 = vld [vmem:[#allocation8 + $0x7d8] sm:$0xf]  ;;  %v3823_v3 = vadd.f32 %v7639_v39, %v3810_v19 }
 0x27b   :  { %v6797_v51 = vld [vmem:[#allocation8 + $0xc54] sm:$0xf]  ;;  %v6642_v35 = vld [vmem:[#allocation8 + $0x774] sm:$0xf0] }
 0x27c   :  { %v5943_v24 = vld [vmem:[#allocation8 + $0xc70] sm:$0xf0]  ;;  %4079 = vmatpush.bf16.msrb.mxu1 %v5690_v1  ;;  %v3836_v39 = vadd.f32 %v7644_v49, %v3823_v3  ;;  %v5310_v14 = vor.u32 %v6642_v35, %v5309_v23  ;;  %v5277_v7 = vld [vmem:[#allocation8 + $0x718] sm:$0xf] }
 0x27d   :  { %v6263_v42 = vld [vmem:[#allocation8 + $0xef0] sm:$0xf0]  ;;  %v5946_v46 = vor.u32 %v6797_v51, %v5943_v24  ;;  %v4542_v51 = vor.u32 %v6450_v11, %v4541_v26  ;;  %v5053_v24 = vld [vmem:[#allocation8 + $0x558] sm:$0xf] }
 0x27e   :  { %v6661_v25 = vld [vmem:[#allocation8 + $0x814] sm:$0xf]  ;;  %v6266_v50 = vor.u32 %v6877_v15, %v6263_v42  ;;  %v6514_v15 = vld [vmem:[#allocation8 + $0x374] sm:$0xf0]  ;;  %v3849_v49 = vadd.f32 %v7649_v18, %v3836_v39 }
 0x27f   :  { %v5399_v53 = vld [vmem:[#allocation8 + $0x830] sm:$0xf0]  ;;  %4092 = vmatpush.bf16.msrb.mxu2 %v5946_v46  ;;  %v6578_v42 = vld [vmem:[#allocation8 + $0x574] sm:$0xf0]  ;;  %v4798_v1 = vor.u32 %v6514_v15, %v4797_v43 }
 0x280   :  { %v6869_v12 = vld [vmem:[#allocation8 + $0xe94] sm:$0xf]  ;;  %v5402_v60 = vor.u32 %v6661_v25, %v5399_v53  ;;  %4103 = vmatpush.bf16.msrb.mxu3 %v6266_v50  ;;  %v6658_v25 = vld [vmem:[#allocation8 + $0x7f4] sm:$0xf0]  ;;  %v5054_v31 = vor.u32 %v6578_v42, %v5053_v24  ;;  %v3862_v18 = vadd.f32 %v3861_v16, %v3849_v49  ;;  %v3887_v24 = vpop.f32.mrf.mxu2 }
 0x281   :  { %v6725_v52 = vld [vmem:[#allocation8 + $0xa14] sm:$0xf]  ;;  %v6442_v53 = vld [vmem:[#allocation8 + $0x134] sm:$0xf0]  ;;  %v5374_v46 = vor.u32 %v6658_v25, %v5373_v34 }
 0x282   :  { %v5655_v59 = vld [vmem:[#allocation8 + $0xa30] sm:$0xf0]  ;;  %4067 = vmatpush.bf16.msrb.mxu0 %v5402_v60  ;;  %v6570_v50 = vld [vmem:[#allocation8 + $0x534] sm:$0xf0]  ;;  %v3850_v60 = vpop.f32.mrf.mxu3 }
 0x283   :  { %v6789_v56 = vld [vmem:[#allocation8 + $0xc14] sm:$0xf]  ;;  %v5658_v0 = vor.u32 %v6725_v52, %v5655_v59  ;;  %v5341_v52 = vld [vmem:[#allocation8 + $0x798] sm:$0xf]  ;;  %v4510_v59 = vor.u32 %v6442_v53, %v4509_v33 }
 0x284   :  { %v5911_v58 = vld [vmem:[#allocation8 + $0xc30] sm:$0xf0]  ;;  %v4957_v11 = vld [vmem:[#allocation8 + $0x498] sm:$0xf] }
 0x285   :  { %v6231_v32 = vld [vmem:[#allocation8 + $0xeb0] sm:$0xf0]  ;;  %v5914_v40 = vor.u32 %v6789_v56, %v5911_v58  ;;  %4080 = vmatpush.bf16.msrb.mxu1 %v5658_v0  ;;  %4068 = vmatmul.bf16.vlgmr.msrb.gmra.mxu0 %v7508_v27  ;;  %v5021_v56 = vld [vmem:[#allocation8 + $0x518] sm:$0xf] }
 0x286   :  { %v6234_v4 = vor.u32 %v6869_v12, %v6231_v32  ;;  %v6861_v2 = vld [vmem:[#allocation8 + $0xe54] sm:$0xf]  ;;  %4112 = vmatpush.bf16.msra.mxu0 %v4606_v22  ;;  %v6506_v12 = vld [vmem:[#allocation8 + $0x334] sm:$0xf0]  ;;  %v5022_v22 = vor.u32 %v6570_v50, %v5021_v56 }
 0x287   :  { %v6199_v6 = vld [vmem:[#allocation8 + $0xe70] sm:$0xf0]  ;;  %4093 = vmatpush.bf16.msrb.mxu2 %v5914_v40  ;;  %v6650_v58 = vld [vmem:[#allocation8 + $0x7b4] sm:$0xf0]  ;;  %v4766_v32 = vor.u32 %v6506_v12, %v4765_v54 }
 0x288   :  { %v6853_v20 = vld [vmem:[#allocation8 + $0xe14] sm:$0xf]  ;;  %4104 = vmatpush.bf16.msrb.mxu3 %v6234_v4  ;;  %v6202_v37 = vor.u32 %v6861_v2, %v6199_v6  ;;  %4081 = vmatmul.bf16.vlgmr.msrb.gmra.mxu1 %v7552_v61  ;;  %v5342_v0 = vor.u32 %v6650_v58, %v5341_v52  ;;  %v4989_v40 = vld [vmem:[#allocation8 + $0x4d8] sm:$0xf]  ;;  %v3874_v4 = vpop.f32.mrf.mxu1  ;;  %v3863_v52 = vpop.f32.mrf.mxu0 }
 0x289   :  { %4125 = vmatpush.bf16.msra.mxu1 %v4862_v55  ;;  %v6167_v10 = vld [vmem:[#allocation8 + $0xe30] sm:$0xf0]  ;;  %v6562_v55 = vld [vmem:[#allocation8 + $0x4f4] sm:$0xf0] }
 0x28a   :  { %4113 = vmatpush.bf16.msra.mxu0 %v4574_v13  ;;  %4094 = vmatmul.bf16.vlgmr.msrb.gmra.mxu2 %v7513_v21  ;;  %v6170_v17 = vor.u32 %v6853_v20, %v6167_v10  ;;  %v4445_v2 = vld [vmem:[#allocation8 + $0x98] sm:$0xf]  ;;  %v4990_v29 = vor.u32 %v6562_v55, %v4989_v40 }
 0x28b   :  { %4138 = vmatpush.bf16.msra.mxu2 %v5118_v38  ;;  %v6426_v38 = vld [vmem:[#allocation8 + $0xb4] sm:$0xf0] }
 0x28c   :  { %4105 = vmatpush.bf16.msrb.mxu3 %v6202_v37  ;;  %v4701_v6 = vld [vmem:[#allocation8 + $0x298] sm:$0xf]  ;;  %v4446_v26 = vor.u32 %v6426_v38, %v4445_v2 }
 0x28d   :  { %4126 = vmatpush.bf16.msra.mxu1 %v4830_v36  ;;  %v6490_v13 = vld [vmem:[#allocation8 + $0x2b4] sm:$0xf0] }
 0x28e   :  { %4114 = vmatpush.bf16.msra.mxu0 %v4542_v51  ;;  %v6554_v20 = vld [vmem:[#allocation8 + $0x4b4] sm:$0xf0]  ;;  %v4702_v10 = vor.u32 %v6490_v13, %v4701_v6  ;;  %v3889_v6 = vpop.f32.mrf.mxu2  ;;  %v3900_v13 = vpop.f32.mrf.mxu3 }
 0x28f   :  { %4139 = vmatpush.bf16.msra.mxu2 %v5086_v8  ;;  %v6634_v19 = vld [vmem:[#allocation8 + $0x734] sm:$0xf0]  ;;  %v4958_v8 = vor.u32 %v6554_v20, %v4957_v11 }
 0x290   :  { %4106 = vmatpush.bf16.msrb.mxu3 %v6170_v17  ;;  %v4413_v36 = vld [vmem:[#allocation8 + $0x58] sm:$0xf]  ;;  %v5278_v34 = vor.u32 %v6634_v19, %v5277_v7  ;;  %v3876_v17 = vpop.f32.mrf.mxu1 }
 0x291   :  { %4127 = vmatpush.bf16.msra.mxu1 %v4798_v1  ;;  %v6418_v37 = vld [vmem:[#allocation8 + $0x74] sm:$0xf0] }
 0x292   :  { %4115 = vmatpush.bf16.msra.mxu0 %v4510_v59  ;;  %v4669_v43 = vld [vmem:[#allocation8 + $0x258] sm:$0xf]  ;;  %v4414_v42 = vor.u32 %v6418_v37, %v4413_v36 }
 0x293   :  { %4140 = vmatpush.bf16.msra.mxu2 %v5054_v31  ;;  %4107 = vmatmul.bf16.vlgmr.msrb.gmra.mxu3 %v7562_v47  ;;  %v6482_v15 = vld [vmem:[#allocation8 + $0x274] sm:$0xf0]  ;;  %v3875_v31 = vadd.f32 %v3874_v4, %v3862_v18 }
 0x294   :  { %4151 = vmatpush.bf16.msra.mxu3 %v5374_v46  ;;  %v5245_v51 = vld [vmem:[#allocation8 + $0x6d8] sm:$0xf]  ;;  %v4670_v54 = vor.u32 %v6482_v15, %v4669_v43 }
 0x295   :  { %4128 = vmatpush.bf16.msra.mxu1 %v4766_v32  ;;  %v4925_v25 = vld [vmem:[#allocation8 + $0x458] sm:$0xf] }
 0x296   :  { %4116 = vmatpush.bf16.msra.mxu0 %v4478_v45  ;;  %v6546_v33 = vld [vmem:[#allocation8 + $0x474] sm:$0xf0]  ;;  %v3888_v45 = vadd.f32 %v3887_v24, %v3875_v31 }
 0x297   :  { %4141 = vmatpush.bf16.msra.mxu2 %v5022_v22  ;;  %v6626_v53 = vld [vmem:[#allocation8 + $0x6f4] sm:$0xf0]  ;;  %v4926_v56 = vor.u32 %v6546_v33, %v4925_v25 }
 0x298   :  { %4152 = vmatpush.bf16.msra.mxu3 %v5342_v0  ;;  %v4381_v3 = vld [vmem:[#allocation8 + $0x18] sm:$0xf]  ;;  %v5246_v62 = vor.u32 %v6626_v53, %v5245_v51  ;;  %v3901_v20 = vadd.f32 %v3900_v13, %v3888_v45 }
 0x299   :  { %4129 = vmatpush.bf16.msra.mxu1 %v4734_v57  ;;  %v6410_v1 = vld [vmem:[#allocation8 + $0x34] sm:$0xf0] }
 0x29a   :  { %4117 = vmatpush.bf16.msra.mxu0 %v4446_v26  ;;  %v5629_v12 = vld [vmem:[#allocation8 + $0x9d8] sm:$0xf]  ;;  %v4382_v63 = vor.u32 %v6410_v1, %v4381_v3 }
 0x29b   :  { %4142 = vmatpush.bf16.msra.mxu2 %v4990_v29  ;;  %v6722_v46 = vld [vmem:[#allocation8 + $0x9f4] sm:$0xf0] }
 0x29c   :  { %4153 = vmatpush.bf16.msra.mxu3 %v5310_v14  ;;  %v5213_v59 = vld [vmem:[#allocation8 + $0x698] sm:$0xf]  ;;  %v5630_v5 = vor.u32 %v6722_v46, %v5629_v12 }
 0x29d   :  { %4130 = vmatpush.bf16.msra.mxu1 %v4702_v10  ;;  %v4637_v50 = vld [vmem:[#allocation8 + $0x218] sm:$0xf]  ;;  %v5214_v38 = vor.u32 %v6618_v28, %v5213_v59 }
 0x29e   :  { %v6474_v60 = vld [vmem:[#allocation8 + $0x234] sm:$0xf0]  ;;  %4118 = vmatpush.bf16.msra.mxu0 %v4414_v42 }
 0x29f   :  { %4143 = vmatpush.bf16.msra.mxu2 %v4958_v8  ;;  %v4893_v58 = vld [vmem:[#allocation8 + $0x418] sm:$0xf]  ;;  %v4638_v40 = vor.u32 %v6474_v60, %v4637_v50  ;;  %v4323_v8 = vmax.f32 %v3901_v20, 0.0 }
 0x2a0   :  { %4154 = vmatpush.bf16.msra.mxu3 %v5278_v34  ;;  %v6538_v39 = vld [vmem:[#allocation8 + $0x434] sm:$0xf0] }
 0x2a1   :  { %v5885_v32 = vld [vmem:[#allocation8 + $0xbd8] sm:$0xf]  ;;  %4131 = vmatpush.bf16.msra.mxu1 %v4670_v54  ;;  %v4894_v4 = vor.u32 %v6538_v39, %v4893_v58  ;;  %4331 = vst [vmem:[#allocation11 + $0x18] sm:$0xff] %v4323_v8  ;;  %v3902_v58 = vpop.f32.mrf.mxu3 }
 0x2a2   :  { %v6786_v22 = vld [vmem:[#allocation8 + $0xbf4] sm:$0xf0]  ;;  %4119 = vmatpush.bf16.msra.mxu0 %v4382_v63 }
 0x2a3   :  { %v6141_v0 = vld [vmem:[#allocation8 + $0xdd8] sm:$0xf]  ;;  %4144 = vmatpush.bf16.msra.mxu2 %v4926_v56  ;;  %v5886_v2 = vor.u32 %v6786_v22, %v5885_v32 }
 0x2a4   :  { %v6850_v23 = vld [vmem:[#allocation8 + $0xdf4] sm:$0xf0]  ;;  %4155 = vmatpush.bf16.msra.mxu3 %v5246_v62 }
 0x2a5   :  { %v5597_v55 = vld [vmem:[#allocation8 + $0x998] sm:$0xf]  ;;  %v6142_v57 = vor.u32 %v6850_v23, %v6141_v0  ;;  %4132 = vmatpush.bf16.msra.mxu1 %v4638_v40  ;;  %4120 = vmatmul.bf16.vlgmr.msra.gmra.mxu0 %v7457_v44 }
 0x2a6   :  { %v6714_v35 = vld [vmem:[#allocation8 + $0x9b4] sm:$0xf0]  ;;  %4164 = vmatpush.bf16.msrb.mxu0 %v5630_v5 }
 0x2a7   :  { %v5181_v49 = vld [vmem:[#allocation8 + $0x658] sm:$0xf]  ;;  %v5598_v7 = vor.u32 %v6714_v35, %v5597_v55  ;;  %4145 = vmatpush.bf16.msra.mxu2 %v4894_v4 }
 0x2a8   :  { %v5853_v16 = vld [vmem:[#allocation8 + $0xb98] sm:$0xf]  ;;  %4156 = vmatpush.bf16.msra.mxu3 %v5214_v38  ;;  %4133 = vmatmul.bf16.vlgmr.msra.gmra.mxu1 %v7461_v30  ;;  %v7662_v38 = vpop.f32.mrf.mxu1 }
 0x2a9   :  { %v6778_v29 = vld [vmem:[#allocation8 + $0xbb4] sm:$0xf0]  ;;  %4177 = vmatpush.bf16.msrb.mxu1 %v5886_v2 }
 0x2aa   :  { %v6610_v14 = vld [vmem:[#allocation8 + $0x674] sm:$0xf0]  ;;  %v5854_v10 = vor.u32 %v6778_v29, %v5853_v16  ;;  %4165 = vmatpush.bf16.msrb.mxu0 %v5598_v7  ;;  %4146 = vmatmul.bf16.vlgmr.msra.gmra.mxu2 %v7467_v41 }
 0x2ab   :  { %v6109_v26 = vld [vmem:[#allocation8 + $0xd98] sm:$0xf]  ;;  %v5182_v43 = vor.u32 %v6610_v14, %v5181_v49  ;;  %4190 = vmatpush.bf16.msrb.mxu2 %v6142_v57  ;;  %v7665_v57 = vpop.f32.mrf.mxu0 }
 0x2ac   :  { %v6842_v11 = vld [vmem:[#allocation8 + $0xdb4] sm:$0xf0] }
 0x2ad   :  { %v5565_v19 = vld [vmem:[#allocation8 + $0x958] sm:$0xf]  ;;  %v6110_v34 = vor.u32 %v6842_v11, %v6109_v26  ;;  %4178 = vmatpush.bf16.msrb.mxu1 %v5854_v10  ;;  %4157 = vmatpush.bf16.msra.mxu3 %v5182_v43 }
 0x2ae   :  { %v6706_v36 = vld [vmem:[#allocation8 + $0x974] sm:$0xf0] }
 0x2af   :  { %v5149_v37 = vld [vmem:[#allocation8 + $0x618] sm:$0xf]  ;;  %v5566_v25 = vor.u32 %v6706_v36, %v5565_v19  ;;  %4191 = vmatpush.bf16.msrb.mxu2 %v6110_v34 }
 0x2b0   :  { %v6602_v18 = vld [vmem:[#allocation8 + $0x634] sm:$0xf0] }
 0x2b1   :  { %v6397_v15 = vld [vmem:[#allocation8 + $0xfd8] sm:$0xf]  ;;  %v5150_v31 = vor.u32 %v6602_v18, %v5149_v37  ;;  %4166 = vmatpush.bf16.msrb.mxu0 %v5566_v25 }
 0x2b2   :  { %v5821_v51 = vld [vmem:[#allocation8 + $0xb58] sm:$0xf] }
 0x2b3   :  { %v6770_v24 = vld [vmem:[#allocation8 + $0xb74] sm:$0xf0]  ;;  %4158 = vmatpush.bf16.msra.mxu3 %v5150_v31  ;;  %v4607_v31 = vld [vmem:[#allocation8 + $0x1f8] sm:$0xf0] }
 0x2b4   :  { %v6914_v42 = vld [vmem:[#allocation8 + $0xff4] sm:$0xf0]  ;;  %v5822_v17 = vor.u32 %v6770_v24, %v5821_v51 }
 0x2b5   :  { %v6077_v33 = vld [vmem:[#allocation8 + $0xd58] sm:$0xf]  ;;  %v6398_v52 = vor.u32 %v6914_v42, %v6397_v15  ;;  %v7667_v42 = vpop.f32.mrf.mxu2 }
 0x2b6   :  { %v6834_v53 = vld [vmem:[#allocation8 + $0xd74] sm:$0xf0]  ;;  %4179 = vmatpush.bf16.msrb.mxu1 %v5822_v17  ;;  %4159 = vmatmul.bf16.vlgmr.msra.gmra.mxu3 %v7479_v48  ;;  %v6462_v17 = vld [vmem:[#allocation8 + $0x1dc] sm:$0xf] }
 0x2b7   :  { %v5533_v3 = vld [vmem:[#allocation8 + $0x918] sm:$0xf]  ;;  %v6078_v54 = vor.u32 %v6834_v53, %v6077_v33  ;;  %4203 = vmatpush.bf16.msrb.mxu3 %v6398_v52 }
 0x2b8   :  { %v6698_v1 = vld [vmem:[#allocation8 + $0x934] sm:$0xf0] }
 0x2b9   :  { %v5789_v12 = vld [vmem:[#allocation8 + $0xb18] sm:$0xf]  ;;  %v5534_v56 = vor.u32 %v6698_v1, %v5533_v3  ;;  %4192 = vmatpush.bf16.msrb.mxu2 %v6078_v54  ;;  %v3928_v3 = vpop.f32.mrf.mxu1  ;;  %v3915_v54 = vpop.f32.mrf.mxu0 }
 0x2ba   :  { %v6762_v46 = vld [vmem:[#allocation8 + $0xb34] sm:$0xf0]  ;;  %v4767_v54 = vld [vmem:[#allocation8 + $0x338] sm:$0xf0] }
 0x2bb   :  { %v6365_v59 = vld [vmem:[#allocation8 + $0xf98] sm:$0xf]  ;;  %v5790_v32 = vor.u32 %v6762_v46, %v5789_v12  ;;  %4167 = vmatpush.bf16.msrb.mxu0 %v5534_v56 }
 0x2bc   :  { %v6045_v50 = vld [vmem:[#allocation8 + $0xd18] sm:$0xf] }
 0x2bd   :  { %v6826_v60 = vld [vmem:[#allocation8 + $0xd34] sm:$0xf0]  ;;  %4180 = vmatpush.bf16.msrb.mxu1 %v5790_v32  ;;  %v4610_v32 = vor.u32 %v6462_v17, %v4607_v31  ;;  %v6502_v31 = vld [vmem:[#allocation8 + $0x31c] sm:$0xf] }
 0x2be   :  { %v6906_v62 = vld [vmem:[#allocation8 + $0xfb4] sm:$0xf0]  ;;  %v6046_v22 = vor.u32 %v6826_v60, %v6045_v50 }
 0x2bf   :  { %v5501_v63 = vld [vmem:[#allocation8 + $0x8d8] sm:$0xf]  ;;  %v6366_v0 = vor.u32 %v6906_v62, %v6365_v59  ;;  %v6526_v62 = vld [vmem:[#allocation8 + $0x3dc] sm:$0xf] }
 0x2c0   :  { %v6690_v39 = vld [vmem:[#allocation8 + $0x8f4] sm:$0xf0]  ;;  %4193 = vmatpush.bf16.msrb.mxu2 %v6046_v22  ;;  %v6590_v22 = vld [vmem:[#allocation8 + $0x5dc] sm:$0xf] }
 0x2c1   :  { %v5757_v28 = vld [vmem:[#allocation8 + $0xad8] sm:$0xf]  ;;  %v5502_v45 = vor.u32 %v6690_v39, %v5501_v63  ;;  %4204 = vmatpush.bf16.msrb.mxu3 %v6366_v0  ;;  %v4863_v63 = vld [vmem:[#allocation8 + $0x3f8] sm:$0xf0] }
 0x2c2   :  { %v6754_v5 = vld [vmem:[#allocation8 + $0xaf4] sm:$0xf0]  ;;  %v6454_v0 = vld [vmem:[#allocation8 + $0x19c] sm:$0xf] }
 0x2c3   :  { %v6333_v23 = vld [vmem:[#allocation8 + $0xf58] sm:$0xf]  ;;  %v5758_v49 = vor.u32 %v6754_v5, %v5757_v28  ;;  %4168 = vmatpush.bf16.msrb.mxu0 %v5502_v45  ;;  %v5119_v28 = vld [vmem:[#allocation8 + $0x5f8] sm:$0xf0] }
 0x2c4   :  { %v6013_v40 = vld [vmem:[#allocation8 + $0xcd8] sm:$0xf] }
 0x2c5   :  { %v6818_v55 = vld [vmem:[#allocation8 + $0xcf4] sm:$0xf0]  ;;  %4181 = vmatpush.bf16.msrb.mxu1 %v5758_v49  ;;  %v6518_v49 = vld [vmem:[#allocation8 + $0x39c] sm:$0xf] }
 0x2c6   :  { %v6898_v35 = vld [vmem:[#allocation8 + $0xf74] sm:$0xf0]  ;;  %v6014_v16 = vor.u32 %v6818_v55, %v6013_v40  ;;  %v4866_v40 = vor.u32 %v6526_v62, %v4863_v63  ;;  %v916_v55 = vperm.slane %v7646_v9, 4  ;;  %v4479_v62 = vld [vmem:[#allocation8 + $0xf8] sm:$0xf0]  ;;  %v4770_v63 = vor.u32 %v6502_v31, %v4767_v54 }
 0x2c7   :  { %v5469_v4 = vld [vmem:[#allocation8 + $0x898] sm:$0xf]  ;;  %v6334_v13 = vor.u32 %v6898_v35, %v6333_v23  ;;  %v4575_v23 = vld [vmem:[#allocation8 + $0x1b8] sm:$0xf0] }
 0x2c8   :  { %v6682_v2 = vld [vmem:[#allocation8 + $0x8b4] sm:$0xf0]  ;;  %4194 = vmatpush.bf16.msrb.mxu2 %v6014_v16  ;;  %v4831_v16 = vld [vmem:[#allocation8 + $0x3b8] sm:$0xf0] }
 0x2c9   :  { %v5725_v29 = vld [vmem:[#allocation8 + $0xa98] sm:$0xf]  ;;  %v5470_v7 = vor.u32 %v6682_v2, %v5469_v4  ;;  %4205 = vmatpush.bf16.msrb.mxu3 %v6334_v13  ;;  %v5122_v2 = vor.u32 %v6590_v22, %v5119_v28  ;;  %v4578_v13 = vor.u32 %v6454_v0, %v4575_v23  ;;  %v4735_v22 = vld [vmem:[#allocation8 + $0x2f8] sm:$0xf0] }
 0x2ca   :  { %v6746_v6 = vld [vmem:[#allocation8 + $0xab4] sm:$0xf0]  ;;  %v6558_v23 = vld [vmem:[#allocation8 + $0x4dc] sm:$0xf] }
 0x2cb   :  { %v6301_v14 = vld [vmem:[#allocation8 + $0xf18] sm:$0xf]  ;;  %v5726_v37 = vor.u32 %v6746_v6, %v5725_v29  ;;  %4169 = vmatpush.bf16.msrb.mxu0 %v5470_v7  ;;  %v3941_v29 = vpop.f32.mrf.mxu2  ;;  %v5087_v7 = vld [vmem:[#allocation8 + $0x5b8] sm:$0xf0] }
 0x2cc   :  { %v5981_v26 = vld [vmem:[#allocation8 + $0xc98] sm:$0xf]  ;;  %v6486_v29 = vld [vmem:[#allocation8 + $0x29c] sm:$0xf] }
 0x2cd   :  { %v6810_v11 = vld [vmem:[#allocation8 + $0xcb4] sm:$0xf0]  ;;  %4182 = vmatpush.bf16.msrb.mxu1 %v5726_v37  ;;  %v6718_v31 = vld [vmem:[#allocation8 + $0x9dc] sm:$0xf] }
 0x2ce   :  { %v6890_v20 = vld [vmem:[#allocation8 + $0xf34] sm:$0xf0]  ;;  %v5982_v18 = vor.u32 %v6810_v11, %v5981_v26  ;;  %v7670_v26 = vpop.f32.mrf.mxu3  ;;  %v6446_v11 = vld [vmem:[#allocation8 + $0x15c] sm:$0xf] }
 0x2cf   :  { %v5437_v19 = vld [vmem:[#allocation8 + $0x858] sm:$0xf]  ;;  %v6302_v43 = vor.u32 %v6890_v20, %v6301_v14  ;;  %v6582_v14 = vld [vmem:[#allocation8 + $0x59c] sm:$0xf] }
 0x2d0   :  { %v6674_v36 = vld [vmem:[#allocation8 + $0x874] sm:$0xf0]  ;;  %4195 = vmatpush.bf16.msrb.mxu2 %v5982_v18  ;;  %v4543_v20 = vld [vmem:[#allocation8 + $0x178] sm:$0xf0] }
 0x2d1   :  { %v5693_v10 = vld [vmem:[#allocation8 + $0xa58] sm:$0xf]  ;;  %v5438_v34 = vor.u32 %v6674_v36, %v5437_v19  ;;  %4206 = vmatpush.bf16.msrb.mxu3 %v6302_v43  ;;  %v3914_v19 = vadd.f32 %v7665_v57, %v916_v55  ;;  %v4834_v36 = vor.u32 %v6518_v49, %v4831_v16  ;;  %v4799_v43 = vld [vmem:[#allocation8 + $0x378] sm:$0xf0]  ;;  %v3978_v55 = vpop.f32.mrf.mxu1  ;;  %v3965_v49 = vpop.f32.mrf.mxu0 }
 0x2d2   :  { %v6738_v8 = vld [vmem:[#allocation8 + $0xa74] sm:$0xf0]  ;;  %v6438_v57 = vld [vmem:[#allocation8 + $0x11c] sm:$0xf] }
 0x2d3   :  { %v6269_v15 = vld [vmem:[#allocation8 + $0xed8] sm:$0xf]  ;;  %v5694_v1 = vor.u32 %v6738_v8, %v5693_v10  ;;  %4170 = vmatpush.bf16.msrb.mxu0 %v5438_v34  ;;  %v5090_v10 = vor.u32 %v6582_v14, %v5087_v7  ;;  %v6510_v8 = vld [vmem:[#allocation8 + $0x35c] sm:$0xf]  ;;  %v4546_v34 = vor.u32 %v6446_v11, %v4543_v20 }
 0x2d4   :  { %v5949_v51 = vld [vmem:[#allocation8 + $0xc58] sm:$0xf]  ;;  %v4802_v3 = vor.u32 %v6510_v8, %v4799_v43  ;;  %v6630_v14 = vld [vmem:[#allocation8 + $0x71c] sm:$0xf] }
 0x2d5   :  { %v6802_v24 = vld [vmem:[#allocation8 + $0xc74] sm:$0xf0]  ;;  %4183 = vmatpush.bf16.msrb.mxu1 %v5694_v1  ;;  %v6550_v11 = vld [vmem:[#allocation8 + $0x49c] sm:$0xf] }
 0x2d6   :  { %v6882_v25 = vld [vmem:[#allocation8 + $0xef4] sm:$0xf0]  ;;  %v5950_v46 = vor.u32 %v6802_v24, %v5949_v51  ;;  %v6574_v51 = vld [vmem:[#allocation8 + $0x55c] sm:$0xf] }
 0x2d7   :  { %v5405_v33 = vld [vmem:[#allocation8 + $0x818] sm:$0xf]  ;;  %v6270_v50 = vor.u32 %v6882_v25, %v6269_v15  ;;  %v6654_v15 = vld [vmem:[#allocation8 + $0x7dc] sm:$0xf] }
 0x2d8   :  { %v6666_v53 = vld [vmem:[#allocation8 + $0x834] sm:$0xf0]  ;;  %4196 = vmatpush.bf16.msrb.mxu2 %v5950_v46  ;;  %v5055_v24 = vld [vmem:[#allocation8 + $0x578] sm:$0xf0] }
 0x2d9   :  { %v6237_v12 = vld [vmem:[#allocation8 + $0xe98] sm:$0xf]  ;;  %v5406_v60 = vor.u32 %v6666_v53, %v5405_v33  ;;  %4207 = vmatpush.bf16.msrb.mxu3 %v6270_v50  ;;  %v5375_v25 = vld [vmem:[#allocation8 + $0x7f8] sm:$0xf0]  ;;  %v3927_v53 = vadd.f32 %v7662_v38, %v3914_v19  ;;  %v5058_v17 = vor.u32 %v6574_v51, %v5055_v24  ;;  %v3954_v50 = vpop.f32.mrf.mxu3 }
 0x2da   :  { %v5661_v52 = vld [vmem:[#allocation8 + $0xa18] sm:$0xf]  ;;  %v4511_v33 = vld [vmem:[#allocation8 + $0x138] sm:$0xf0] }
 0x2db   :  { %v6730_v59 = vld [vmem:[#allocation8 + $0xa34] sm:$0xf0]  ;;  %4171 = vmatpush.bf16.msrb.mxu0 %v5406_v60  ;;  %v6646_v46 = vld [vmem:[#allocation8 + $0x79c] sm:$0xf]  ;;  %v3940_v38 = vadd.f32 %v7667_v42, %v3927_v53 }
 0x2dc   :  { %v5917_v56 = vld [vmem:[#allocation8 + $0xc18] sm:$0xf]  ;;  %v5662_v5 = vor.u32 %v6730_v59, %v5661_v52  ;;  %v4514_v52 = vor.u32 %v6438_v57, %v4511_v33  ;;  %v6566_v59 = vld [vmem:[#allocation8 + $0x51c] sm:$0xf] }
 0x2dd   :  { %v6794_v58 = vld [vmem:[#allocation8 + $0xc34] sm:$0xf0]  ;;  %v5343_v60 = vld [vmem:[#allocation8 + $0x7b8] sm:$0xf0]  ;;  %v3953_v42 = vadd.f32 %v7670_v26, %v3940_v38 }
 0x2de   :  { %v6874_v39 = vld [vmem:[#allocation8 + $0xeb4] sm:$0xf0]  ;;  %v5918_v45 = vor.u32 %v6794_v58, %v5917_v56  ;;  %4184 = vmatpush.bf16.msrb.mxu1 %v5662_v5  ;;  %4172 = vmatmul.bf16.vlgmr.msrb.gmra.mxu0 %v7508_v27  ;;  %v5023_v56 = vld [vmem:[#allocation8 + $0x538] sm:$0xf0]  ;;  %v5346_v28 = vor.u32 %v6646_v46, %v5343_v60 }
 0x2df   :  { %v6238_v35 = vor.u32 %v6874_v39, %v6237_v12  ;;  %v6205_v4 = vld [vmem:[#allocation8 + $0xe58] sm:$0xf]  ;;  %4216 = vmatpush.bf16.msra.mxu0 %v4610_v32  ;;  %v5378_v12 = vor.u32 %v6654_v15, %v5375_v25  ;;  %v6430_v58 = vld [vmem:[#allocation8 + $0xdc] sm:$0xf]  ;;  %v5026_v39 = vor.u32 %v6566_v59, %v5023_v56  ;;  %v3966_v26 = vadd.f32 %v3965_v49, %v3953_v42 }
 0x2e0   :  { %v6866_v6 = vld [vmem:[#allocation8 + $0xe74] sm:$0xf0]  ;;  %4197 = vmatpush.bf16.msrb.mxu2 %v5918_v45  ;;  %v6494_v32 = vld [vmem:[#allocation8 + $0x2dc] sm:$0xf]  ;;  %v4482_v0 = vor.u32 %v6430_v58, %v4479_v62 }
 0x2e1   :  { %v6173_v9 = vld [vmem:[#allocation8 + $0xe18] sm:$0xf]  ;;  %4208 = vmatpush.bf16.msrb.mxu3 %v6238_v35  ;;  %v6206_v37 = vor.u32 %v6866_v6, %v6205_v4  ;;  %4185 = vmatmul.bf16.vlgmr.msrb.gmra.mxu1 %v7552_v61  ;;  %v6638_v5 = vld [vmem:[#allocation8 + $0x75c] sm:$0xf] }
 0x2e2   :  { %4229 = vmatpush.bf16.msra.mxu1 %v4866_v40  ;;  %v6858_v18 = vld [vmem:[#allocation8 + $0xe34] sm:$0xf0]  ;;  %v4991_v45 = vld [vmem:[#allocation8 + $0x4f8] sm:$0xf0] }
 0x2e3   :  { %4217 = vmatpush.bf16.msra.mxu0 %v4578_v13  ;;  %4198 = vmatmul.bf16.vlgmr.msrb.gmra.mxu2 %v7513_v21  ;;  %v6174_v1 = vor.u32 %v6858_v18, %v6173_v9  ;;  %v5311_v40 = vld [vmem:[#allocation8 + $0x778] sm:$0xf0]  ;;  %v4994_v16 = vor.u32 %v6558_v23, %v4991_v45 }
 0x2e4   :  { %4242 = vmatpush.bf16.msra.mxu2 %v5122_v2  ;;  %v6422_v35 = vld [vmem:[#allocation8 + $0x9c] sm:$0xf]  ;;  %v4738_v2 = vor.u32 %v6494_v32, %v4735_v22  ;;  %v5314_v13 = vor.u32 %v6638_v5, %v5311_v40 }
 0x2e5   :  { %4209 = vmatpush.bf16.msrb.mxu3 %v6206_v37  ;;  %v4447_v4 = vld [vmem:[#allocation8 + $0xb8] sm:$0xf0] }
 0x2e6   :  { %4230 = vmatpush.bf16.msra.mxu1 %v4834_v36  ;;  %v4703_v6 = vld [vmem:[#allocation8 + $0x2b8] sm:$0xf0]  ;;  %v4450_v7 = vor.u32 %v6422_v35, %v4447_v4 }
 0x2e7   :  { %4218 = vmatpush.bf16.msra.mxu0 %v4546_v34  ;;  %v4959_v20 = vld [vmem:[#allocation8 + $0x4b8] sm:$0xf0]  ;;  %v4706_v37 = vor.u32 %v6486_v29, %v4703_v6  ;;  %v3991_v34 = vpop.f32.mrf.mxu2  ;;  %v4004_v29 = vpop.f32.mrf.mxu3 }
 0x2e8   :  { %4243 = vmatpush.bf16.msra.mxu2 %v5090_v10  ;;  %v5279_v9 = vld [vmem:[#allocation8 + $0x738] sm:$0xf0]  ;;  %v4962_v18 = vor.u32 %v6550_v11, %v4959_v20 }
 0x2e9   :  { %4210 = vmatpush.bf16.msrb.mxu3 %v6174_v1  ;;  %v6414_v19 = vld [vmem:[#allocation8 + $0x5c] sm:$0xf]  ;;  %v5282_v43 = vor.u32 %v6630_v14, %v5279_v9  ;;  %v3979_v1 = vadd.f32 %v3978_v55, %v3966_v26 }
 0x2ea   :  { %4231 = vmatpush.bf16.msra.mxu1 %v4802_v3  ;;  %v4415_v36 = vld [vmem:[#allocation8 + $0x78] sm:$0xf0]  ;;  %v3980_v3 = vpop.f32.mrf.mxu1 }
 0x2eb   :  { %4219 = vmatpush.bf16.msra.mxu0 %v4514_v52  ;;  %v6478_v10 = vld [vmem:[#allocation8 + $0x25c] sm:$0xf]  ;;  %v4418_v51 = vor.u32 %v6414_v19, %v4415_v36  ;;  %v3992_v5 = vadd.f32 %v3991_v34, %v3979_v1 }
 0x2ec   :  { %4244 = vmatpush.bf16.msra.mxu2 %v5058_v17  ;;  %4211 = vmatmul.bf16.vlgmr.msrb.gmra.mxu3 %v7562_v47  ;;  %v4671_v8 = vld [vmem:[#allocation8 + $0x278] sm:$0xf0] }
 0x2ed   :  { %4255 = vmatpush.bf16.msra.mxu3 %v5378_v12  ;;  %v6622_v15 = vld [vmem:[#allocation8 + $0x6dc] sm:$0xf]  ;;  %v4674_v17 = vor.u32 %v6478_v10, %v4671_v8  ;;  %v3967_v12 = vpop.f32.mrf.mxu0  ;;  %v4005_v11 = vadd.f32 %v4004_v29, %v3992_v5 }
 0x2ee   :  { %4232 = vmatpush.bf16.msra.mxu1 %v4770_v63  ;;  %v6542_v24 = vld [vmem:[#allocation8 + $0x45c] sm:$0xf] }
 0x2ef   :  { %4220 = vmatpush.bf16.msra.mxu0 %v4482_v0  ;;  %v4927_v25 = vld [vmem:[#allocation8 + $0x478] sm:$0xf0] }
 0x2f0   :  { %4245 = vmatpush.bf16.msra.mxu2 %v5026_v39  ;;  %v5247_v57 = vld [vmem:[#allocation8 + $0x6f8] sm:$0xf0]  ;;  %v4930_v52 = vor.u32 %v6542_v24, %v4927_v25 }
 0x2f1   :  { %4256 = vmatpush.bf16.msra.mxu3 %v5346_v28  ;;  %v6406_v33 = vld [vmem:[#allocation8 + $0x1c] sm:$0xf]  ;;  %v5250_v60 = vor.u32 %v6622_v15, %v5247_v57 }
 0x2f2   :  { %4233 = vmatpush.bf16.msra.mxu1 %v4738_v2  ;;  %v4383_v53 = vld [vmem:[#allocation8 + $0x38] sm:$0xf0] }
 0x2f3   :  { %4221 = vmatpush.bf16.msra.mxu0 %v4450_v7  ;;  %v5631_v54 = vld [vmem:[#allocation8 + $0x9f8] sm:$0xf0]  ;;  %v4386_v58 = vor.u32 %v6406_v33, %v4383_v53 }
 0x2f4   :  { %4246 = vmatpush.bf16.msra.mxu2 %v4994_v16  ;;  %v6614_v46 = vld [vmem:[#allocation8 + $0x69c] sm:$0xf]  ;;  %v5634_v32 = vor.u32 %v6718_v31, %v5631_v54  ;;  %v3993_v16 = vpop.f32.mrf.mxu2 }
 0x2f5   :  { %4257 = vmatpush.bf16.msra.mxu3 %v5314_v13  ;;  %v6470_v59 = vld [vmem:[#allocation8 + $0x21c] sm:$0xf] }
 0x2f6   :  { %4234 = vmatpush.bf16.msra.mxu1 %v4706_v37  ;;  %v4639_v56 = vld [vmem:[#allocation8 + $0x238] sm:$0xf0]  ;;  %v4324_v37 = vmax.f32 %v4005_v11, 0.0 }
 0x2f7   :  { %v6534_v50 = vld [vmem:[#allocation8 + $0x41c] sm:$0xf]  ;;  %4222 = vmatpush.bf16.msra.mxu0 %v4418_v51  ;;  %v4642_v0 = vor.u32 %v6470_v59, %v4639_v56  ;;  %v4006_v59 = vpop.f32.mrf.mxu3 }
 0x2f8   :  { %4247 = vmatpush.bf16.msra.mxu2 %v4962_v18  ;;  %v4895_v62 = vld [vmem:[#allocation8 + $0x438] sm:$0xf0]  ;;  %4332 = vst [vmem:[#allocation11 + $0x20] sm:$0xff] %v4324_v37 }
 0x2f9   :  { %4258 = vmatpush.bf16.msra.mxu3 %v5282_v43  ;;  %v6782_v38 = vld [vmem:[#allocation8 + $0xbdc] sm:$0xf]  ;;  %v4898_v40 = vor.u32 %v6534_v50, %v4895_v62 }
 0x2fa   :  { %v5887_v63 = vld [vmem:[#allocation8 + $0xbf8] sm:$0xf0]  ;;  %4235 = vmatpush.bf16.msra.mxu1 %v4674_v17 }
 0x2fb   :  { %v5215_v39 = vld [vmem:[#allocation8 + $0x6b8] sm:$0xf0]  ;;  %v5890_v55 = vor.u32 %v6782_v38, %v5887_v63  ;;  %4223 = vmatpush.bf16.msra.mxu0 %v4386_v58 }
 0x2fc   :  { %v6846_v22 = vld [vmem:[#allocation8 + $0xddc] sm:$0xf]  ;;  %4248 = vmatpush.bf16.msra.mxu2 %v4930_v52  ;;  %v5218_v35 = vor.u32 %v6614_v46, %v5215_v39 }
 0x2fd   :  { %v6143_v28 = vld [vmem:[#allocation8 + $0xdf8] sm:$0xf0]  ;;  %4259 = vmatpush.bf16.msra.mxu3 %v5250_v60 }
 0x2fe   :  { %v6710_v23 = vld [vmem:[#allocation8 + $0x99c] sm:$0xf]  ;;  %v6146_v42 = vor.u32 %v6846_v22, %v6143_v28  ;;  %4236 = vmatpush.bf16.msra.mxu1 %v4642_v0  ;;  %4224 = vmatmul.bf16.vlgmr.msra.gmra.mxu0 %v7457_v44 }
 0x2ff   :  { %v5599_v45 = vld [vmem:[#allocation8 + $0x9b8] sm:$0xf0]  ;;  %4268 = vmatpush.bf16.msrb.mxu0 %v5634_v32 }
 0x300   :  { %v6606_v4 = vld [vmem:[#allocation8 + $0x65c] sm:$0xf]  ;;  %v5602_v13 = vor.u32 %v6710_v23, %v5599_v45  ;;  %4249 = vmatpush.bf16.msra.mxu2 %v4898_v40  ;;  %v7683_v23 = vpop.f32.mrf.mxu1  ;;  %v7686_v40 = vpop.f32.mrf.mxu0 }
 0x301   :  { %v6774_v2 = vld [vmem:[#allocation8 + $0xb9c] sm:$0xf]  ;;  %4260 = vmatpush.bf16.msra.mxu3 %v5218_v35  ;;  %4237 = vmatmul.bf16.vlgmr.msra.gmra.mxu1 %v7461_v30 }
 0x302   :  { %v5855_v49 = vld [vmem:[#allocation8 + $0xbb8] sm:$0xf0]  ;;  %4281 = vmatpush.bf16.msrb.mxu1 %v5890_v55 }
 0x303   :  { %v5183_v6 = vld [vmem:[#allocation8 + $0x678] sm:$0xf0]  ;;  %v5858_v26 = vor.u32 %v6774_v2, %v5855_v49  ;;  %4269 = vmatpush.bf16.msrb.mxu0 %v5602_v13  ;;  %4250 = vmatmul.bf16.vlgmr.msra.gmra.mxu2 %v7467_v41 }
 0x304   :  { %v6838_v14 = vld [vmem:[#allocation8 + $0xd9c] sm:$0xf]  ;;  %v5186_v18 = vor.u32 %v6606_v4, %v5183_v6  ;;  %4294 = vmatpush.bf16.msrb.mxu2 %v6146_v42 }
 0x305   :  { %v6111_v7 = vld [vmem:[#allocation8 + $0xdb8] sm:$0xf0] }
 0x306   :  { %v6702_v20 = vld [vmem:[#allocation8 + $0x95c] sm:$0xf]  ;;  %v6114_v8 = vor.u32 %v6838_v14, %v6111_v7  ;;  %4282 = vmatpush.bf16.msrb.mxu1 %v5858_v26  ;;  %4261 = vmatpush.bf16.msra.mxu3 %v5186_v18  ;;  %v4043_v18 = vpop.f32.mrf.mxu2 }
 0x307   :  { %v5567_v9 = vld [vmem:[#allocation8 + $0x978] sm:$0xf0] }
 0x308   :  { %v6598_v19 = vld [vmem:[#allocation8 + $0x61c] sm:$0xf]  ;;  %v5570_v51 = vor.u32 %v6702_v20, %v5567_v9  ;;  %4295 = vmatpush.bf16.msrb.mxu2 %v6114_v8 }
 0x309   :  { %v5151_v36 = vld [vmem:[#allocation8 + $0x638] sm:$0xf0] }
 0x30a   :  { %v6910_v10 = vld [vmem:[#allocation8 + $0xfdc] sm:$0xf]  ;;  %v5154_v3 = vor.u32 %v6598_v19, %v5151_v36  ;;  %4270 = vmatpush.bf16.msrb.mxu0 %v5570_v51  ;;  %v4019_v51 = vpop.f32.mrf.mxu0 }
 0x30b   :  { %v6766_v43 = vld [vmem:[#allocation8 + $0xb5c] sm:$0xf] }
 0x30c   :  { %v5823_v15 = vld [vmem:[#allocation8 + $0xb78] sm:$0xf0]  ;;  %4262 = vmatpush.bf16.msra.mxu3 %v5154_v3 }
 0x30d   :  { %v6399_v34 = vld [vmem:[#allocation8 + $0xff8] sm:$0xf0]  ;;  %v5826_v53 = vor.u32 %v6766_v43, %v5823_v15  ;;  %v4032_v15 = vpop.f32.mrf.mxu1 }
 0x30e   :  { %v6830_v24 = vld [vmem:[#allocation8 + $0xd5c] sm:$0xf]  ;;  %v6402_v54 = vor.u32 %v6910_v10, %v6399_v34  ;;  %v4045_v59 = vpop.f32.mrf.mxu2 }
 0x30f   :  { %v6079_v25 = vld [vmem:[#allocation8 + $0xd78] sm:$0xf0]  ;;  %4283 = vmatpush.bf16.msrb.mxu1 %v5826_v53  ;;  %4263 = vmatmul.bf16.vlgmr.msra.gmra.mxu3 %v7479_v48 }
 0x310   :  { %v6694_v57 = vld [vmem:[#allocation8 + $0x91c] sm:$0xf]  ;;  %v6082_v1 = vor.u32 %v6830_v24, %v6079_v25  ;;  %4307 = vmatpush.bf16.msrb.mxu3 %v6402_v54 }
 0x311   :  { %v5535_v33 = vld [vmem:[#allocation8 + $0x938] sm:$0xf0] }
 0x312   :  { %v6758_v17 = vld [vmem:[#allocation8 + $0xb1c] sm:$0xf]  ;;  %v5538_v46 = vor.u32 %v6694_v57, %v5535_v33  ;;  %4296 = vmatpush.bf16.msrb.mxu2 %v6082_v1 }
 0x313   :  { %v5791_v31 = vld [vmem:[#allocation8 + $0xb38] sm:$0xf0] }
 0x314   :  { %v6902_v12 = vld [vmem:[#allocation8 + $0xf9c] sm:$0xf]  ;;  %v5794_v50 = vor.u32 %v6758_v17, %v5791_v31  ;;  %4271 = vmatpush.bf16.msrb.mxu0 %v5538_v46  ;;  %v7688_v46 = vld [vmem:[#allocation10] sm:$0xff] }
 0x315   :  { %v6822_v30 = vld [vmem:[#allocation8 + $0xd1c] sm:$0xf] }
 0x316   :  { %v6047_v52 = vld [vmem:[#allocation8 + $0xd38] sm:$0xf0]  ;;  %4284 = vmatpush.bf16.msrb.mxu1 %v5794_v50 }
 0x317   :  { %v6367_v41 = vld [vmem:[#allocation8 + $0xfb8] sm:$0xf0]  ;;  %v6050_v60 = vor.u32 %v6822_v30, %v6047_v52  ;;  %v917_v30 = vperm.slane %v7688_v46, 5 }
 0x318   :  { %v6686_v56 = vld [vmem:[#allocation8 + $0x8dc] sm:$0xf]  ;;  %v6370_v38 = vor.u32 %v6902_v12, %v6367_v41 }
 0x319   :  { %v5503_v44 = vld [vmem:[#allocation8 + $0x8f8] sm:$0xf0]  ;;  %4297 = vmatpush.bf16.msrb.mxu2 %v6050_v60  ;;  %v4018_v50 = vadd.f32 %v7686_v40, %v917_v30 }
 0x31a   :  { %v6750_v58 = vld [vmem:[#allocation8 + $0xadc] sm:$0xf]  ;;  %v5506_v39 = vor.u32 %v6686_v56, %v5503_v44  ;;  %4308 = vmatpush.bf16.msrb.mxu3 %v6370_v38  ;;  %v4056_v44 = vpop.f32.mrf.mxu3 }
 0x31b   :  { %v5759_v62 = vld [vmem:[#allocation8 + $0xaf8] sm:$0xf0]  ;;  %v4031_v38 = vadd.f32 %v7683_v23, %v4018_v50 }
 0x31c   :  { %v6894_v63 = vld [vmem:[#allocation8 + $0xf5c] sm:$0xf]  ;;  %v5762_v45 = vor.u32 %v6750_v58, %v5759_v62  ;;  %4272 = vmatpush.bf16.msrb.mxu0 %v5506_v39 }
 0x31d   :  { %v6814_v32 = vld [vmem:[#allocation8 + $0xcdc] sm:$0xf] }
 0x31e   :  { %v6015_v22 = vld [vmem:[#allocation8 + $0xcf8] sm:$0xf0]  ;;  %4285 = vmatpush.bf16.msrb.mxu1 %v5762_v45 }
 0x31f   :  { %v6335_v28 = vld [vmem:[#allocation8 + $0xf78] sm:$0xf0]  ;;  %v6018_v55 = vor.u32 %v6814_v32, %v6015_v22  ;;  %v4044_v32 = vadd.f32 %v4043_v18, %v4031_v38  ;;  %v4082_v22 = vpop.f32.mrf.mxu1 }
 0x320   :  { %v6678_v5 = vld [vmem:[#allocation8 + $0x89c] sm:$0xf]  ;;  %v6338_v42 = vor.u32 %v6894_v63, %v6335_v28 }
 0x321   :  { %v5471_v0 = vld [vmem:[#allocation8 + $0x8b8] sm:$0xf0]  ;;  %4298 = vmatpush.bf16.msrb.mxu2 %v6018_v55  ;;  %v4057_v28 = vadd.f32 %v4056_v44, %v4044_v32 }
 0x322   :  { %v6742_v35 = vld [vmem:[#allocation8 + $0xa9c] sm:$0xf]  ;;  %v5474_v49 = vor.u32 %v6678_v5, %v5471_v0  ;;  %4309 = vmatpush.bf16.msrb.mxu3 %v6338_v42  ;;  %v4058_v39 = vpop.f32.mrf.mxu3  ;;  %v4095_v0 = vpop.f32.mrf.mxu2 }
 0x323   :  { %v5727_v4 = vld [vmem:[#allocation8 + $0xab8] sm:$0xf0] }
 0x324   :  { %v6886_v2 = vld [vmem:[#allocation8 + $0xf1c] sm:$0xf]  ;;  %v5730_v48 = vor.u32 %v6742_v35, %v5727_v4  ;;  %4273 = vmatpush.bf16.msrb.mxu0 %v5474_v49 }
 0x325   :  { %v6806_v16 = vld [vmem:[#allocation8 + $0xc9c] sm:$0xf] }
 0x326   :  { %v5983_v29 = vld [vmem:[#allocation8 + $0xcb8] sm:$0xf0]  ;;  %4286 = vmatpush.bf16.msrb.mxu1 %v5730_v48 }
 0x327   :  { %v6303_v6 = vld [vmem:[#allocation8 + $0xf38] sm:$0xf0]  ;;  %v5986_v7 = vor.u32 %v6806_v16, %v5983_v29  ;;  %v4084_v45 = vpop.f32.mrf.mxu1 }
 0x328   :  { %v6670_v13 = vld [vmem:[#allocation8 + $0x85c] sm:$0xf]  ;;  %v6306_v9 = vor.u32 %v6886_v2, %v6303_v6 }
 0x329   :  { %v5439_v14 = vld [vmem:[#allocation8 + $0x878] sm:$0xf0]  ;;  %4299 = vmatpush.bf16.msrb.mxu2 %v5986_v7 }
 0x32a   :  { %v6734_v11 = vld [vmem:[#allocation8 + $0xa5c] sm:$0xf]  ;;  %v5442_v36 = vor.u32 %v6670_v13, %v5439_v14  ;;  %4310 = vmatpush.bf16.msrb.mxu3 %v6306_v9  ;;  %v4097_v35 = vpop.f32.mrf.mxu2 }
 0x32b   :  { %v5695_v20 = vld [vmem:[#allocation8 + $0xa78] sm:$0xf0] }
 0x32c   :  { %v6878_v19 = vld [vmem:[#allocation8 + $0xedc] sm:$0xf]  ;;  %v5698_v34 = vor.u32 %v6734_v11, %v5695_v20  ;;  %4274 = vmatpush.bf16.msrb.mxu0 %v5442_v36 }
 0x32d   :  { %v6798_v26 = vld [vmem:[#allocation8 + $0xc5c] sm:$0xf] }
 0x32e   :  { %v5951_v37 = vld [vmem:[#allocation8 + $0xc78] sm:$0xf0]  ;;  %4287 = vmatpush.bf16.msrb.mxu1 %v5698_v34 }
 0x32f   :  { %v6271_v10 = vld [vmem:[#allocation8 + $0xef8] sm:$0xf0]  ;;  %v5954_v24 = vor.u32 %v6798_v26, %v5951_v37  ;;  %v4134_v2 = vpop.f32.mrf.mxu1 }
 0x330   :  { %v6662_v8 = vld [vmem:[#allocation8 + $0x81c] sm:$0xf]  ;;  %v6274_v33 = vor.u32 %v6878_v19, %v6271_v10 }
 0x331   :  { %v5407_v43 = vld [vmem:[#allocation8 + $0x838] sm:$0xf0]  ;;  %4300 = vmatpush.bf16.msrb.mxu2 %v5954_v24 }
 0x332   :  { %v6726_v25 = vld [vmem:[#allocation8 + $0xa1c] sm:$0xf]  ;;  %v5410_v53 = vor.u32 %v6662_v8, %v5407_v43  ;;  %4311 = vmatpush.bf16.msrb.mxu3 %v6274_v33  ;;  %v4147_v16 = vpop.f32.mrf.mxu2 }
 0x333   :  { %v5663_v57 = vld [vmem:[#allocation8 + $0xa38] sm:$0xf0] }
 0x334   :  { %v6790_v3 = vld [vmem:[#allocation8 + $0xc1c] sm:$0xf]  ;;  %v5666_v54 = vor.u32 %v6726_v25, %v5663_v57  ;;  %4275 = vmatpush.bf16.msrb.mxu0 %v5410_v53 }
 0x335   :  { %v5919_v1 = vld [vmem:[#allocation8 + $0xc38] sm:$0xf0] }
 0x336   :  { %v6870_v17 = vld [vmem:[#allocation8 + $0xe9c] sm:$0xf]  ;;  %v5922_v12 = vor.u32 %v6790_v3, %v5919_v1  ;;  %4288 = vmatpush.bf16.msrb.mxu1 %v5666_v54  ;;  %v919_v54 = vperm.slane %v7688_v46, 7 }
 0x337   :  { %v6239_v31 = vld [vmem:[#allocation8 + $0xeb8] sm:$0xf0]  ;;  %4276 = vmatmul.bf16.vlgmr.msrb.gmra.mxu0 %v7508_v27  ;;  %v4069_v27 = vpop.f32.mrf.mxu0  ;;  %v4136_v29 = vpop.f32.mrf.mxu1 }
 0x338   :  { %v6242_v52 = vor.u32 %v6870_v17, %v6239_v31  ;;  %v6862_v41 = vld [vmem:[#allocation8 + $0xe5c] sm:$0xf]  ;;  %4301 = vmatpush.bf16.msrb.mxu2 %v5922_v12  ;;  %v4070_v5 = vadd.f32 %v4069_v27, %v4057_v28 }
 0x339   :  { %v6207_v56 = vld [vmem:[#allocation8 + $0xe78] sm:$0xf0]  ;;  %4289 = vmatmul.bf16.vlgmr.msrb.gmra.mxu1 %v7552_v61 }
 0x33a   :  { %4312 = vmatpush.bf16.msrb.mxu3 %v6242_v52  ;;  %v6210_v60 = vor.u32 %v6862_v41, %v6207_v56  ;;  %v6854_v58 = vld [vmem:[#allocation8 + $0xe1c] sm:$0xf]  ;;  %v4083_v40 = vadd.f32 %v4082_v22, %v4070_v5  ;;  %v4149_v13 = vpop.f32.mrf.mxu2 }
 0x33b   :  { %v6175_v62 = vld [vmem:[#allocation8 + $0xe38] sm:$0xf0]  ;;  %4302 = vmatmul.bf16.vlgmr.msrb.gmra.mxu2 %v7513_v21  ;;  %v4108_v21 = vpop.f32.mrf.mxu3 }
 0x33c   :  { %v6178_v63 = vor.u32 %v6854_v58, %v6175_v62  ;;  %v4096_v61 = vadd.f32 %v4095_v0, %v4083_v40 }
 0x33e   :  { %4313 = vmatpush.bf16.msrb.mxu3 %v6210_v60  ;;  %v4109_v4 = vadd.f32 %v4108_v21, %v4096_v61 }
 0x33f   :  { %v4071_v55 = vpop.f32.mrf.mxu0 }
 0x340   :  { %v4325_v23 = vmax.f32 %v4109_v4, 0.0 }
 0x342   :  { %4314 = vmatpush.bf16.msrb.mxu3 %v6178_v63  ;;  %4333 = vst [vmem:[#allocation11 + $0x28] sm:$0xff] %v4325_v23 }
 0x343   :  { %v4110_v42 = vpop.f32.mrf.mxu3 }
 0x345   :  { %4315 = vmatmul.bf16.vlgmr.msrb.gmra.mxu3 %v7562_v47  ;;  %v918_v47 = vperm.slane %v7688_v46, 6 }
 0x347   :  { %v4121_v49 = vpop.f32.mrf.mxu0 }
 0x348   :  { %v4122_v48 = vadd.f32 %v4121_v49, %v918_v47 }
 0x34a   :  { %v4135_v7 = vadd.f32 %v4134_v2, %v4122_v48 }
 0x34b   :  { %v4160_v14 = vpop.f32.mrf.mxu3 }
 0x34c   :  { %v4148_v20 = vadd.f32 %v4147_v16, %v4135_v7 }
 0x34e   :  { %v4161_v19 = vadd.f32 %v4160_v14, %v4148_v20 }
 0x34f   :  { %v4123_v6 = vpop.f32.mrf.mxu0 }
 0x353   :  { %v4162_v11 = vpop.f32.mrf.mxu3 }
 0x35b   :  { %v4173_v36 = vpop.f32.mrf.mxu0 }
 0x35c   :  { %v4174_v26 = vadd.f32 %v4173_v36, %v4161_v19 }
 0x35e   :  { %v4186_v9 = vpop.f32.mrf.mxu1 }
 0x35f   :  { %v4187_v10 = vadd.f32 %v4186_v9, %v4174_v26 }
 0x363   :  { %v4175_v8 = vpop.f32.mrf.mxu0 }
 0x366   :  { %v4199_v37 = vpop.f32.mrf.mxu2  ;;  %v4188_v18 = vpop.f32.mrf.mxu1 }
 0x367   :  { %v4200_v43 = vadd.f32 %v4199_v37, %v4187_v10 }
 0x36e   :  { %v4201_v15 = vpop.f32.mrf.mxu2 }
 0x36f   :  { %v4212_v34 = vpop.f32.mrf.mxu3 }
 0x370   :  { %v4213_v51 = vadd.f32 %v4212_v34, %v4200_v43 }
 0x372   :  { %v4326_v24 = vmax.f32 %v4213_v51, 0.0 }
 0x374   :  { %4334 = vst [vmem:[#allocation11 + $0x30] sm:$0xff] %v4326_v24 }
 0x377   :  { %v4214_v25 = vpop.f32.mrf.mxu3 }
 0x37b   :  { %v4225_v33 = vpop.f32.mrf.mxu0 }
 0x37c   :  { %v4226_v12 = vadd.f32 %v4225_v33, %v919_v54 }
 0x37e   :  { %v4238_v57 = vpop.f32.mrf.mxu1 }
 0x37f   :  { %v4239_v52 = vadd.f32 %v4238_v57, %v4226_v12 }
 0x383   :  { %v4227_v1 = vpop.f32.mrf.mxu0 }
 0x386   :  { %v4251_v53 = vpop.f32.mrf.mxu2  ;;  %v4240_v3 = vpop.f32.mrf.mxu1 }
 0x387   :  { %v4252_v56 = vadd.f32 %v4251_v53, %v4239_v52 }
 0x38e   :  { %v4253_v17 = vpop.f32.mrf.mxu2 }
 0x392   :  { %v4264_v31 = vpop.f32.mrf.mxu3 }
 0x393   :  { %v4265_v44 = vadd.f32 %v4264_v31, %v4252_v56 }
 0x39a   :  { %v4266_v30 = vpop.f32.mrf.mxu3 }
 0x3b4   :  { %v4277_v59 = vpop.f32.mrf.mxu0 }
 0x3b5   :  { %v4278_v60 = vadd.f32 %v4277_v59, %v4265_v44 }
 0x3b6   :  { %v4290_v41 = vpop.f32.mrf.mxu1 }
 0x3b7   :  { %v4291_v38 = vadd.f32 %v4290_v41, %v4278_v60 }
 0x3bc   :  { %v4279_v50 = vpop.f32.mrf.mxu0 }
 0x3be   :  { %v4303_v58 = vpop.f32.mrf.mxu2  ;;  %v4292_v62 = vpop.f32.mrf.mxu1 }
 0x3bf   :  { %v4304_v63 = vadd.f32 %v4303_v58, %v4291_v38 }
 0x3c6   :  { %v4305_v39 = vpop.f32.mrf.mxu2 }
 0x3c8   :  { %v4316_v32 = vpop.f32.mrf.mxu3 }
 0x3c9   :  { %v4317_v46 = vadd.f32 %v4316_v32, %v4304_v63 }
 0x3cb   :  { %v4327_v22 = vmax.f32 %v4317_v46, 0.0 }
 0x3cd   :  { %4335 = vst [vmem:[#allocation11 + $0x38] sm:$0xff] %v4327_v22 }
 0x3ce   :  { %4346 = dma.vmem_to_hbm [thread:$0]  %s4342_s4, 1024, %s4344_s19, [#allocation4]  }
 0x3d0   :  { %v4318_v28 = vpop.f32.mrf.mxu3 }
 0x3d1   :  { %7094 = dma.done.wait [#allocation4], 1024  }
 0x3d2   :  { %7095 = vsyncadd [#allocation4], 4294966272 }
 0x3d3   :  { %4351 = vsyncpa [#allocation3], 1 }
 0x3d4   :  { %4352 = vsyncpa [#allocation6], 1 }
 0x3d5   :  { %4353 = vsyncpa [#allocation9], 1 }
 0x3d6   :  { %4354 = vsyncpa [#allocation4], 1 }

</bundles_post_ra>
